<compile_context>
chip_gen: v5e
topology: v5e:2x2
jax: 0.10.0
libtpu: 0.0.40
codegen_flags: <defaults>
</compile_context>

<pallas_src>
import functools

import jax
import jax.numpy as jnp
from jax import lax
from jax.experimental import pallas as pl
from jax.experimental.pallas import tpu as pltpu


def _largest_divisor_leq(n, cap):
    for d in range(min(n, max(cap, 1)), 0, -1):
        if n % d == 0:
            return d
    return 1


def _vmem_limit_bytes():
    # ~3/4 of physical VMEM: ~96 MiB on v5e/v6e (128 MiB), ~48 MiB on v7x (64 MiB).
    try:
        cap = int(pltpu.get_tpu_info().vmem_capacity_bytes)
    except Exception:
        cap = 64 * 1024 * 1024
    return max(32 * 1024 * 1024, min((cap * 3) // 4, 100 * 1024 * 1024))


# --------------------------- pass 1: conv + BN statistics -------------------
def _conv_stats_kernel(x_ref, w_ref, y_ref, sum_ref, sq_ref, patch_ref, *,
                       kh, kw, th, wo, cin, cout, stride):
    # x_ref:     (1, Hp, Wp, Cin)   bf16  whole padded image of this batch item
    # w_ref:     (kh*kw*Cin, Cout)  bf16  im2col-ordered weights
    # y_ref:     (1, th, Wo, Cout)  bf16  conv-output tile (bias-free, see wrapper)
    # sum_ref:   (1, 1, 1, Cout)    f32   per-tile channel sum
    # sq_ref:    (1, 1, 1, Cout)    f32   per-tile channel sum of squares
    # patch_ref: (th*Wo, kh*kw*Cin) bf16  VMEM im2col scratch
    t = pl.program_id(1)
    r0 = t * (th * stride)                      # first padded-input row of tile

    # Pack the kh*kw shifted windows into one im2col patch so the whole conv
    # tile is a single MXU matmul with K = kh*kw*cin.
    for di in range(kh):
        for dj in range(kw):
            if stride == 1:
                win = x_ref[0, pl.ds(r0 + di, th), pl.ds(dj, wo), :]
            else:
                # TODO(synk): for stride 2, pre-split W phases (space-to-depth)
                # in the wrapper so these strided slices become dense loads.
                win = x_ref[0, pl.ds(r0 + di, th, stride),
                            pl.ds(dj, wo, stride), :]
            k = di * kw + dj
            patch_ref[:, pl.ds(k * cin, cin)] = win.reshape(th * wo, cin)

    acc = jnp.dot(patch_ref[...], w_ref[...],
                  preferred_element_type=jnp.float32)        # (th*wo, Cout) f32

    y_ref[0] = acc.reshape(th, wo, cout).astype(y_ref.dtype)
    sum_ref[0, 0] = jnp.sum(acc, axis=0, keepdims=True)       # (1, Cout)
    sq_ref[0, 0] = jnp.sum(acc * acc, axis=0, keepdims=True)  # (1, Cout)


# ------------- pass 2: BN affine + LeakyReLU + 2x bilinear upsample ---------
def _bn_act_upsample_kernel(y_ref, prev_ref, next_ref, scale_ref, shift_ref,
                            out_ref, *, th, wo, cout, neg):
    # y_ref:    (1, th, Wo, Cout) bf16  conv tile
    # prev_ref: (1, 1, Wo, Cout)  bf16  conv row (t*th - 1), clamped (edge replicate)
    # next_ref: (1, 1, Wo, Cout)  bf16  conv row ((t+1)*th), clamped
    # out_ref:  (1, 2, 2, th, Wo, Cout) f32; dims 1/2 = H-parity / W-parity
    sc = scale_ref[...]                 # (1, Cout)  gamma * rstd
    sh = shift_ref[...]                 # (1, Cout)  beta - mean * gamma * rstd

    def bn_act(v):
        v = v.astype(jnp.float32) * sc + sh
        return jnp.where(v >= 0.0, v, neg * v)

    y = bn_act(y_ref[0])                # (th, Wo, Cout)
    yp = bn_act(prev_ref[0])            # (1, Wo, Cout)
    yn = bn_act(next_ref[0])

    if th > 1:
        up = jnp.concatenate([yp, y[:th - 1]], axis=0)   # y[i-1]
        dn = jnp.concatenate([y[1:], yn], axis=0)        # y[i+1]
    else:
        up, dn = yp, yn

    # bilinear x2 along H (align_corners=False): output rows 2i / 2i+1
    r_even = y + 0.25 * (up - y)        # 0.75*y[i] + 0.25*y[i-1]
    r_odd = y + 0.25 * (dn - y)         # 0.75*y[i] + 0.25*y[i+1]

    # bilinear x2 along W: neighbours via sublane roll (XLU) + edge fix
    col = lax.broadcasted_iota(jnp.int32, (th, wo, cout), 1)

    def wblend(rows):
        left = jnp.where(col == 0, rows, pltpu.roll(rows, 1, axis=1))          # j-1
        right = jnp.where(col == wo - 1, rows, pltpu.roll(rows, wo - 1, axis=1))  # j+1
        return rows + 0.25 * (left - rows), rows + 0.25 * (right - rows)

    e_l, e_r = wblend(r_even)
    o_l, o_r = wblend(r_odd)
    # Write the four upsample phases directly (no stack+reshape tile copy); the
    # H/W interleave rides on the final NCHW transpose in the wrapper.
    out_ref[0, 0, 0] = e_l.astype(out_ref.dtype)   # rows 2i,   cols 2j
    out_ref[0, 0, 1] = e_r.astype(out_ref.dtype)   # rows 2i,   cols 2j+1
    out_ref[0, 1, 0] = o_l.astype(out_ref.dtype)   # rows 2i+1, cols 2j
    out_ref[0, 1, 1] = o_r.astype(out_ref.dtype)   # rows 2i+1, cols 2j+1


def upsampling_block(x_nchw, conv_w, conv_b, bn_gamma, bn_beta, *,
                     stride, padding, eps=1e-5, negative_slope=0.1):
    n, cin, h, w = x_nchw.shape
    cout, cin_w, kh, kw = conv_w.shape
    assert cin_w == cin
    ho = (h + 2 * padding - kh) // stride + 1
    wo = (w + 2 * padding - kw) // stride + 1
    hp, wp = h + 2 * padding, w + 2 * padding
    kdim = kh * kw * cin
    # Row tiles: pass 1 targets matmul M = th1*wo ~ 256-512; pass 2 (pure
    # element-wise + stores) uses larger tiles.
    th1 = _largest_divisor_leq(ho, max(1, 512 // max(wo, 1)))
    th2 = _largest_divisor_leq(ho, max(1, 2048 // max(wo, 1)))
    nt1, nt2 = ho // th1, ho // th2
    vmem_limit = _vmem_limit_bytes()

    # glue: NCHW -> NHWC, zero-pad spatially, bf16 for MXU + halved input DMA.
    # TODO(synk): for cin << 128 the input stays lane-sparse; folding cin with
    # the kw window (wrapper-side repack) would make window loads lane-dense.
    x = jnp.transpose(x_nchw, (0, 2, 3, 1))
    xp = jnp.pad(x, ((0, 0), (padding, padding), (padding, padding), (0, 0)))
    xp = xp.astype(jnp.bfloat16)
    # OIHW -> im2col-ordered (kh*kw*cin, cout), bf16.  No 128-channel padding:
    # all HBM tensors carry exactly cout channels (intended regime is
    # cout >= 128; small cout still works, just under-fills MXU N / lanes).
    wk = jnp.transpose(conv_w, (2, 3, 1, 0)).reshape(kdim, cout)
    wk = wk.astype(jnp.bfloat16)
    # NOTE: conv bias intentionally unused -- it cancels exactly in (y - mean)
    # under training-mode BatchNorm (kept in the signature for API parity).
    del conv_b

    # ---------------- pass 1: conv + per-tile channel sums ------------------
    k1 = functools.partial(_conv_stats_kernel, kh=kh, kw=kw, th=th1, wo=wo,
                           cin=cin, cout=cout, stride=stride)
    bytes1 = (xp.size * 2 + wk.size * 2 + n * ho * wo * cout * 2
              + 2 * n * nt1 * cout * 4)
    y_conv, csum, csq = pl.pallas_call(
        k1,
        out_shape=(jax.ShapeDtypeStruct((n, ho, wo, cout), jnp.bfloat16),
                   jax.ShapeDtypeStruct((n, nt1, 1, cout), jnp.float32),
                   jax.ShapeDtypeStruct((n, nt1, 1, cout), jnp.float32)),
        grid=(n, nt1),
        in_specs=[
            # TODO(synk): for very large Hp*Wp*Cin (esp. v7x, 64 MiB VMEM),
            # replace the per-image resident block with per-tile halo rows via
            # manual pltpu.make_async_copy double-buffering.
            pl.BlockSpec((1, hp, wp, cin), lambda b, t: (b, 0, 0, 0)),
            pl.BlockSpec((kdim, cout), lambda b, t: (0, 0)),
        ],
        out_specs=(
            pl.BlockSpec((1, th1, wo, cout), lambda b, t: (b, t, 0, 0)),
            pl.BlockSpec((1, 1, 1, cout), lambda b, t: (b, t, 0, 0)),
            pl.BlockSpec((1, 1, 1, cout), lambda b, t: (b, t, 0, 0)),
        ),
        scratch_shapes=[pltpu.VMEM((th1 * wo, kdim), jnp.bfloat16)],
        compiler_params=pltpu.CompilerParams(
            dimension_semantics=("parallel", "parallel"),
            vmem_limit_bytes=vmem_limit),
        cost_estimate=pl.CostEstimate(
            flops=2 * n * ho * wo * kdim * cout,
            transcendentals=0, bytes_accessed=bytes1),
    )(xp, wk)

    # tiny finalize (2*cout floats): fold BN stats + gamma/beta into scale/shift.
    cnt = float(n * ho * wo)
    ssum = jnp.sum(csum, axis=(0, 1, 2))
    ssq = jnp.sum(csq, axis=(0, 1, 2))
    mean = ssum / cnt
    # TODO(synk): E[x^2]-E[x]^2 in f32 can cancel for large-mean activations;
    # a shifted / Welford-style accumulation would be more robust.
    var = jnp.maximum(ssq / cnt - mean * mean, 0.0)   # biased var (training BN)
    rstd = lax.rsqrt(var + eps)
    gam = bn_gamma.astype(jnp.float32)
    bet = bn_beta.astype(jnp.float32)
    scale = (gam * rstd).reshape(1, cout)
    shift = (bet - mean * gam * rstd).reshape(1, cout)

    # --------- pass 2: BN affine + LeakyReLU + 2x bilinear upsample ---------
    k2 = functools.partial(_bn_act_upsample_kernel, th=th2, wo=wo, cout=cout,
                           neg=negative_slope)
    bytes2 = (n * ho * wo * cout * 2 * 2 + n * 4 * ho * wo * cout * 4
              + 2 * cout * 4)
    out6 = pl.pallas_call(
        k2,
        out_shape=jax.ShapeDtypeStruct((n, 2, 2, ho, wo, cout), jnp.float32),
        grid=(n, nt2),
        in_specs=[
            pl.BlockSpec((1, th2, wo, cout), lambda b, t: (b, t, 0, 0)),
            pl.BlockSpec((1, 1, wo, cout),
                         lambda b, t: (b, jnp.maximum(t * th2 - 1, 0), 0, 0)),
            pl.BlockSpec((1, 1, wo, cout),
                         lambda b, t: (b, jnp.minimum((t + 1) * th2, ho - 1), 0, 0)),
            pl.BlockSpec((1, cout), lambda b, t: (0, 0)),
            pl.BlockSpec((1, cout), lambda b, t: (0, 0)),
        ],
        out_specs=pl.BlockSpec((1, 2, 2, th2, wo, cout),
                               lambda b, t: (b, 0, 0, t, 0, 0)),
        compiler_params=pltpu.CompilerParams(
            dimension_semantics=("parallel", "parallel"),
            vmem_limit_bytes=vmem_limit),
        cost_estimate=pl.CostEstimate(
            flops=20 * n * ho * wo * cout, transcendentals=0,
            bytes_accessed=bytes2),
    )(y_conv, y_conv, y_conv, scale, shift)

    # glue: the 2x2 phase interleave rides on the single NCHW transpose PyTorch
    # layout requires; it reads exactly cout channels (no 128-padding).
    out = jnp.transpose(out6, (0, 5, 3, 1, 4, 2))      # (N, Cout, Ho, 2, Wo, 2)
    return out.reshape(n, cout, 2 * ho, 2 * wo)


# ---------------- pure-JAX reference (PyTorch semantics, all f32) -----------
def reference(x_nchw, conv_w, conv_b, gamma, beta, *, stride, padding,
              eps=1e-5, neg=0.1):
    y = lax.conv_general_dilated(
        x_nchw, conv_w, (stride, stride),
        [(padding, padding), (padding, padding)],
        dimension_numbers=('NCHW', 'OIHW', 'NCHW'))
    y = y + conv_b[None, :, None, None]
    mean = jnp.mean(y, axis=(0, 2, 3), keepdims=True)
    var = jnp.mean(jnp.square(y - mean), axis=(0, 2, 3), keepdims=True)
    y = (y - mean) / jnp.sqrt(var + eps)
    y = y * gamma[None, :, None, None] + beta[None, :, None, None]
    y = jnp.where(y >= 0, y, neg * y)

    def idxw(size):
        dst = jnp.arange(2 * size).astype(jnp.float32)
        src = jnp.maximum((dst + 0.5) / 2.0 - 0.5, 0.0)
        i0 = jnp.minimum(jnp.floor(src).astype(jnp.int32), size - 1)
        i1 = jnp.minimum(i0 + 1, size - 1)
        w1 = src - i0.astype(jnp.float32)
        return i0, i1, w1

    _, _, hh, ww = y.shape
    i0, i1, wh = idxw(hh)
    y = (y[:, :, i0, :] * (1.0 - wh)[None, None, :, None]
         + y[:, :, i1, :] * wh[None, None, :, None])
    j0, j1, wv = idxw(ww)
    y = (y[:, :, :, j0] * (1.0 - wv)[None, None, None, :]
         + y[:, :, :, j1] * wv[None, None, None, :])
    return y


if __name__ == "__main__":
    N, Cin, H, W = 2, 4, 16, 16
    Cout, K, STRIDE, PAD = 8, 3, 1, 1

    key = jax.random.PRNGKey(0)
    kx, kw_, kb, kg, kbeta = jax.random.split(key, 5)
    x = jax.random.normal(kx, (N, Cin, H, W), dtype=jnp.float32)
    conv_w = jax.random.normal(kw_, (Cout, Cin, K, K), dtype=jnp.float32) * 0.1
    conv_b = jax.random.normal(kb, (Cout,), dtype=jnp.float32) * 0.1
    bn_gamma = 1.0 + 0.1 * jax.random.normal(kg, (Cout,), dtype=jnp.float32)
    bn_beta = 0.1 * jax.random.normal(kbeta, (Cout,), dtype=jnp.float32)

    out = upsampling_block(x, conv_w, conv_b, bn_gamma, bn_beta,
                           stride=STRIDE, padding=PAD, negative_slope=0.1)
    out = jax.block_until_ready(out)

    ref = reference(x, conv_w, conv_b, bn_gamma, bn_beta,
                    stride=STRIDE, padding=PAD, neg=0.1)
    assert out.shape == (N, Cout, 2 * H, 2 * W), out.shape
    # Tolerance reflects bf16 MXU inputs + bf16 y_conv storage (f32 accumulation
    # and f32 BN stats) vs. the all-f32 reference; any structural error
    # (indexing/interleave/BN) would be O(1).
    assert jnp.allclose(out, ref, atol=3e-2, rtol=3e-2), float(
        jnp.max(jnp.abs(out - ref)))

    print("KERNEL_OK")
</pallas_src>

<mosaic_0001>
module attributes {stable_mosaic.version = 11 : i64} {
  func.func @_conv_stats_kernel(%arg0: i32, %arg1: i32, %arg2: memref<1x18x18x4xbf16, #tpu.memory_space<vmem>>, %arg3: memref<36x8xbf16, #tpu.memory_space<vmem>>, %arg4: memref<1x16x16x8xbf16, #tpu.memory_space<vmem>>, %arg5: memref<1x1x1x8xf32, #tpu.memory_space<vmem>>, %arg6: memref<1x1x1x8xf32, #tpu.memory_space<vmem>>, %arg7: memref<256x36xbf16, #tpu.memory_space<vmem>>) attributes {dimension_semantics = [#tpu.dimension_semantics<parallel>, #tpu.dimension_semantics<parallel>], iteration_bounds = array<i64: 2, 1>, scalar_prefetch = 0 : i64, scratch_operands = 1 : i64, tpu.core_type = #tpu.core_type<tc>, window_params = [{transform_indices = @transform_0, window_bounds = array<i64: 1, 18, 18, 4>}, {pipeline_mode = #tpu.pipeline_mode<synchronous>, transform_indices = @transform_1, window_bounds = array<i64: 36, 8>}, {transform_indices = @transform_2, window_bounds = array<i64: 1, 16, 16, 8>}, {transform_indices = @transform_3, window_bounds = array<i64: 1, 1, 1, 8>}, {transform_indices = @transform_4, window_bounds = array<i64: 1, 1, 1, 8>}]} {
    %c16_i32 = arith.constant 16 : i32
    %0 = arith.muli %arg1, %c16_i32 : i32
    %c0_i32 = arith.constant 0 : i32
    %1 = arith.addi %0, %c0_i32 : i32
    %c0 = arith.constant 0 : index
    %2 = arith.index_cast %1 : i32 to index
    %c0_0 = arith.constant 0 : index
    %c0_1 = arith.constant 0 : index
    %3 = vector.load %arg2[%c0, %2, %c0_0, %c0_1] : memref<1x18x18x4xbf16, #tpu.memory_space<vmem>>, vector<1x16x16x4xbf16>
    %4 = vector.shape_cast %3 : vector<1x16x16x4xbf16> to vector<16x16x4xbf16>
    %5 = vector.shape_cast %4 : vector<16x16x4xbf16> to vector<256x4xbf16>
    %c0_2 = arith.constant 0 : index
    %c0_3 = arith.constant 0 : index
    %6 = vector.load %arg7[%c0_2, %c0_3] : memref<256x36xbf16, #tpu.memory_space<vmem>>, vector<256x4xbf16>
    tpu.vector_store %arg7[%c0_2, %c0_3], %5 {strides = array<i32>} : memref<256x36xbf16, #tpu.memory_space<vmem>>, vector<256x4xbf16>,
    %c0_i32_4 = arith.constant 0 : i32
    %7 = arith.addi %0, %c0_i32_4 : i32
    %c0_5 = arith.constant 0 : index
    %8 = arith.index_cast %7 : i32 to index
    %c1 = arith.constant 1 : index
    %c0_6 = arith.constant 0 : index
    %9 = vector.load %arg2[%c0_5, %8, %c1, %c0_6] : memref<1x18x18x4xbf16, #tpu.memory_space<vmem>>, vector<1x16x16x4xbf16>
    %10 = vector.shape_cast %9 : vector<1x16x16x4xbf16> to vector<16x16x4xbf16>
    %11 = vector.shape_cast %10 : vector<16x16x4xbf16> to vector<256x4xbf16>
    %c0_7 = arith.constant 0 : index
    %c4 = arith.constant 4 : index
    %12 = vector.load %arg7[%c0_7, %c4] : memref<256x36xbf16, #tpu.memory_space<vmem>>, vector<256x4xbf16>
    tpu.vector_store %arg7[%c0_7, %c4], %11 {strides = array<i32>} : memref<256x36xbf16, #tpu.memory_space<vmem>>, vector<256x4xbf16>,
    %c0_i32_8 = arith.constant 0 : i32
    %13 = arith.addi %0, %c0_i32_8 : i32
    %c0_9 = arith.constant 0 : index
    %14 = arith.index_cast %13 : i32 to index
    %c2 = arith.constant 2 : index
    %c0_10 = arith.constant 0 : index
    %15 = vector.load %arg2[%c0_9, %14, %c2, %c0_10] : memref<1x18x18x4xbf16, #tpu.memory_space<vmem>>, vector<1x16x16x4xbf16>
    %16 = vector.shape_cast %15 : vector<1x16x16x4xbf16> to vector<16x16x4xbf16>
    %17 = vector.shape_cast %16 : vector<16x16x4xbf16> to vector<256x4xbf16>
    %c0_11 = arith.constant 0 : index
    %c8 = arith.constant 8 : index
    %18 = vector.load %arg7[%c0_11, %c8] : memref<256x36xbf16, #tpu.memory_space<vmem>>, vector<256x4xbf16>
    tpu.vector_store %arg7[%c0_11, %c8], %17 {strides = array<i32>} : memref<256x36xbf16, #tpu.memory_space<vmem>>, vector<256x4xbf16>,
    %c1_i32 = arith.constant 1 : i32
    %19 = arith.addi %0, %c1_i32 : i32
    %c0_12 = arith.constant 0 : index
    %20 = arith.index_cast %19 : i32 to index
    %c0_13 = arith.constant 0 : index
    %c0_14 = arith.constant 0 : index
    %21 = vector.load %arg2[%c0_12, %20, %c0_13, %c0_14] : memref<1x18x18x4xbf16, #tpu.memory_space<vmem>>, vector<1x16x16x4xbf16>
    %22 = vector.shape_cast %21 : vector<1x16x16x4xbf16> to vector<16x16x4xbf16>
    %23 = vector.shape_cast %22 : vector<16x16x4xbf16> to vector<256x4xbf16>
    %c0_15 = arith.constant 0 : index
    %c12 = arith.constant 12 : index
    %24 = vector.load %arg7[%c0_15, %c12] : memref<256x36xbf16, #tpu.memory_space<vmem>>, vector<256x4xbf16>
    tpu.vector_store %arg7[%c0_15, %c12], %23 {strides = array<i32>} : memref<256x36xbf16, #tpu.memory_space<vmem>>, vector<256x4xbf16>,
    %c1_i32_16 = arith.constant 1 : i32
    %25 = arith.addi %0, %c1_i32_16 : i32
    %c0_17 = arith.constant 0 : index
    %26 = arith.index_cast %25 : i32 to index
    %c1_18 = arith.constant 1 : index
    %c0_19 = arith.constant 0 : index
    %27 = vector.load %arg2[%c0_17, %26, %c1_18, %c0_19] : memref<1x18x18x4xbf16, #tpu.memory_space<vmem>>, vector<1x16x16x4xbf16>
    %28 = vector.shape_cast %27 : vector<1x16x16x4xbf16> to vector<16x16x4xbf16>
    %29 = vector.shape_cast %28 : vector<16x16x4xbf16> to vector<256x4xbf16>
    %c0_20 = arith.constant 0 : index
    %c16 = arith.constant 16 : index
    %30 = vector.load %arg7[%c0_20, %c16] : memref<256x36xbf16, #tpu.memory_space<vmem>>, vector<256x4xbf16>
    tpu.vector_store %arg7[%c0_20, %c16], %29 {strides = array<i32>} : memref<256x36xbf16, #tpu.memory_space<vmem>>, vector<256x4xbf16>,
    %c1_i32_21 = arith.constant 1 : i32
    %31 = arith.addi %0, %c1_i32_21 : i32
    %c0_22 = arith.constant 0 : index
    %32 = arith.index_cast %31 : i32 to index
    %c2_23 = arith.constant 2 : index
    %c0_24 = arith.constant 0 : index
    %33 = vector.load %arg2[%c0_22, %32, %c2_23, %c0_24] : memref<1x18x18x4xbf16, #tpu.memory_space<vmem>>, vector<1x16x16x4xbf16>
    %34 = vector.shape_cast %33 : vector<1x16x16x4xbf16> to vector<16x16x4xbf16>
    %35 = vector.shape_cast %34 : vector<16x16x4xbf16> to vector<256x4xbf16>
    %c0_25 = arith.constant 0 : index
    %c20 = arith.constant 20 : index
    %36 = vector.load %arg7[%c0_25, %c20] : memref<256x36xbf16, #tpu.memory_space<vmem>>, vector<256x4xbf16>
    tpu.vector_store %arg7[%c0_25, %c20], %35 {strides = array<i32>} : memref<256x36xbf16, #tpu.memory_space<vmem>>, vector<256x4xbf16>,
    %c2_i32 = arith.constant 2 : i32
    %37 = arith.addi %0, %c2_i32 : i32
    %c0_26 = arith.constant 0 : index
    %38 = arith.index_cast %37 : i32 to index
    %c0_27 = arith.constant 0 : index
    %c0_28 = arith.constant 0 : index
    %39 = vector.load %arg2[%c0_26, %38, %c0_27, %c0_28] : memref<1x18x18x4xbf16, #tpu.memory_space<vmem>>, vector<1x16x16x4xbf16>
    %40 = vector.shape_cast %39 : vector<1x16x16x4xbf16> to vector<16x16x4xbf16>
    %41 = vector.shape_cast %40 : vector<16x16x4xbf16> to vector<256x4xbf16>
    %c0_29 = arith.constant 0 : index
    %c24 = arith.constant 24 : index
    %42 = vector.load %arg7[%c0_29, %c24] : memref<256x36xbf16, #tpu.memory_space<vmem>>, vector<256x4xbf16>
    tpu.vector_store %arg7[%c0_29, %c24], %41 {strides = array<i32>} : memref<256x36xbf16, #tpu.memory_space<vmem>>, vector<256x4xbf16>,
    %c2_i32_30 = arith.constant 2 : i32
    %43 = arith.addi %0, %c2_i32_30 : i32
    %c0_31 = arith.constant 0 : index
    %44 = arith.index_cast %43 : i32 to index
    %c1_32 = arith.constant 1 : index
    %c0_33 = arith.constant 0 : index
    %45 = vector.load %arg2[%c0_31, %44, %c1_32, %c0_33] : memref<1x18x18x4xbf16, #tpu.memory_space<vmem>>, vector<1x16x16x4xbf16>
    %46 = vector.shape_cast %45 : vector<1x16x16x4xbf16> to vector<16x16x4xbf16>
    %47 = vector.shape_cast %46 : vector<16x16x4xbf16> to vector<256x4xbf16>
    %c0_34 = arith.constant 0 : index
    %c28 = arith.constant 28 : index
    %48 = vector.load %arg7[%c0_34, %c28] : memref<256x36xbf16, #tpu.memory_space<vmem>>, vector<256x4xbf16>
    tpu.vector_store %arg7[%c0_34, %c28], %47 {strides = array<i32>} : memref<256x36xbf16, #tpu.memory_space<vmem>>, vector<256x4xbf16>,
    %c2_i32_35 = arith.constant 2 : i32
    %49 = arith.addi %0, %c2_i32_35 : i32
    %c0_36 = arith.constant 0 : index
    %50 = arith.index_cast %49 : i32 to index
    %c2_37 = arith.constant 2 : index
    %c0_38 = arith.constant 0 : index
    %51 = vector.load %arg2[%c0_36, %50, %c2_37, %c0_38] : memref<1x18x18x4xbf16, #tpu.memory_space<vmem>>, vector<1x16x16x4xbf16>
    %52 = vector.shape_cast %51 : vector<1x16x16x4xbf16> to vector<16x16x4xbf16>
    %53 = vector.shape_cast %52 : vector<16x16x4xbf16> to vector<256x4xbf16>
    %c0_39 = arith.constant 0 : index
    %c32 = arith.constant 32 : index
    %54 = vector.load %arg7[%c0_39, %c32] : memref<256x36xbf16, #tpu.memory_space<vmem>>, vector<256x4xbf16>
    tpu.vector_store %arg7[%c0_39, %c32], %53 {strides = array<i32>} : memref<256x36xbf16, #tpu.memory_space<vmem>>, vector<256x4xbf16>,
    %c0_40 = arith.constant 0 : index
    %c0_41 = arith.constant 0 : index
    %55 = vector.load %arg7[%c0_40, %c0_41] : memref<256x36xbf16, #tpu.memory_space<vmem>>, vector<256x36xbf16>
    %c0_42 = arith.constant 0 : index
    %c0_43 = arith.constant 0 : index
    %56 = vector.load %arg3[%c0_42, %c0_43] : memref<36x8xbf16, #tpu.memory_space<vmem>>, vector<36x8xbf16>
    %cst = arith.constant dense<0.000000e+00> : vector<256x8xf32>
    %57 = tpu.matmul %55, %56, %cst {dimension_numbers = #tpu.dot_dimension_numbers<[1], [0], [0], [1], [0, 0, 1, 1], [], []>} : vector<256x36xbf16>, vector<36x8xbf16>, vector<256x8xf32> -> vector<256x8xf32>
    %58 = vector.shape_cast %57 : vector<256x8xf32> to vector<16x16x8xf32>
    %59 = arith.truncf %58 : vector<16x16x8xf32> to vector<16x16x8xbf16>
    %c0_44 = arith.constant 0 : index
    %c0_45 = arith.constant 0 : index
    %c0_46 = arith.constant 0 : index
    %c0_47 = arith.constant 0 : index
    %60 = vector.load %arg4[%c0_44, %c0_45, %c0_46, %c0_47] : memref<1x16x16x8xbf16, #tpu.memory_space<vmem>>, vector<1x16x16x8xbf16>
    %61 = vector.shape_cast %60 : vector<1x16x16x8xbf16> to vector<16x16x8xbf16>
    %62 = vector.shape_cast %59 : vector<16x16x8xbf16> to vector<1x16x16x8xbf16>
    tpu.vector_store %arg4[%c0_44, %c0_45, %c0_46, %c0_47], %62 {strides = array<i32>} : memref<1x16x16x8xbf16, #tpu.memory_space<vmem>>, vector<1x16x16x8xbf16>,
    %cst_48 = arith.constant dense<0.000000e+00> : vector<8xf32>
    %63 = vector.multi_reduction <add>, %57, %cst_48 [0] : vector<256x8xf32> to vector<8xf32>
    %64 = vector.shape_cast %63 : vector<8xf32> to vector<1x8xf32>
    %c0_49 = arith.constant 0 : index
    %c0_50 = arith.constant 0 : index
    %c0_51 = arith.constant 0 : index
    %c0_52 = arith.constant 0 : index
    %65 = vector.load %arg5[%c0_49, %c0_50, %c0_51, %c0_52] : memref<1x1x1x8xf32, #tpu.memory_space<vmem>>, vector<1x1x1x8xf32>
    %66 = vector.shape_cast %65 : vector<1x1x1x8xf32> to vector<1x8xf32>
    %67 = vector.shape_cast %64 : vector<1x8xf32> to vector<1x1x1x8xf32>
    tpu.vector_store %arg5[%c0_49, %c0_50, %c0_51, %c0_52], %67 {strides = array<i32>} : memref<1x1x1x8xf32, #tpu.memory_space<vmem>>, vector<1x1x1x8xf32>,
    %68 = arith.mulf %57, %57 : vector<256x8xf32>
    %cst_53 = arith.constant dense<0.000000e+00> : vector<8xf32>
    %69 = vector.multi_reduction <add>, %68, %cst_53 [0] : vector<256x8xf32> to vector<8xf32>
    %70 = vector.shape_cast %69 : vector<8xf32> to vector<1x8xf32>
    %c0_54 = arith.constant 0 : index
    %c0_55 = arith.constant 0 : index
    %c0_56 = arith.constant 0 : index
    %c0_57 = arith.constant 0 : index
    %71 = vector.load %arg6[%c0_54, %c0_55, %c0_56, %c0_57] : memref<1x1x1x8xf32, #tpu.memory_space<vmem>>, vector<1x1x1x8xf32>
    %72 = vector.shape_cast %71 : vector<1x1x1x8xf32> to vector<1x8xf32>
    %73 = vector.shape_cast %70 : vector<1x8xf32> to vector<1x1x1x8xf32>
    tpu.vector_store %arg6[%c0_54, %c0_55, %c0_56, %c0_57], %73 {strides = array<i32>} : memref<1x1x1x8xf32, #tpu.memory_space<vmem>>, vector<1x1x1x8xf32>,
    return
  }
  func.func @transform_0(%arg0: i32, %arg1: i32) -> (i32, i32, i32, i32) {
    %c0_i32 = arith.constant 0 : i32
    %c0_i32_0 = arith.constant 0 : i32
    %c0_i32_1 = arith.constant 0 : i32
    %c0_i32_2 = arith.constant 0 : i32
    return %arg0, %c0_i32, %c0_i32_0, %c0_i32_1 : i32, i32, i32, i32
  }
  func.func @transform_1(%arg0: i32, %arg1: i32) -> (i32, i32) {
    %c0_i32 = arith.constant 0 : i32
    %c0_i32_0 = arith.constant 0 : i32
    %c0_i32_1 = arith.constant 0 : i32
    return %c0_i32, %c0_i32_0 : i32, i32
  }
  func.func @transform_2(%arg0: i32, %arg1: i32) -> (i32, i32, i32, i32) {
    %c0_i32 = arith.constant 0 : i32
    %c0_i32_0 = arith.constant 0 : i32
    %c0_i32_1 = arith.constant 0 : i32
    return %arg0, %arg1, %c0_i32, %c0_i32_0 : i32, i32, i32, i32
  }
  func.func @transform_3(%arg0: i32, %arg1: i32) -> (i32, i32, i32, i32) {
    %c0_i32 = arith.constant 0 : i32
    %c0_i32_0 = arith.constant 0 : i32
    %c0_i32_1 = arith.constant 0 : i32
    return %arg0, %arg1, %c0_i32, %c0_i32_0 : i32, i32, i32, i32
  }
  func.func @transform_4(%arg0: i32, %arg1: i32) -> (i32, i32, i32, i32) {
    %c0_i32 = arith.constant 0 : i32
    %c0_i32_0 = arith.constant 0 : i32
    %c0_i32_1 = arith.constant 0 : i32
    return %arg0, %arg1, %c0_i32, %c0_i32_0 : i32, i32, i32, i32
  }
}

</mosaic_0001>

<bundles_post_ra>
// kernel: tpu_custom_call.1
= control target key start
LH: loop header
LB: loop body
LE: loop exit
PB: predicated region body
PF: predicated region fallthrough
CT: control target
= control target key end

     0   :  { %10 = vsyncpa [#allocation4], 0  ;;  %s6540_s0 = inlined_call_operand.vmem [shape: bf16[2,18,18,4], index: 0, kind: input, shape index: {}]   ;;  %s6541_s1 = inlined_call_operand.vmem [shape: bf16[36,8], index: 1, kind: input, shape index: {}]   ;;  %s6542_s2 = inlined_call_operand.vmem [shape: bf16[2,16,16,8], index: 2, kind: output, shape index: {0}]   ;;  %s6543_s3 = inlined_call_operand.hbm [shape: f32[2,1,1,8], index: 3, kind: output, shape index: {1}]   ;;  %s6544_s4 = inlined_call_operand.hbm [shape: f32[2,1,1,8], index: 4, kind: output, shape index: {2}]  }
   0x1   :  { %12 = vsyncpa [#allocation4 + $0x1], 0 }
   0x2   :  { %13 = vsyncpa [#allocation6], 0 }
   0x3   :  { %15 = vsyncpa [#allocation6 + $0x1], 0  ;;  %s4758_s15 = smov 0   ;;  %s4760_s16 = smov 0  }
   0x4   :  { %s4762_s17 = smov 0   ;;  %s4764_s18 = smov 0  }
   0x5   :  { %s4766_s19 = smov 0   ;;  %s4768_s20 = smov 0  }
   0x6 LB: > { %s4114_s21 = sadd.s32 4294967295, %s4723_s20   ;;  %s4115_s22 = sadd.s32 4294967294, %s4723_s20   ;;  %s4723_s20 = sphi %s4768_s20, %s21_s20   ;;  %s4719_s19 = sphi %s4766_s19, %s6555_s19   ;;  %s4715_s18 = sphi %s4764_s18, %s6554_s18   ;;  %s4711_s17 = sphi %s4762_s17, %s6553_s17   ;;  %s4707_s16 = sphi %s4760_s16, %s6552_s16   ;;  %s4703_s15 = sphi %s4758_s15, %s6551_s15  }
   0x7   : > { %s33_s23 = sadd.s32 1, %s4719_s19  ;;  %s117_s24 = sadd.s32 1, %s4711_s17 }
   0x8   : > { %p35_p0 = scmp.ge.s32.totalorder %s33_s23, 2  ;;  %p127_p1 = scmp.ne.s32.totalorder %s4711_s17, %s4707_s16 }
   0x9   : > { %p128_p2 = scmp.eq.s32.totalorder %s4114_s21, 1  ;;  %p133_p3 = scmp.ne.s32.totalorder %s4707_s16, %s4703_s15 }
   0xa   : > { %s6557_s23 = smov (%p35_p0, %s33_s23), 0  ;;  %p134_p5 = scmp.eq.s32.totalorder %s4115_s22, 1 }
   0xb   : > { %p4798_p4 = por %p128_p2, %p127_p1  ;;  %s112_s26 = ssub.s32 %s4719_s19, %s6557_s23 }
   0xc   : > { %p4118_p6 = scmp.ge.s32.totalorder %s4723_s20, 1  ;;  %p115_p7 = scmp.eq.s32.totalorder %s112_s26, 0 }
   0xd   : > { %p4805_p8 = por %p134_p5, %p133_p3  ;;  %p191_p9 = scmp.lt.s32.totalorder %s4723_s20, 3 }
   0xe   : > { %s4811_s28 = scalar_select %p115_p7, %s4711_s17, %s117_s24  }
   0xf   : > { %p192_p10 = pnand %p4118_p6, %p191_p9 }
  0x10   : > { %p230_p11 = scmp.lt.s32.totalorder (!%p192_p10), %s4715_s18, 1  ;;  %s4725_s8 = smov (!%p192_p10), 4  }
  0x11   : > { %195 = sbr.rel (%p192_p10) target bundleno = 1011 (0x3f3), region = 28  ;;  %s4726_s9 = smov (!%p192_p10), 8  }
  0x12   : > { %s4727_s10 = smov (!%p192_p10), 12   ;;  %s4728_s11 = smov (!%p192_p10), 16  }
  0x13   : > { %s4729_s12 = smov (!%p192_p10), 20   ;;  %s4730_s13 = smov (!%p192_p10), 24  }
  0x14   : > { %s4731_s14 = smov (!%p192_p10), 28   ;;  %s4732_s21 = smov (!%p192_p10), 32  }
  0x15   : > { %s3965_s22 = scalar_lea.hbm (!%p192_p10), %s6544_s4, %s4715_s18 }
  0x16   : > { %s4815_s29 = scalar_select %p230_p11, %s4715_s18, 1  ;;  %vm364_vm0 = vsmask.f32 3328  ;;  %vm365_vm1 = vsmask.f32 7440  ;;  %vm976_vm3 = vcmask 1042432  }
  0x17   : > { %vm4832_vm2 = vmor %vm364_vm0, %vm365_vm1  ;;  %vm977_vm4 = vcmask 1046532   ;;  %vm283_vm5 = vcmask 27648   ;;  %vm847_vm7 = vcmask 60448   ;;  %vm1187_vm8 = vcmask 93248  }
  0x18   : > { %s4544_s30 = smul.u32 216, %s4815_s29  ;;  %vm5007_vm6 = vmor %vm976_vm3, %vm977_vm4  ;;  %vm1384_vm9 = vcmask 126048   ;;  %vm1945_vm10 = vcmask 158848   ;;  %vm2282_vm11 = vcmask 191648   ;;  %vm3591_vm12 = vcmask 1041408  }
  0x19   : > { %vm2479_vm13 = vcmask 224448   ;;  %vm3040_vm14 = vcmask 257248   ;;  %vm3377_vm15 = vcmask 290048   ;;  %vm3542_vm0 = vcmask 293888  }
  0x1a   : > { %s4821_s7 = scalar_lea.vmem %s6540_s0, %s4544_s30  ;;  %vm3716_vm1 = vcmask 60416   ;;  %vm3819_vm3 = vcmask 57344  }
  0x1b   : > { %v319_v0 = vld [vmem:[%s4821_s7 + $0xc] sm:$0xf]  ;;  %v320_v1 = vld [vmem:[%s4821_s7 + $0x10] sm:$0xf]  ;;  %v316_v2 = vld [vmem:[%s4821_s7] sm:$0xf] }
  0x1c   : > { %v392_v3 = vshrl.u32 %v319_v0, 16  ;;  %v395_v4 = vshll.u32 %v319_v0, 16  ;;  %v401_v5 = vshll.u32 %v320_v1, 16  ;;  %v405_v6 = vshrl.u32 %v320_v1, 16  ;;  %v317_v7 = vld [vmem:[%s4821_s7 + $0x4] sm:$0xf] }
  0x1d   : > { %v368_v8 = vshrl.u32 %v316_v2, 16  ;;  %v371_v9 = vshll.u32 %v316_v2, 16  ;;  %v377_v10 = vshll.u32 %v317_v7, 16  ;;  %v381_v11 = vshrl.u32 %v317_v7, 16  ;;  %v321_v12 = vld [vmem:[%s4821_s7 + $0x14] sm:$0x1] }
  0x1e   : > { %v394_v13 = vrot.slane %v392_v3, 4  ;;  %v397_v14 = vrot.slane %v395_v4, 5  ;;  %v403_v15 = vrot.slane %v401_v5, 5  ;;  %v407_v16 = vrot.slane %v405_v6, 4  ;;  %v318_v17 = vld [vmem:[%s4821_s7 + $0x8] sm:$0x1] }
  0x1f   : > { %v370_v18 = vrot.slane %v368_v8, 4  ;;  %v373_v19 = vrot.slane %v371_v9, 5  ;;  %v383_v20 = vrot.slane %v381_v11, 4  ;;  %v326_v21 = vld [vmem:[%s4821_s7 + $0x28] sm:$0xf]  ;;  %v411_v24 = vshll.u32 %v321_v12, 16 }
  0x20   : > { %v398_v22 = vor.u32 %v397_v14, %v394_v13  ;;  %v408_v23 = vor.u32 %v407_v16, %v403_v15  ;;  %v379_v27 = vrot.slane %v377_v10, 5  ;;  %v449_v28 = vshll.u32 %v326_v21, 16  ;;  %v325_v30 = vld [vmem:[%s4821_s7 + $0x24] sm:$0xf]  ;;  %v322_v35 = vld [vmem:[%s4821_s7 + $0x18] sm:$0xf] }
  0x21   : > { %v374_v26 = vor.u32 %v373_v19, %v370_v18  ;;  %v453_v29 = vshrl.u32 %v326_v21, 16  ;;  %v387_v32 = vshll.u32 %v318_v17, 16  ;;  %v413_v38 = vrot.slane %v411_v24, 5  ;;  %v323_v40 = vld [vmem:[%s4821_s7 + $0x1c] sm:$0xf] }
  0x22   : > { %v399_v31 = vrot.slane %v398_v22, 4  ;;  %v384_v34 = vor.u32 %v383_v20, %v379_v27  ;;  %v409_v37 = vrot.slane %v408_v23, 4  ;;  %v440_v39 = vshrl.u32 %v325_v30, 16  ;;  %v327_v42 = vld [vmem:[%s4821_s7 + $0x2c] sm:$0x1] }
  0x23   : > { %v375_v33 = vrot.slane %v374_v26, 4  ;;  %v4845_v43 = vrot.slane %v449_v28, 5  ;;  %v455_v44 = vrot.slane %v453_v29, 4  ;;  %v443_v45 = vshll.u32 %v325_v30, 16  ;;  %v331_v50 = vld [vmem:[%s4821_s7 + $0x3c] sm:$0xf] }
  0x24   : > { %v404_v36 = vsel %vm4832_vm2, %v399_v31, %v403_v15  ;;  %v389_v46 = vrot.slane %v387_v32, 5  ;;  %v442_v47 = vrot.slane %v440_v39, 4  ;;  %v416_v48 = vshrl.u32 %v322_v35, 16  ;;  %v329_v58 = vld [vmem:[%s4821_s7 + $0x34] sm:$0xf] }
  0x25   : > { %755 = vrot.lane.b32.xlu1 %v404_v36, %s4725_s8  ;;  %v380_v41 = vsel %vm4832_vm2, %v375_v33, %v379_v27  ;;  %v419_v49 = vshll.u32 %v322_v35, 16  ;;  %v385_v51 = vrot.slane %v384_v34, 4  ;;  %v445_v52 = vrot.slane %v443_v45, 5  ;;  %v324_v6 = vld [vmem:[%s4821_s7 + $0x20] sm:$0x1] }
  0x26   : > { %751 = vrot.lane.b32.xlu0 %v380_v41, %s4725_s8  ;;  %v425_v53 = vshll.u32 %v323_v40, 16  ;;  %v429_v54 = vshrl.u32 %v323_v40, 16  ;;  %v459_v55 = vshll.u32 %v327_v42, 16  ;;  %v418_v56 = vrot.slane %v416_v48, 4  ;;  %v332_v15 = vld [vmem:[%s4821_s7 + $0x40] sm:$0xf] }
  0x27   : > { %v421_v57 = vrot.slane %v419_v49, 5  ;;  %v456_v59 = vor.u32 %v455_v44, %v4845_v43  ;;  %v488_v61 = vshrl.u32 %v331_v50, 16  ;;  %v491_v62 = vshll.u32 %v331_v50, 16  ;;  %v330_v16 = vld [vmem:[%s4821_s7 + $0x38] sm:$0x1] }
  0x28   : > { %v431_v60 = vrot.slane %v429_v54, 4  ;;  %v414_v63 = vsel %vm4832_vm2, %v409_v37, %v413_v38  ;;  %v446_v0 = vor.u32 %v445_v52, %v442_v47  ;;  %v427_v2 = vrot.slane %v425_v53, 5  ;;  %v335_v20 = vld [vmem:[%s4821_s7 + $0x4c] sm:$0xf]  ;;  %v328_v21 = vld [vmem:[%s4821_s7 + $0x30] sm:$0xf] }
  0x29   : > { %v422_v1 = vor.u32 %v421_v57, %v418_v56  ;;  %v390_v3 = vsel %vm4832_vm2, %v385_v51, %v389_v46  ;;  %v473_v4 = vshll.u32 %v329_v58, 16  ;;  %v477_v5 = vshrl.u32 %v329_v58, 16  ;;  %v334_v24 = vld [vmem:[%s4821_s7 + $0x48] sm:$0xf]  ;;  %v340_v47 = vld [vmem:[%s4821_s7 + $0x60] sm:$0xf] }
  0x2a   : > { %v461_v7 = vrot.slane %v459_v55, 5  ;;  %v457_v9 = vrot.slane %v456_v59, 4  ;;  %v490_v10 = vrot.slane %v488_v61, 4  ;;  %v493_v11 = vrot.slane %v491_v62, 5  ;;  %v336_v49 = vld [vmem:[%s4821_s7 + $0x50] sm:$0x1] }
  0x2b   : > { %v423_v8 = vrot.slane %v422_v1, 4  ;;  %v432_v12 = vor.u32 %v431_v60, %v427_v2  ;;  %v447_v13 = vrot.slane %v446_v0, 4  ;;  %v435_v17 = vshll.u32 %v324_v6, 16  ;;  %v338_v53 = vld [vmem:[%s4821_s7 + $0x58] sm:$0xf] }
  0x2c   : > { %v4863_v18 = vrot.slane %v473_v4, 5  ;;  %v479_v19 = vrot.slane %v477_v5, 4  ;;  %v462_v26 = vsel %vm4832_vm2, %v457_v9, %v461_v7  ;;  %v494_v27 = vor.u32 %v493_v11, %v490_v10  ;;  %v333_v58 = vld [vmem:[%s4821_s7 + $0x44] sm:$0x1]  ;;  %v344_v11 = vld [vmem:[%s4821_s7 + $0x70] sm:$0xf] }
  0x2d   : > { %757 = vrot.lane.b32.xlu1 %v414_v63, %s4725_s8  ;;  %v428_v14 = vsel %vm4832_vm2, %v423_v8, %v427_v2  ;;  %v433_v22 = vrot.slane %v432_v12, 4  ;;  %v437_v23 = vrot.slane %v435_v17, 5  ;;  %v497_v28 = vshll.u32 %v332_v15, 16  ;;  %v337_v2 = vld [vmem:[%s4821_s7 + $0x54] sm:$0xf] }
  0x2e   : > { %753 = vrot.lane.b32.xlu0 %v390_v3, %s4725_s8  ;;  %759 = vrot.lane.b32.xlu2 %v428_v14, %s4725_s8  ;;  %v483_v29 = vshll.u32 %v330_v16, 16  ;;  %v452_v30 = vsel %vm4832_vm2, %v447_v13, %v4845_v43  ;;  %v521_v31 = vshll.u32 %v335_v20, 16  ;;  %v525_v32 = vshrl.u32 %v335_v20, 16  ;;  %v341_v6 = vld [vmem:[%s4821_s7 + $0x64] sm:$0xf] }
  0x2f   : > { %v464_v33 = vshrl.u32 %v328_v21, 16  ;;  %v480_v34 = vor.u32 %v479_v19, %v4863_v18  ;;  %v512_v35 = vshrl.u32 %v334_v24, 16  ;;  %v515_v36 = vshll.u32 %v334_v24, 16  ;;  %v343_v20 = vld [vmem:[%s4821_s7 + $0x6c] sm:$0xf] }
  0x30   : > { %v467_v37 = vshll.u32 %v328_v21, 16  ;;  %v501_v38 = vshrl.u32 %v332_v15, 16  ;;  %v438_v39 = vsel %vm4832_vm2, %v433_v22, %v437_v23  ;;  %v499_v41 = vrot.slane %v497_v28, 5  ;;  %v339_v15 = vld [vmem:[%s4821_s7 + $0x5c] sm:$0x1] }
  0x31   : > { %v466_v40 = vrot.slane %v464_v33, 4  ;;  %v495_v43 = vrot.slane %v494_v27, 4  ;;  %v485_v44 = vrot.slane %v483_v29, 5  ;;  %v4878_v45 = vrot.slane %v521_v31, 5 }
  0x32   : > { %v469_v42 = vrot.slane %v467_v37, 5  ;;  %v527_v46 = vrot.slane %v525_v32, 4  ;;  %v481_v48 = vrot.slane %v480_v34, 4  ;;  %v514_v50 = vrot.slane %v512_v35, 4 }
  0x33   : > { %v517_v51 = vrot.slane %v515_v36, 5  ;;  %v503_v54 = vrot.slane %v501_v38, 4  ;;  %v560_v56 = vshrl.u32 %v340_v47, 16  ;;  %v563_v57 = vshll.u32 %v340_v47, 16  ;;  %v347_v47 = vld [vmem:[%s4821_s7 + $0x7c] sm:$0xf] }
  0x34   : > { %v470_v52 = vor.u32 %v469_v42, %v466_v40  ;;  %v500_v59 = vsel %vm4832_vm2, %v495_v43, %v499_v41  ;;  %v528_v60 = vor.u32 %v527_v46, %v4878_v45  ;;  %v531_v61 = vshll.u32 %v336_v49, 16  ;;  %v349_v42 = vld [vmem:[%s4821_s7 + $0x84] sm:$0xf]  ;;  %v342_v49 = vld [vmem:[%s4821_s7 + $0x68] sm:$0x1] }
  0x35   : > { %765 = vrot.lane.b32.xlu1 %v462_v26, %s4725_s8  ;;  %v486_v62 = vsel %vm4832_vm2, %v481_v48, %v485_v44  ;;  %v518_v63 = vor.u32 %v517_v51, %v514_v50  ;;  %v545_v0 = vshll.u32 %v338_v53, 16  ;;  %v549_v1 = vshrl.u32 %v338_v53, 16 }
  0x36   : > { %763 = vrot.lane.b32.xlu0 %v452_v30, %s4725_s8  ;;  %761 = vrot.lane.b32.xlu2 %v438_v39, %s4725_s8  ;;  %v471_v55 = vrot.slane %v470_v52, 4  ;;  %v504_v4 = vor.u32 %v503_v54, %v499_v41  ;;  %v507_v5 = vshll.u32 %v333_v58, 16  ;;  %v562_v7 = vrot.slane %v560_v56, 4  ;;  %v345_v41 = vld [vmem:[%s4821_s7 + $0x74] sm:$0x1] }
  0x37   : > { %v565_v8 = vrot.slane %v563_v57, 5  ;;  %v529_v9 = vrot.slane %v528_v60, 4  ;;  %v533_v10 = vrot.slane %v531_v61, 5  ;;  %v536_v12 = vshrl.u32 %v337_v2, 16  ;;  %v346_v54 = vld [vmem:[%s4821_s7 + $0x78] sm:$0xf] }
  0x38   : > { %v476_v3 = vsel %vm4832_vm2, %v471_v55, %v4863_v18  ;;  %v539_v13 = vshll.u32 %v337_v2, 16  ;;  %v519_v14 = vrot.slane %v518_v63, 4  ;;  %v4900_v16 = vrot.slane %v545_v0, 5 }
  0x39   : > { %v551_v17 = vrot.slane %v549_v1, 4  ;;  %v505_v18 = vrot.slane %v504_v4, 4  ;;  %v509_v19 = vrot.slane %v507_v5, 5  ;;  %v538_v21 = vrot.slane %v536_v12, 4  ;;  %v350_v4 = vld [vmem:[%s4821_s7 + $0x88] sm:$0xf] }
  0x3a   : > { %v541_v22 = vrot.slane %v539_v13, 5  ;;  %v566_v23 = vor.u32 %v565_v8, %v562_v7  ;;  %v569_v24 = vshll.u32 %v341_v6, 16  ;;  %v593_v26 = vshll.u32 %v344_v11, 16 }
  0x3b   : > { %v597_v27 = vshrl.u32 %v344_v11, 16  ;;  %v534_v28 = vsel %vm4832_vm2, %v529_v9, %v533_v10  ;;  %v555_v29 = vshll.u32 %v339_v15, 16  ;;  %v524_v30 = vsel %vm4832_vm2, %v519_v14, %v4878_v45  ;;  %v353_v9 = vld [vmem:[%s4821_s7 + $0x94] sm:$0xf]  ;;  %v348_v11 = vld [vmem:[%s4821_s7 + $0x80] sm:$0x1] }
  0x3c   : > { %v552_v31 = vor.u32 %v551_v17, %v4900_v16  ;;  %v584_v32 = vshrl.u32 %v343_v20, 16  ;;  %v587_v33 = vshll.u32 %v343_v20, 16  ;;  %v573_v34 = vshrl.u32 %v341_v6, 16  ;;  %v352_v14 = vld [vmem:[%s4821_s7 + $0x90] sm:$0xf] }
  0x3d   : > { %771 = vrot.lane.b32.xlu1 %v500_v59, %s4725_s8  ;;  %v510_v35 = vsel %vm4832_vm2, %v505_v18, %v509_v19  ;;  %v542_v36 = vor.u32 %v541_v22, %v538_v21  ;;  %v567_v37 = vrot.slane %v566_v23, 4  ;;  %v571_v38 = vrot.slane %v569_v24, 5 }
  0x3e   : > { %769 = vrot.lane.b32.xlu0 %v486_v62, %s4725_s8  ;;  %767 = vrot.lane.b32.xlu2 %v476_v3, %s4725_s8  ;;  %v4912_v39 = vrot.slane %v593_v26, 5  ;;  %v599_v40 = vrot.slane %v597_v27, 4  ;;  %v553_v43 = vrot.slane %v552_v31, 4  ;;  %v557_v44 = vrot.slane %v555_v29, 5 }
  0x3f   : > { %v586_v45 = vrot.slane %v584_v32, 4  ;;  %v589_v46 = vrot.slane %v587_v33, 5  ;;  %v543_v48 = vrot.slane %v542_v36, 4  ;;  %v575_v50 = vrot.slane %v573_v34, 4 }
  0x40   : > { %v572_v51 = vsel %vm4832_vm2, %v567_v37, %v571_v38  ;;  %v600_v52 = vor.u32 %v599_v40, %v4912_v39  ;;  %v603_v53 = vshll.u32 %v345_v41, 16  ;;  %v632_v55 = vshrl.u32 %v349_v42, 16  ;;  %v354_v37 = vld [vmem:[%s4821_s7 + $0x98] sm:$0x1]  ;;  %v358_v40 = vld [vmem:[%s4821_s7 + $0xa8] sm:$0xf] }
  0x41   : > { %v635_v56 = vshll.u32 %v349_v42, 16  ;;  %v617_v57 = vshll.u32 %v347_v47, 16  ;;  %v621_v58 = vshrl.u32 %v347_v47, 16  ;;  %v558_v59 = vsel %vm4832_vm2, %v553_v43, %v557_v44  ;;  %v356_v42 = vld [vmem:[%s4821_s7 + $0xa0] sm:$0xf] }
  0x42   : > { %v590_v60 = vor.u32 %v589_v46, %v586_v45  ;;  %v579_v61 = vshll.u32 %v342_v49, 16  ;;  %v548_v62 = vsel %vm4832_vm2, %v543_v48, %v4900_v16  ;;  %v576_v63 = vor.u32 %v575_v50, %v571_v38  ;;  %v351_v43 = vld [vmem:[%s4821_s7 + $0x8c] sm:$0x1]  ;;  %v355_v47 = vld [vmem:[%s4821_s7 + $0x9c] sm:$0xf] }
  0x43   : > { %v608_v0 = vshrl.u32 %v346_v54, 16  ;;  %v611_v1 = vshll.u32 %v346_v54, 16  ;;  %v601_v2 = vrot.slane %v600_v52, 4  ;;  %v605_v3 = vrot.slane %v603_v53, 5 }
  0x44   : > { %v634_v5 = vrot.slane %v632_v55, 4  ;;  %v637_v6 = vrot.slane %v635_v56, 5  ;;  %v4932_v7 = vrot.slane %v617_v57, 5  ;;  %v623_v8 = vrot.slane %v621_v58, 4 }
  0x45   : > { %777 = vrot.lane.b32.xlu1 %v534_v28, %s4725_s8  ;;  %v591_v10 = vrot.slane %v590_v60, 4  ;;  %v577_v12 = vrot.slane %v576_v63, 4  ;;  %v581_v13 = vrot.slane %v579_v61, 5  ;;  %v610_v15 = vrot.slane %v608_v0, 4 }
  0x46   : > { %775 = vrot.lane.b32.xlu0 %v524_v30, %s4725_s8  ;;  %773 = vrot.lane.b32.xlu2 %v510_v35, %s4725_s8  ;;  %v613_v16 = vrot.slane %v611_v1, 5  ;;  %v641_v17 = vshll.u32 %v350_v4, 16  ;;  %v665_v18 = vshll.u32 %v353_v9, 16  ;;  %v669_v19 = vshrl.u32 %v353_v9, 16  ;;  %v357_v1 = vld [vmem:[%s4821_s7 + $0xa4] sm:$0x1] }
  0x47   : > { %v606_v20 = vsel %vm4832_vm2, %v601_v2, %v605_v3  ;;  %v638_v21 = vor.u32 %v637_v6, %v634_v5  ;;  %v624_v22 = vor.u32 %v623_v8, %v4932_v7  ;;  %v627_v23 = vshll.u32 %v348_v11, 16  ;;  %v362_v5 = vld [vmem:[%s4821_s7 + $0xb8] sm:$0xf]  ;;  %v361_v8 = vld [vmem:[%s4821_s7 + $0xb4] sm:$0xf] }
  0x48   : > { %v596_v24 = vsel %vm4832_vm2, %v591_v10, %v4912_v39  ;;  %v656_v26 = vshrl.u32 %v352_v14, 16  ;;  %v659_v27 = vshll.u32 %v352_v14, 16  ;;  %v645_v28 = vshrl.u32 %v350_v4, 16 }
  0x49   : > { %v582_v29 = vsel %vm4832_vm2, %v577_v12, %v581_v13  ;;  %v614_v30 = vor.u32 %v613_v16, %v610_v15  ;;  %v4947_v31 = vrot.slane %v665_v18, 5  ;;  %v671_v32 = vrot.slane %v669_v19, 4 }
  0x4a   : > { %v639_v33 = vrot.slane %v638_v21, 4  ;;  %v643_v34 = vrot.slane %v641_v17, 5  ;;  %v625_v35 = vrot.slane %v624_v22, 4  ;;  %v629_v36 = vrot.slane %v627_v23, 5 }
  0x4b   : > { %v658_v38 = vrot.slane %v656_v26, 4  ;;  %v661_v39 = vrot.slane %v659_v27, 5  ;;  %v615_v41 = vrot.slane %v614_v30, 4  ;;  %v647_v44 = vrot.slane %v645_v28, 4 }
  0x4c   : > { %v672_v45 = vor.u32 %v671_v32, %v4947_v31  ;;  %v675_v46 = vshll.u32 %v354_v37, 16  ;;  %v644_v48 = vsel %vm4832_vm2, %v639_v33, %v643_v34  ;;  %v630_v49 = vsel %vm4832_vm2, %v625_v35, %v629_v36  ;;  %v360_v36 = vld [vmem:[%s4821_s7 + $0xb0] sm:$0x1] }
  0x4d   : > { %783 = vrot.lane.b32.xlu1 %v572_v51, %s4725_s8  ;;  %v704_v50 = vshrl.u32 %v358_v40, 16  ;;  %v707_v51 = vshll.u32 %v358_v40, 16  ;;  %v662_v52 = vor.u32 %v661_v39, %v658_v38  ;;  %v689_v53 = vshll.u32 %v356_v42, 16 }
  0x4e   : > { %781 = vrot.lane.b32.xlu0 %v558_v59, %s4725_s8  ;;  %779 = vrot.lane.b32.xlu2 %v548_v62, %s4725_s8  ;;  %v693_v54 = vshrl.u32 %v356_v42, 16  ;;  %v651_v55 = vshll.u32 %v351_v43, 16  ;;  %v620_v56 = vsel %vm4832_vm2, %v615_v41, %v4932_v7  ;;  %v648_v57 = vor.u32 %v647_v44, %v643_v34  ;;  %v359_v62 = vld [vmem:[%s4821_s7 + $0xac] sm:$0xf] }
  0x4f   : > { %v680_v58 = vshrl.u32 %v355_v47, 16  ;;  %v683_v59 = vshll.u32 %v355_v47, 16  ;;  %v673_v60 = vrot.slane %v672_v45, 4  ;;  %v677_v61 = vrot.slane %v675_v46, 5 }
  0x50   : > { %v706_v63 = vrot.slane %v704_v50, 4  ;;  %v709_v0 = vrot.slane %v707_v51, 5  ;;  %v663_v2 = vrot.slane %v662_v52, 4  ;;  %v691_v3 = vrot.slane %v689_v53, 5  ;;  %v883_v51 = vld [vmem:[%s4821_s7 + $0xc] sm:$0xe] }
  0x51   : > { %v695_v4 = vrot.slane %v693_v54, 4  ;;  %v649_v6 = vrot.slane %v648_v57, 4  ;;  %v653_v7 = vrot.slane %v651_v55, 5  ;;  %v682_v9 = vrot.slane %v680_v58, 4  ;;  %v884_v53 = vld [vmem:[%s4821_s7 + $0x10] sm:$0xf] }
  0x52   : > { %v685_v10 = vrot.slane %v683_v59, 5  ;;  %v678_v11 = vsel %vm4832_vm2, %v673_v60, %v677_v61  ;;  %v713_v12 = vshll.u32 %v359_v62, 16  ;;  %v710_v13 = vor.u32 %v709_v0, %v706_v63  ;;  %v882_v54 = vld [vmem:[%s4821_s7 + $0x8] sm:$0x1]  ;;  %v880_v61 = vld [vmem:[%s4821_s7] sm:$0xe] }
  0x53   : > { %v699_v14 = vshll.u32 %v357_v1, 16  ;;  %v737_v15 = vshll.u32 %v362_v5, 16  ;;  %v741_v16 = vshrl.u32 %v362_v5, 16  ;;  %v668_v17 = vsel %vm4832_vm2, %v663_v2, %v4947_v31  ;;  %v363_v31 = vld [vmem:[%s4821_s7 + $0xbc] sm:$0x1] }
  0x54   : > { %v696_v18 = vor.u32 %v695_v4, %v691_v3  ;;  %v728_v19 = vshrl.u32 %v361_v8, 16  ;;  %v717_v21 = vshrl.u32 %v359_v62, 16  ;;  %v654_v22 = vsel %vm4832_vm2, %v649_v6, %v653_v7  ;;  %v887_v63 = vld [vmem:[%s4821_s7 + $0x1c] sm:$0xf]  ;;  %v255_v0 = vld [vmem:[%s4821_s7 + $0x18] sm:$0xf] }
  0x55   : > { %789 = vrot.lane.b32.xlu1 %v606_v20, %s4725_s8  ;;  %v731_v20 = vshll.u32 %v361_v8, 16  ;;  %v686_v23 = vor.u32 %v685_v10, %v682_v9  ;;  %v715_v26 = vrot.slane %v713_v12, 5  ;;  %v739_v27 = vrot.slane %v737_v15, 5  ;;  %288 = vst.msk [vmem:[#allocation2 + $0x10] sm:$0xf] %vm283_vm5, %v255_v0 }
  0x56   : > { %787 = vrot.lane.b32.xlu0 %v596_v24, %s4725_s8  ;;  %785 = vrot.lane.b32.xlu2 %v582_v29, %s4725_s8  ;;  %v711_v24 = vrot.slane %v710_v13, 4  ;;  %v743_v28 = vrot.slane %v741_v16, 4  ;;  %v697_v29 = vrot.slane %v696_v18, 4  ;;  %v701_v30 = vrot.slane %v699_v14, 5  ;;  %v253_v2 = vld [vmem:[%s4821_s7 + $0xc] sm:$0xf] }
  0x57   : > { %v730_v32 = vrot.slane %v728_v19, 4  ;;  %v733_v33 = vrot.slane %v731_v20, 5  ;;  %v687_v34 = vrot.slane %v686_v23, 4  ;;  %v719_v35 = vrot.slane %v717_v21, 4  ;;  %286 = vst.msk [vmem:[#allocation2 + $0x8] sm:$0xf] %vm283_vm5, %v253_v2 }
  0x58   : > { %v716_v37 = vsel %vm4832_vm2, %v711_v24, %v715_v26  ;;  %v744_v38 = vor.u32 %v743_v28, %v739_v27  ;;  %v747_v39 = vshll.u32 %v363_v31, 16  ;;  %v702_v40 = vsel %vm4832_vm2, %v697_v29, %v701_v30  ;;  %v888_v6 = vld [vmem:[%s4821_s7 + $0x20] sm:$0x1]  ;;  %v886_v9 = vld [vmem:[%s4821_s7 + $0x18] sm:$0xe] }
  0x59   : > { %v734_v41 = vor.u32 %v733_v33, %v730_v32  ;;  %v692_v42 = vsel %vm4832_vm2, %v687_v34, %v691_v3  ;;  %v720_v43 = vor.u32 %v719_v35, %v715_v26  ;;  %v723_v44 = vshll.u32 %v360_v36, 16  ;;  %v251_v3 = vld [vmem:[%s4821_s7] sm:$0xf]  ;;  %v885_v12 = vld [vmem:[%s4821_s7 + $0x14] sm:$0x1] }
  0x5a   : > { %v745_v45 = vrot.slane %v744_v38, 4  ;;  %v749_v46 = vrot.slane %v747_v39, 5  ;;  %v4123_v58 = vrot.slane %v883_v51, 9  ;;  %v988_v59 = vrot.slane %v884_v53, 5  ;;  %284 = vst.msk [vmem:[#allocation2] sm:$0xf] %vm283_vm5, %v251_v3 }
  0x5b   : > { %v735_v47 = vrot.slane %v734_v41, 4  ;;  %v725_v50 = vrot.slane %v723_v44, 5  ;;  %v984_v60 = vrot.slane %v882_v54, 5  ;;  %v4122_v4 = vrot.slane %v880_v61, 9  ;;  %v890_v15 = vld [vmem:[%s4821_s7 + $0x28] sm:$0xf] }
  0x5c   : > { %v750_v52 = vsel %vm4832_vm2, %v745_v45, %v749_v46  ;;  %v989_v5 = vsel %vm5007_vm6, %v4123_v58, %v988_v59  ;;  %v995_v7 = vrot.slane %v887_v63, 5  ;;  %v4124_v14 = vrot.slane %v886_v9, 9  ;;  %v256_v16 = vld [vmem:[%s4821_s7 + $0x1c] sm:$0xf]  ;;  %v252_v18 = vld [vmem:[%s4821_s7 + $0x4] sm:$0xf] }
  0x5d   : > { %795 = vrot.lane.b32.xlu1 %v644_v48, %s4725_s8  ;;  %v881_v48 = vld [vmem:[%s4821_s7 + $0x4] sm:$0xf]  ;;  %289 = vst.msk [vmem:[#allocation2 + $0x14] sm:$0xf] %vm283_vm5, %v256_v16  ;;  %v990_v19 = vrot.slane %v988_v59, 4  ;;  %v991_v20 = vrot.slane %v885_v12, 5 }
  0x5e   : > { %793 = vrot.lane.b32.xlu0 %v630_v49, %s4725_s8  ;;  %791 = vrot.lane.b32.xlu2 %v620_v56, %s4725_s8  ;;  %v721_v49 = vrot.slane %v720_v43, 4  ;;  %v981_v55 = vrot.slane %v881_v48, 5  ;;  %v740_v56 = vsel %vm4832_vm2, %v735_v47, %v739_v27  ;;  %v997_v13 = vrot.slane %v995_v7, 4  ;;  %285 = vst.msk [vmem:[#allocation2 + $0x4] sm:$0xf] %vm283_vm5, %v252_v18 }
  0x5f   : > { %v893_v23 = vld [vmem:[%s4821_s7 + $0x34] sm:$0xf]  ;;  %v1002_v24 = vrot.slane %v890_v15, 5  ;;  %v996_v26 = vsel %vm5007_vm6, %v4124_v14, %v995_v7  ;;  %v891_v27 = vld [vmem:[%s4821_s7 + $0x2c] sm:$0x1]  ;;  %v992_v28 = vsel %vm5007_vm6, %v990_v19, %v991_v20 }
  0x60   : > { %v726_v57 = vsel %vm4832_vm2, %v721_v49, %v725_v50  ;;  %v983_v62 = vrot.slane %v981_v55, 4  ;;  %v982_v10 = vsel %vm5007_vm6, %v4122_v4, %v981_v55  ;;  %v1009_v30 = vrot.slane %v893_v23, 5  ;;  %v889_v31 = vld [vmem:[%s4821_s7 + $0x24] sm:$0xe]  ;;  %v896_v34 = vld [vmem:[%s4821_s7 + $0x40] sm:$0xf] }
  0x61   : > { %v1004_v32 = vrot.slane %v1002_v24, 4  ;;  %v1005_v33 = vrot.slane %v891_v27, 5  ;;  %v259_v35 = vld [vmem:[%s4821_s7 + $0x30] sm:$0xf]  ;;  %v258_v36 = vld [vmem:[%s4821_s7 + $0x28] sm:$0xf] }
  0x62   : > { %v985_v8 = vsel %vm5007_vm6, %v983_v62, %v984_v60  ;;  %292 = vst.msk [vmem:[#allocation2 + $0x20] sm:$0xf] %vm283_vm5, %v259_v35  ;;  %v4125_v38 = vrot.slane %v889_v31, 9  ;;  %v1016_v41 = vrot.slane %v896_v34, 5  ;;  %v897_v43 = vld [vmem:[%s4821_s7 + $0x44] sm:$0x1] }
  0x63   : > { %291 = vst.msk [vmem:[#allocation2 + $0x1c] sm:$0xf] %vm283_vm5, %v258_v36  ;;  %v895_v44 = vld [vmem:[%s4821_s7 + $0x3c] sm:$0xe]  ;;  %v894_v46 = vld [vmem:[%s4821_s7 + $0x38] sm:$0x1] }
  0x64   : > { %v1003_v45 = vsel %vm5007_vm6, %v4125_v38, %v1002_v24  ;;  %v1018_v47 = vrot.slane %v1016_v41, 4  ;;  %v1019_v48 = vrot.slane %v897_v43, 5  ;;  %v4127_v49 = vrot.slane %v895_v44, 9  ;;  %v262_v50 = vld [vmem:[%s4821_s7 + $0x40] sm:$0xf] }
  0x65   : > { %801 = vrot.lane.b32.xlu1 %v678_v11, %s4725_s8  ;;  %v998_v11 = vrot.slane %v888_v6, 5  ;;  %295 = vst.msk [vmem:[#allocation2 + $0x2c] sm:$0xf] %vm283_vm5, %v262_v50  ;;  %v261_v51 = vld [vmem:[%s4821_s7 + $0x3c] sm:$0xf]  ;;  %v1011_v54 = vrot.slane %v1009_v30, 4 }
  0x66   : > { %799 = vrot.lane.b32.xlu0 %v668_v17, %s4725_s8  ;;  %797 = vrot.lane.b32.xlu2 %v654_v22, %s4725_s8  ;;  %v254_v17 = vld [vmem:[%s4821_s7 + $0x10] sm:$0xf]  ;;  %v899_v53 = vld [vmem:[%s4821_s7 + $0x4c] sm:$0xf]  ;;  %v1012_v55 = vrot.slane %v894_v46, 5  ;;  %v1017_v58 = vsel %vm5007_vm6, %v4127_v49, %v1016_v41 }
  0x67   : > { %287 = vst.msk [vmem:[#allocation2 + $0xc] sm:$0xf] %vm283_vm5, %v254_v17  ;;  %v999_v21 = vsel %vm5007_vm6, %v997_v13, %v998_v11  ;;  %v892_v22 = vld [vmem:[%s4821_s7 + $0x30] sm:$0xe]  ;;  %v901_v59 = vld [vmem:[%s4821_s7 + $0x54] sm:$0xe] }
  0x68   : > { %v4126_v29 = vrot.slane %v892_v22, 9  ;;  %294 = vst.msk [vmem:[#allocation2 + $0x28] sm:$0xf] %vm283_vm5, %v261_v51  ;;  %v902_v60 = vld [vmem:[%s4821_s7 + $0x58] sm:$0xf]  ;;  %v1023_v61 = vrot.slane %v899_v53, 5  ;;  %v1013_v63 = vsel %vm5007_vm6, %v1011_v54, %v1012_v55 }
  0x69   : > { %v900_v62 = vld [vmem:[%s4821_s7 + $0x50] sm:$0x1]  ;;  %v898_v0 = vld [vmem:[%s4821_s7 + $0x48] sm:$0xe]  ;;  %v4129_v2 = vrot.slane %v901_v59, 9  ;;  %v1030_v3 = vrot.slane %v902_v60, 5 }
  0x6a   : > { %v265_v4 = vld [vmem:[%s4821_s7 + $0x54] sm:$0xf]  ;;  %v1025_v6 = vrot.slane %v1023_v61, 4  ;;  %v1026_v7 = vrot.slane %v900_v62, 5  ;;  %v264_v11 = vld [vmem:[%s4821_s7 + $0x4c] sm:$0xf] }
  0x6b   : > { %298 = vst.msk [vmem:[#allocation2 + $0x38] sm:$0xf] %vm283_vm5, %v265_v4  ;;  %v263_v13 = vld [vmem:[%s4821_s7 + $0x48] sm:$0xf]  ;;  %v1031_v14 = vsel %vm5007_vm6, %v4129_v2, %v1030_v3  ;;  %v904_v18 = vld [vmem:[%s4821_s7 + $0x60] sm:$0xe] }
  0x6c   : > { %v1027_v16 = vsel %vm5007_vm6, %v1025_v6, %v1026_v7  ;;  %v906_v17 = vld [vmem:[%s4821_s7 + $0x68] sm:$0x1]  ;;  %297 = vst.msk [vmem:[#allocation2 + $0x34] sm:$0xf] %vm283_vm5, %v264_v11  ;;  %v903_v20 = vld [vmem:[%s4821_s7 + $0x5c] sm:$0x1] }
  0x6d   : > { %807 = vrot.lane.b32.xlu1 %v716_v37, %s4725_s8  ;;  %v257_v37 = vld [vmem:[%s4821_s7 + $0x24] sm:$0xf]  ;;  %296 = vst.msk [vmem:[#allocation2 + $0x30] sm:$0xf] %vm283_vm5, %v263_v13  ;;  %v1040_v22 = vrot.slane %v906_v17, 5 }
  0x6e   : > { %805 = vrot.lane.b32.xlu0 %v702_v40, %s4725_s8  ;;  %803 = vrot.lane.b32.xlu2 %v692_v42, %s4725_s8  ;;  %290 = vst.msk [vmem:[#allocation2 + $0x18] sm:$0xf] %vm283_vm5, %v257_v37  ;;  %v1010_v40 = vsel %vm5007_vm6, %v4126_v29, %v1009_v30  ;;  %v1006_v42 = vsel %vm5007_vm6, %v1004_v32, %v1005_v33  ;;  %v268_v23 = vld [vmem:[%s4821_s7 + $0x64] sm:$0xf]  ;;  %v908_v27 = vld [vmem:[%s4821_s7 + $0x70] sm:$0xf] }
  0x6f   : > { %301 = vst.msk [vmem:[#allocation2 + $0x44] sm:$0xf] %vm283_vm5, %v268_v23  ;;  %v1032_v29 = vrot.slane %v1030_v3, 4  ;;  %v1033_v30 = vrot.slane %v903_v20, 5  ;;  %v267_v31 = vld [vmem:[%s4821_s7 + $0x60] sm:$0xf] }
  0x70   : > { %v266_v33 = vld [vmem:[%s4821_s7 + $0x58] sm:$0xf]  ;;  %v911_v37 = vld [vmem:[%s4821_s7 + $0x7c] sm:$0xf]  ;;  %v1044_v38 = vrot.slane %v908_v27, 5 }
  0x71   : > { %v910_v35 = vld [vmem:[%s4821_s7 + $0x78] sm:$0xe]  ;;  %300 = vst.msk [vmem:[#allocation2 + $0x40] sm:$0xf] %vm283_vm5, %v267_v31  ;;  %v907_v41 = vld [vmem:[%s4821_s7 + $0x6c] sm:$0xe] }
  0x72   : > { %299 = vst.msk [vmem:[#allocation2 + $0x3c] sm:$0xf] %vm283_vm5, %v266_v33  ;;  %v1051_v43 = vrot.slane %v911_v37, 5  ;;  %v271_v44 = vld [vmem:[%s4821_s7 + $0x78] sm:$0xf]  ;;  %v1046_v46 = vrot.slane %v1044_v38, 4 }
  0x73   : > { %304 = vst.msk [vmem:[#allocation2 + $0x50] sm:$0xf] %vm283_vm5, %v271_v44  ;;  %v4131_v50 = vrot.slane %v907_v41, 9  ;;  %v270_v51 = vld [vmem:[%s4821_s7 + $0x70] sm:$0xf] }
  0x74   : > { %v269_v53 = vld [vmem:[%s4821_s7 + $0x6c] sm:$0xf]  ;;  %303 = vst.msk [vmem:[#allocation2 + $0x4c] sm:$0xf] %vm283_vm5, %v270_v51  ;;  %v912_v60 = vld [vmem:[%s4821_s7 + $0x80] sm:$0x1] }
  0x75   : > { %813 = vrot.lane.b32.xlu1 %v750_v52, %s4725_s8  ;;  %v260_v52 = vld [vmem:[%s4821_s7 + $0x34] sm:$0xf]  ;;  %v1045_v59 = vsel %vm5007_vm6, %v4131_v50, %v1044_v38  ;;  %302 = vst.msk [vmem:[#allocation2 + $0x48] sm:$0xf] %vm283_vm5, %v269_v53  ;;  %v1054_v6 = vrot.slane %v912_v60, 5 }
  0x76   : > { %811 = vrot.lane.b32.xlu0 %v740_v56, %s4725_s8  ;;  %809 = vrot.lane.b32.xlu2 %v726_v57, %s4725_s8  ;;  %293 = vst.msk [vmem:[#allocation2 + $0x24] sm:$0xf] %vm283_vm5, %v260_v52  ;;  %v1020_v57 = vsel %vm5007_vm6, %v1018_v47, %v1019_v48  ;;  %v914_v48 = vld [vmem:[%s4821_s7 + $0x88] sm:$0xf]  ;;  %v917_v3 = vld [vmem:[%s4821_s7 + $0x94] sm:$0xf] }
  0x77   : > { %v1058_v55 = vrot.slane %v914_v48, 5  ;;  %v273_v7 = vld [vmem:[%s4821_s7 + $0x84] sm:$0xf]  ;;  %v919_v11 = vld [vmem:[%s4821_s7 + $0x9c] sm:$0xe] }
  0x78   : > { %v920_v13 = vld [vmem:[%s4821_s7 + $0xa0] sm:$0xf]  ;;  %306 = vst.msk [vmem:[#allocation2 + $0x58] sm:$0xf] %vm283_vm5, %v273_v7  ;;  %v916_v17 = vld [vmem:[%s4821_s7 + $0x90] sm:$0xe] }
  0x79   : > { %v277_v20 = vld [vmem:[%s4821_s7 + $0x9c] sm:$0xf]  ;;  %v4134_v27 = vrot.slane %v916_v17, 9  ;;  %v921_v37 = vld [vmem:[%s4821_s7 + $0xa4] sm:$0x1] }
  0x7a   : > { %310 = vst.msk [vmem:[#allocation2 + $0x68] sm:$0xf] %vm283_vm5, %v277_v20  ;;  %v927_v53 = vld [vmem:[%s4821_s7 + $0xbc] sm:$0x1] }
  0x7b   : > { %v4141_v7 = vld [vmem:[%s4821_s7 + $0x1c] sm:$0xf] }
  0x7c   : > { %v4146_v20 = vld [vmem:[%s4821_s7 + $0x3c] sm:$0xf] }
  0x7d   : > { %1095 = vrot.lane.b32.xlu1 %v989_v5, %s4726_s9 }
  0x7e   : > { %1093 = vrot.lane.b32.xlu0 %v985_v8, %s4726_s9  ;;  %1091 = vrot.lane.b32.xlu2 %v982_v10, %s4726_s9  ;;  %v905_v8 = vld [vmem:[%s4821_s7 + $0x64] sm:$0xf]  ;;  %v4128_v10 = vrot.slane %v898_v0, 9 }
  0x7f   : > { %v1037_v15 = vrot.slane %v905_v8, 5 }
  0x80   : > { %v1024_v19 = vsel %vm5007_vm6, %v4128_v10, %v1023_v61  ;;  %v1060_v61 = vrot.slane %v1058_v55, 4 }
  0x85   : > { %1101 = vrot.lane.b32.xlu1 %v999_v21, %s4726_s9  ;;  %v1039_v21 = vrot.slane %v1037_v15, 4 }
  0x86   : > { %1099 = vrot.lane.b32.xlu0 %v996_v26, %s4726_s9  ;;  %1097 = vrot.lane.b32.xlu2 %v992_v28, %s4726_s9  ;;  %v4130_v26 = vrot.slane %v904_v18, 9  ;;  %v4135_v18 = vrot.slane %v919_v11, 9 }
  0x87   : > { %v1041_v34 = vsel %vm5007_vm6, %v1039_v21, %v1040_v22 }
  0x88   : > { %v760_v39 = vpop.permute.xlu2 %759  ;;  %v1038_v36 = vsel %vm5007_vm6, %v4130_v26, %v1037_v15  ;;  %v918_v15 = vld [vmem:[%s4821_s7 + $0x98] sm:$0x1] }
  0x89   : > { %852 = vst.msk [vmem:[#allocation2 + $0x10] sm:$0xf] %vm847_vm7, %v760_v39  ;;  %v909_v39 = vld [vmem:[%s4821_s7 + $0x74] sm:$0x1]  ;;  %v1068_v23 = vrot.slane %v918_v15, 5 }
  0x8a   : > { %v1047_v47 = vrot.slane %v909_v39, 5  ;;  %v4142_v15 = vld [vmem:[%s4821_s7 + $0x24] sm:$0xf] }
  0x8d   : > { %1107 = vrot.lane.b32.xlu1 %v1010_v40, %s4726_s9  ;;  %v1034_v40 = vsel %vm5007_vm6, %v1032_v29, %v1033_v30  ;;  %v275_v30 = vld [vmem:[%s4821_s7 + $0x90] sm:$0xf] }
  0x8e   : > { %1105 = vrot.lane.b32.xlu0 %v1006_v42, %s4726_s9  ;;  %1103 = vrot.lane.b32.xlu2 %v1003_v45, %s4726_s9  ;;  %v4132_v42 = vrot.slane %v910_v35, 9  ;;  %v922_v35 = vld [vmem:[%s4821_s7 + $0xa8] sm:$0xe]  ;;  %308 = vst.msk [vmem:[#allocation2 + $0x60] sm:$0xf] %vm283_vm5, %v275_v30 }
  0x90   : > { %v762_v56 = vpop.permute.xlu2 %761  ;;  %v1052_v54 = vsel %vm5007_vm6, %v4132_v42, %v1051_v43  ;;  %v4136_v42 = vrot.slane %v922_v35, 9 }
  0x91   : > { %853 = vst.msk [vmem:[#allocation2 + $0x14] sm:$0xf] %vm847_vm7, %v762_v56  ;;  %v1048_v56 = vsel %vm5007_vm6, %v1046_v46, %v1047_v47  ;;  %v1075_v46 = vrot.slane %v921_v37, 5  ;;  %v279_v47 = vld [vmem:[%s4821_s7 + $0xa8] sm:$0xf] }
  0x92   : > { %312 = vst.msk [vmem:[#allocation2 + $0x70] sm:$0xf] %vm283_vm5, %v279_v47 }
  0x95   : > { %1113 = vrot.lane.b32.xlu1 %v1020_v57, %s4726_s9  ;;  %v915_v57 = vld [vmem:[%s4821_s7 + $0x8c] sm:$0x1] }
  0x96   : > { %1111 = vrot.lane.b32.xlu0 %v1017_v58, %s4726_s9  ;;  %1109 = vrot.lane.b32.xlu2 %v1013_v63, %s4726_s9  ;;  %v913_v58 = vld [vmem:[%s4821_s7 + $0x84] sm:$0xe]  ;;  %v1061_v62 = vrot.slane %v915_v57, 5  ;;  %v274_v63 = vld [vmem:[%s4821_s7 + $0x88] sm:$0xf] }
  0x97   : > { %v756_v5 = vpop.permute.xlu1 %755  ;;  %v4133_v2 = vrot.slane %v913_v58, 9  ;;  %307 = vst.msk [vmem:[#allocation2 + $0x5c] sm:$0xf] %vm283_vm5, %v274_v63  ;;  %v1089_v58 = vrot.slane %v927_v53, 5  ;;  %v281_v63 = vld [vmem:[%s4821_s7 + $0xb4] sm:$0xf] }
  0x98   : > { %850 = vst.msk [vmem:[#allocation2 + $0x8] sm:$0xf] %vm847_vm7, %v756_v5  ;;  %v752_v9 = vpop.permute.xlu0 %751  ;;  %v768_v12 = vpop.permute.xlu2 %767  ;;  %v1053_v5 = vrot.slane %v1051_v43, 4  ;;  %v1062_v10 = vsel %vm5007_vm6, %v1060_v61, %v1061_v62  ;;  %v926_v43 = vld [vmem:[%s4821_s7 + $0xb8] sm:$0xf] }
  0x99   : > { %848 = vst.msk [vmem:[#allocation2] sm:$0xf] %vm847_vm7, %v752_v9  ;;  %v272_v9 = vld [vmem:[%s4821_s7 + $0x7c] sm:$0xf]  ;;  %v282_v61 = vld [vmem:[%s4821_s7 + $0xb8] sm:$0xf] }
  0x9a   : > { %856 = vst.msk [vmem:[#allocation2 + $0x20] sm:$0xf] %vm847_vm7, %v768_v12  ;;  %v1059_v12 = vsel %vm5007_vm6, %v4133_v2, %v1058_v55  ;;  %v925_v55 = vld [vmem:[%s4821_s7 + $0xb4] sm:$0xe]  ;;  %v4171_v53 = vld [vmem:[%s4821_s7 + $0x10] sm:$0xf] }
  0x9b   : > { %305 = vst.msk [vmem:[#allocation2 + $0x54] sm:$0xf] %vm283_vm5, %v272_v9  ;;  %v4137_v60 = vrot.slane %v925_v55, 9  ;;  %v4139_v9 = vld [vmem:[%s4821_s7 + $0x10] sm:$0xf] }
  0x9c   : > { %315 = vst.msk [vmem:[#allocation2 + $0x7c] sm:$0xf] %vm283_vm5, %v282_v61  ;;  %v4164_v61 = vld [vmem:[%s4821_s7 + $0xa8] sm:$0xf] }
  0x9d   : > { %1119 = vrot.lane.b32.xlu1 %v1031_v14, %s4726_s9  ;;  %v1065_v14 = vrot.slane %v917_v3, 5  ;;  %314 = vst.msk [vmem:[#allocation2 + $0x78] sm:$0xf] %vm283_vm5, %v281_v63 }
  0x9e   : > { %1117 = vrot.lane.b32.xlu0 %v1027_v16, %s4726_s9  ;;  %1115 = vrot.lane.b32.xlu2 %v1024_v19, %s4726_s9  ;;  %v1055_v16 = vsel %vm5007_vm6, %v1053_v5, %v1054_v6  ;;  %v1072_v19 = vrot.slane %v920_v13, 5  ;;  %v4144_v13 = vld [vmem:[%s4821_s7 + $0x30] sm:$0xf] }
  0x9f   : > { %v758_v24 = vpop.permute.xlu1 %757  ;;  %v1067_v22 = vrot.slane %v1065_v14, 4 }
  0xa0   : > { %851 = vst.msk [vmem:[#allocation2 + $0xc] sm:$0xf] %vm847_vm7, %v758_v24  ;;  %v754_v28 = vpop.permute.xlu0 %753  ;;  %v774_v32 = vpop.permute.xlu2 %773  ;;  %v923_v24 = vld [vmem:[%s4821_s7 + $0xac] sm:$0xf]  ;;  %v1073_v31 = vsel %vm5007_vm6, %v4135_v18, %v1072_v19 }
  0xa1   : > { %849 = vst.msk [vmem:[#allocation2 + $0x4] sm:$0xf] %vm847_vm7, %v754_v28  ;;  %v276_v28 = vld [vmem:[%s4821_s7 + $0x94] sm:$0xf]  ;;  %v1069_v33 = vsel %vm5007_vm6, %v1067_v22, %v1068_v23 }
  0xa2   : > { %859 = vst.msk [vmem:[#allocation2 + $0x2c] sm:$0xf] %vm847_vm7, %v774_v32  ;;  %v1079_v32 = vrot.slane %v923_v24, 5 }
  0xa3   : > { %309 = vst.msk [vmem:[#allocation2 + $0x64] sm:$0xf] %vm283_vm5, %v276_v28  ;;  %v4148_v28 = vld [vmem:[%s4821_s7 + $0x48] sm:$0xf] }
  0xa4   : > { %v1081_v38 = vrot.slane %v1079_v32, 4  ;;  %v1080_v51 = vsel %vm5007_vm6, %v4136_v42, %v1079_v32  ;;  %v4153_v32 = vld [vmem:[%s4821_s7 + $0x64] sm:$0xf] }
  0xa5   : > { %1125 = vrot.lane.b32.xlu1 %v1041_v34, %s4726_s9  ;;  %v924_v34 = vld [vmem:[%s4821_s7 + $0xb0] sm:$0x1] }
  0xa6   : > { %1123 = vrot.lane.b32.xlu0 %v1038_v36, %s4726_s9  ;;  %1121 = vrot.lane.b32.xlu2 %v1034_v40, %s4726_s9  ;;  %v1066_v36 = vsel %vm5007_vm6, %v4134_v27, %v1065_v14  ;;  %v1082_v39 = vrot.slane %v924_v34, 5  ;;  %v280_v40 = vld [vmem:[%s4821_s7 + $0xac] sm:$0xf]  ;;  %v4143_v14 = vld [vmem:[%s4821_s7 + $0x28] sm:$0xf] }
  0xa7   : > { %v766_v45 = vpop.permute.xlu1 %765  ;;  %313 = vst.msk [vmem:[#allocation2 + $0x74] sm:$0xf] %vm283_vm5, %v280_v40  ;;  %v4149_v27 = vld [vmem:[%s4821_s7 + $0x4c] sm:$0xf]  ;;  %v4151_v34 = vld [vmem:[%s4821_s7 + $0x58] sm:$0xf] }
  0xa8   : > { %855 = vst.msk [vmem:[#allocation2 + $0x1c] sm:$0xf] %vm847_vm7, %v766_v45  ;;  %v764_v49 = vpop.permute.xlu0 %763  ;;  %v780_v52 = vpop.permute.xlu2 %779  ;;  %v1074_v45 = vrot.slane %v1072_v19, 4  ;;  %v1083_v50 = vsel %vm5007_vm6, %v1081_v38, %v1082_v39  ;;  %v4147_v19 = vld [vmem:[%s4821_s7 + $0x40] sm:$0xf] }
  0xa9   : > { %854 = vst.msk [vmem:[#allocation2 + $0x18] sm:$0xf] %vm847_vm7, %v764_v49  ;;  %v278_v49 = vld [vmem:[%s4821_s7 + $0xa0] sm:$0xf]  ;;  %v4156_v38 = vld [vmem:[%s4821_s7 + $0x78] sm:$0xf] }
  0xaa   : > { %862 = vst.msk [vmem:[#allocation2 + $0x38] sm:$0xf] %vm847_vm7, %v780_v52  ;;  %v1086_v52 = vrot.slane %v926_v43, 5  ;;  %v4155_v39 = vld [vmem:[%s4821_s7 + $0x70] sm:$0xf] }
  0xab   : > { %311 = vst.msk [vmem:[#allocation2 + $0x6c] sm:$0xf] %vm283_vm5, %v278_v49  ;;  %v4154_v40 = vld [vmem:[%s4821_s7 + $0x6c] sm:$0xf] }
  0xac   : > { %v1088_v57 = vrot.slane %v1086_v52, 4  ;;  %v1087_v3 = vsel %vm5007_vm6, %v4137_v60, %v1086_v52  ;;  %v4160_v52 = vld [vmem:[%s4821_s7 + $0x90] sm:$0xf]  ;;  %v4165_v60 = vld [vmem:[%s4821_s7 + $0xac] sm:$0xf] }
  0xad   : > { %1131 = vrot.lane.b32.xlu1 %v1052_v54, %s4726_s9  ;;  %v1076_v54 = vsel %vm5007_vm6, %v1074_v45, %v1075_v46  ;;  %v4158_v45 = vld [vmem:[%s4821_s7 + $0x84] sm:$0xf]  ;;  %v4157_v46 = vld [vmem:[%s4821_s7 + $0x7c] sm:$0xf] }
  0xae   : > { %1129 = vrot.lane.b32.xlu0 %v1048_v56, %s4726_s9  ;;  %1127 = vrot.lane.b32.xlu2 %v1045_v59, %s4726_s9  ;;  %v1090_v2 = vsel %vm5007_vm6, %v1088_v57, %v1089_v58  ;;  %v1475_v58 = vshll.u32 %v4171_v53, 16 }
  0xaf   : > { %v772_v0 = vpop.permute.xlu1 %771 }
  0xb0   : > { %858 = vst.msk [vmem:[#allocation2 + $0x28] sm:$0xf] %vm847_vm7, %v772_v0  ;;  %v770_v4 = vpop.permute.xlu0 %769  ;;  %v786_v8 = vpop.permute.xlu2 %785  ;;  %v4138_v0 = vld [vmem:[%s4821_s7 + $0xc] sm:$0xf] }
  0xb1   : > { %857 = vst.msk [vmem:[#allocation2 + $0x24] sm:$0xf] %vm847_vm7, %v770_v4 }
  0xb2   : > { %865 = vst.msk [vmem:[#allocation2 + $0x44] sm:$0xf] %vm847_vm7, %v786_v8  ;;  %v4140_v8 = vld [vmem:[%s4821_s7 + $0x18] sm:$0xf] }
  0xb5   : > { %1137 = vrot.lane.b32.xlu1 %v1062_v10, %s4726_s9 }
  0xb6   : > { %1135 = vrot.lane.b32.xlu0 %v1059_v12, %s4726_s9  ;;  %1133 = vrot.lane.b32.xlu2 %v1055_v16, %s4726_s9 }
  0xb7   : > { %v778_v21 = vpop.permute.xlu1 %777 }
  0xb8   : > { %861 = vst.msk [vmem:[#allocation2 + $0x34] sm:$0xf] %vm847_vm7, %v778_v21  ;;  %v776_v26 = vpop.permute.xlu0 %775  ;;  %v792_v29 = vpop.permute.xlu2 %791  ;;  %v4145_v21 = vld [vmem:[%s4821_s7 + $0x34] sm:$0xf] }
  0xb9   : > { %860 = vst.msk [vmem:[#allocation2 + $0x30] sm:$0xf] %vm847_vm7, %v776_v26  ;;  %v4150_v26 = vld [vmem:[%s4821_s7 + $0x54] sm:$0xf] }
  0xba   : > { %868 = vst.msk [vmem:[#allocation2 + $0x50] sm:$0xf] %vm847_vm7, %v792_v29 }
  0xbd   : > { %1143 = vrot.lane.b32.xlu1 %v1073_v31, %s4726_s9 }
  0xbe   : > { %1141 = vrot.lane.b32.xlu0 %v1069_v33, %s4726_s9  ;;  %1139 = vrot.lane.b32.xlu2 %v1066_v36, %s4726_s9  ;;  %v4152_v33 = vld [vmem:[%s4821_s7 + $0x60] sm:$0xf] }
  0xbf   : > { %v784_v41 = vpop.permute.xlu1 %783 }
  0xc0   : > { %864 = vst.msk [vmem:[#allocation2 + $0x40] sm:$0xf] %vm847_vm7, %v784_v41  ;;  %v782_v44 = vpop.permute.xlu0 %781  ;;  %v798_v48 = vpop.permute.xlu2 %797 }
  0xc1   : > { %863 = vst.msk [vmem:[#allocation2 + $0x3c] sm:$0xf] %vm847_vm7, %v782_v44  ;;  %v4159_v44 = vld [vmem:[%s4821_s7 + $0x88] sm:$0xf] }
  0xc2   : > { %871 = vst.msk [vmem:[#allocation2 + $0x5c] sm:$0xf] %vm847_vm7, %v798_v48 }
  0xc5   : > { %1149 = vrot.lane.b32.xlu1 %v1083_v50, %s4726_s9  ;;  %v4162_v50 = vld [vmem:[%s4821_s7 + $0x9c] sm:$0xf] }
  0xc6   : > { %1147 = vrot.lane.b32.xlu0 %v1080_v51, %s4726_s9  ;;  %1145 = vrot.lane.b32.xlu2 %v1076_v54, %s4726_s9  ;;  %v4161_v51 = vld [vmem:[%s4821_s7 + $0x94] sm:$0xf] }
  0xc7   : > { %v790_v56 = vpop.permute.xlu1 %789 }
  0xc8   : > { %867 = vst.msk [vmem:[#allocation2 + $0x4c] sm:$0xf] %vm847_vm7, %v790_v56  ;;  %v788_v59 = vpop.permute.xlu0 %787  ;;  %v804_v62 = vpop.permute.xlu2 %803  ;;  %v4170_v56 = vld [vmem:[%s4821_s7 + $0xc] sm:$0xf] }
  0xc9   : > { %866 = vst.msk [vmem:[#allocation2 + $0x48] sm:$0xf] %vm847_vm7, %v788_v59  ;;  %v1479_v59 = vshrl.u32 %v4171_v53, 16  ;;  %v1469_v63 = vshll.u32 %v4170_v56, 16  ;;  %v4169_v53 = vld [vmem:[%s4821_s7 + $0xc4] sm:$0xf] }
  0xca   : > { %874 = vst.msk [vmem:[#allocation2 + $0x68] sm:$0xf] %vm847_vm7, %v804_v62  ;;  %v1466_v62 = vshrl.u32 %v4170_v56, 16 }
  0xcd   : > { %1288 = vrot.lane.b32.xlu1 %v4138_v0, %s4727_s10  ;;  %v4163_v0 = vld [vmem:[%s4821_s7 + $0xa0] sm:$0xf] }
  0xce   : > { %1153 = vrot.lane.b32.xlu0 %v1090_v2, %s4726_s9  ;;  %1151 = vrot.lane.b32.xlu2 %v1087_v3, %s4726_s9  ;;  %v5319_v2 = vrot.slane %v1475_v58, 5  ;;  %v1481_v3 = vrot.slane %v1479_v59, 4 }
  0xcf   : > { %v796_v4 = vpop.permute.xlu1 %795 }
  0xd0   : > { %870 = vst.msk [vmem:[#allocation2 + $0x58] sm:$0xf] %vm847_vm7, %v796_v4  ;;  %v794_v5 = vpop.permute.xlu0 %793  ;;  %v810_v6 = vpop.permute.xlu2 %809  ;;  %v4172_v4 = vld [vmem:[%s4821_s7 + $0x14] sm:$0x1] }
  0xd1   : > { %869 = vst.msk [vmem:[#allocation2 + $0x54] sm:$0xf] %vm847_vm7, %v794_v5 }
  0xd2   : > { %877 = vst.msk [vmem:[#allocation2 + $0x74] sm:$0xf] %vm847_vm7, %v810_v6  ;;  %v1468_v6 = vrot.slane %v1466_v62, 4  ;;  %v4185_v62 = vld [vmem:[%s4821_s7 + $0x48] sm:$0xf] }
  0xd5   : > { %1294 = vrot.lane.b32.xlu1 %v4141_v7, %s4727_s10  ;;  %v1471_v7 = vrot.slane %v1469_v63, 5 }
  0xd6   : > { %1292 = vrot.lane.b32.xlu0 %v4140_v8, %s4727_s10  ;;  %1290 = vrot.lane.b32.xlu2 %v4139_v9, %s4727_s10  ;;  %v4176_v8 = vld [vmem:[%s4821_s7 + $0x24] sm:$0xf] }
  0xd7   : > { %v802_v10 = vpop.permute.xlu1 %801 }
  0xd8   : > { %873 = vst.msk [vmem:[#allocation2 + $0x64] sm:$0xf] %vm847_vm7, %v802_v10  ;;  %v800_v11 = vpop.permute.xlu0 %799  ;;  %v1092_v12 = vpop.permute.xlu2 %1091  ;;  %v4174_v10 = vld [vmem:[%s4821_s7 + $0x1c] sm:$0xf] }
  0xd9   : > { %872 = vst.msk [vmem:[#allocation2 + $0x60] sm:$0xf] %vm847_vm7, %v800_v11  ;;  %v1482_v11 = vor.u32 %v1481_v3, %v5319_v2  ;;  %v4183_v3 = vld [vmem:[%s4821_s7 + $0x40] sm:$0xf] }
  0xda   : > { %1188 = vst.msk [vmem:[#allocation2] sm:$0xf] %vm1187_vm8, %v1092_v12  ;;  %v1485_v12 = vshll.u32 %v4172_v4, 16 }
  0xdd   : > { %1300 = vrot.lane.b32.xlu1 %v4144_v13, %s4727_s10 }
  0xde   : > { %1298 = vrot.lane.b32.xlu0 %v4143_v14, %s4727_s10  ;;  %1296 = vrot.lane.b32.xlu2 %v4142_v15, %s4727_s10  ;;  %v4173_v14 = vld [vmem:[%s4821_s7 + $0x18] sm:$0xf]  ;;  %v4168_v15 = vld [vmem:[%s4821_s7 + $0xc0] sm:$0xf] }
  0xdf   : > { %v808_v16 = vpop.permute.xlu1 %807 }
  0xe0   : > { %876 = vst.msk [vmem:[#allocation2 + $0x70] sm:$0xf] %vm847_vm7, %v808_v16  ;;  %v806_v17 = vpop.permute.xlu0 %805  ;;  %v1098_v18 = vpop.permute.xlu2 %1097  ;;  %v1514_v16 = vshrl.u32 %v4176_v8, 16 }
  0xe1   : > { %875 = vst.msk [vmem:[#allocation2 + $0x6c] sm:$0xf] %vm847_vm7, %v806_v17  ;;  %v1517_v17 = vshll.u32 %v4176_v8, 16 }
  0xe2   : > { %1191 = vst.msk [vmem:[#allocation2 + $0xc] sm:$0xf] %vm1187_vm8, %v1098_v18  ;;  %v4167_v18 = vld [vmem:[%s4821_s7 + $0xb8] sm:$0xf] }
  0xe5   : > { %1306 = vrot.lane.b32.xlu1 %v4147_v19, %s4727_s10  ;;  %v1472_v19 = vor.u32 %v1471_v7, %v1468_v6  ;;  %v4182_v7 = vld [vmem:[%s4821_s7 + $0x3c] sm:$0xf] }
  0xe6   : > { %1304 = vrot.lane.b32.xlu0 %v4146_v20, %s4727_s10  ;;  %1302 = vrot.lane.b32.xlu2 %v4145_v21, %s4727_s10  ;;  %v1499_v20 = vshll.u32 %v4174_v10, 16  ;;  %v1503_v21 = vshrl.u32 %v4174_v10, 16 }
  0xe7   : > { %v814_v22 = vpop.permute.xlu1 %813 }
  0xe8   : > { %879 = vst.msk [vmem:[#allocation2 + $0x7c] sm:$0xf] %vm847_vm7, %v814_v22  ;;  %v812_v23 = vpop.permute.xlu0 %811  ;;  %v1104_v24 = vpop.permute.xlu2 %1103  ;;  %v4166_v22 = vld [vmem:[%s4821_s7 + $0xb4] sm:$0xf] }
  0xe9   : > { %878 = vst.msk [vmem:[#allocation2 + $0x78] sm:$0xf] %vm847_vm7, %v812_v23  ;;  %v1490_v23 = vshrl.u32 %v4173_v14, 16 }
  0xea   : > { %1194 = vst.msk [vmem:[#allocation2 + $0x18] sm:$0xf] %vm1187_vm8, %v1104_v24  ;;  %v1493_v24 = vshll.u32 %v4173_v14, 16 }
  0xed   : > { %1312 = vrot.lane.b32.xlu1 %v4150_v26, %s4727_s10  ;;  %v1483_v26 = vrot.slane %v1482_v11, 4 }
  0xee   : > { %1310 = vrot.lane.b32.xlu0 %v4149_v27, %s4727_s10  ;;  %1308 = vrot.lane.b32.xlu2 %v4148_v28, %s4727_s10  ;;  %v1487_v27 = vrot.slane %v1485_v12, 5  ;;  %v1516_v28 = vrot.slane %v1514_v16, 4  ;;  %v1586_v12 = vshrl.u32 %v4185_v62, 16  ;;  %v1571_v16 = vshll.u32 %v4183_v3, 16 }
  0xef   : > { %v1096_v29 = vpop.permute.xlu1 %1095 }
  0xf0   : > { %1190 = vst.msk [vmem:[#allocation2 + $0x8] sm:$0xf] %vm1187_vm8, %v1096_v29  ;;  %v1094_v30 = vpop.permute.xlu0 %1093  ;;  %v1110_v31 = vpop.permute.xlu2 %1109  ;;  %v1519_v29 = vrot.slane %v1517_v17, 5  ;;  %v1575_v17 = vshrl.u32 %v4183_v3, 16 }
  0xf1   : > { %1189 = vst.msk [vmem:[#allocation2 + $0x4] sm:$0xf] %vm1187_vm8, %v1094_v30  ;;  %v4180_v30 = vld [vmem:[%s4821_s7 + $0x34] sm:$0xf] }
  0xf2   : > { %1197 = vst.msk [vmem:[#allocation2 + $0x24] sm:$0xf] %vm1187_vm8, %v1110_v31  ;;  %v4179_v31 = vld [vmem:[%s4821_s7 + $0x30] sm:$0xf] }
  0xf5   : > { %1318 = vrot.lane.b32.xlu1 %v4153_v32, %s4727_s10 }
  0xf6   : > { %1316 = vrot.lane.b32.xlu0 %v4152_v33, %s4727_s10  ;;  %1314 = vrot.lane.b32.xlu2 %v4151_v34, %s4727_s10  ;;  %v1473_v33 = vrot.slane %v1472_v19, 4  ;;  %v4177_v34 = vld [vmem:[%s4821_s7 + $0x28] sm:$0xf]  ;;  %v4189_v19 = vld [vmem:[%s4821_s7 + $0x58] sm:$0xf] }
  0xf7   : > { %v1102_v35 = vpop.permute.xlu1 %1101 }
  0xf8   : > { %1193 = vst.msk [vmem:[#allocation2 + $0x14] sm:$0xf] %vm1187_vm8, %v1102_v35  ;;  %v1100_v36 = vpop.permute.xlu0 %1099  ;;  %v1116_v37 = vpop.permute.xlu2 %1115  ;;  %v5340_v35 = vrot.slane %v1499_v20, 5  ;;  %v1562_v20 = vshrl.u32 %v4182_v7, 16 }
  0xf9   : > { %1192 = vst.msk [vmem:[#allocation2 + $0x10] sm:$0xf] %vm1187_vm8, %v1100_v36  ;;  %v1505_v36 = vrot.slane %v1503_v21, 4  ;;  %v1565_v21 = vshll.u32 %v4182_v7, 16  ;;  %v4192_v7 = vld [vmem:[%s4821_s7 + $0x64] sm:$0xf] }
  0xfa   : > { %1200 = vst.msk [vmem:[#allocation2 + $0x30] sm:$0xf] %vm1187_vm8, %v1116_v37 }
  0xfd   : > { %1324 = vrot.lane.b32.xlu1 %v4156_v38, %s4727_s10  ;;  %v4175_v38 = vld [vmem:[%s4821_s7 + $0x20] sm:$0x1] }
  0xfe   : > { %1322 = vrot.lane.b32.xlu0 %v4155_v39, %s4727_s10  ;;  %1320 = vrot.lane.b32.xlu2 %v4154_v40, %s4727_s10  ;;  %v1492_v39 = vrot.slane %v1490_v23, 4  ;;  %v1495_v40 = vrot.slane %v1493_v24, 5 }
  0xff   : > { %v1108_v41 = vpop.permute.xlu1 %1107 }
 0x100   : > { %1196 = vst.msk [vmem:[#allocation2 + $0x20] sm:$0xf] %vm1187_vm8, %v1108_v41  ;;  %v1106_v42 = vpop.permute.xlu0 %1105  ;;  %v1122_v43 = vpop.permute.xlu2 %1121 }
 0x101   : > { %1195 = vst.msk [vmem:[#allocation2 + $0x1c] sm:$0xf] %vm1187_vm8, %v1106_v42  ;;  %v1547_v42 = vshll.u32 %v4180_v30, 16 }
 0x102   : > { %1203 = vst.msk [vmem:[#allocation2 + $0x3c] sm:$0xf] %vm1187_vm8, %v1122_v43  ;;  %v1551_v43 = vshrl.u32 %v4180_v30, 16  ;;  %v1588_v30 = vrot.slane %v1586_v12, 4 }
 0x104   : > { %v1553_v56 = vrot.slane %v1551_v43, 4 }
 0x105   : > { %1330 = vrot.lane.b32.xlu1 %v4159_v44, %s4727_s10  ;;  %v1538_v44 = vshrl.u32 %v4179_v31, 16 }
 0x106   : > { %1328 = vrot.lane.b32.xlu0 %v4158_v45, %s4727_s10  ;;  %1326 = vrot.lane.b32.xlu2 %v4157_v46, %s4727_s10  ;;  %v1541_v45 = vshll.u32 %v4179_v31, 16  ;;  %v1488_v46 = vsel %vm4832_vm2, %v1483_v26, %v1487_v27 }
 0x107   : > { %v1114_v47 = vpop.permute.xlu1 %1113 }
 0x108   : > { %1199 = vst.msk [vmem:[#allocation2 + $0x2c] sm:$0xf] %vm1187_vm8, %v1114_v47  ;;  %v1112_v48 = vpop.permute.xlu0 %1111  ;;  %v1128_v49 = vpop.permute.xlu2 %1127  ;;  %v1520_v47 = vor.u32 %v1519_v29, %v1516_v28  ;;  %v1543_v58 = vrot.slane %v1541_v45, 5  ;;  %v4186_v29 = vld [vmem:[%s4821_s7 + $0x4c] sm:$0xf] }
 0x109   : > { %1198 = vst.msk [vmem:[#allocation2 + $0x28] sm:$0xf] %vm1187_vm8, %v1112_v48  ;;  %v1523_v48 = vshll.u32 %v4177_v34, 16 }
 0x10a   : > { %1206 = vst.msk [vmem:[#allocation2 + $0x48] sm:$0xf] %vm1187_vm8, %v1128_v49  ;;  %v1478_v49 = vsel %vm4832_vm2, %v1473_v33, %v5319_v2  ;;  %v1521_v59 = vrot.slane %v1520_v47, 4  ;;  %v5379_v33 = vrot.slane %v1571_v16, 5 }
 0x10d   : > { %1336 = vrot.lane.b32.xlu1 %v4162_v50, %s4727_s10  ;;  %v1506_v50 = vor.u32 %v1505_v36, %v5340_v35  ;;  %v1619_v36 = vshll.u32 %v4189_v19, 16 }
 0x10e   : > { %1334 = vrot.lane.b32.xlu0 %v4161_v51, %s4727_s10  ;;  %1332 = vrot.lane.b32.xlu2 %v4160_v52, %s4727_s10  ;;  %v1509_v51 = vshll.u32 %v4175_v38, 16  ;;  %v1527_v52 = vshrl.u32 %v4177_v34, 16  ;;  %v1577_v34 = vrot.slane %v1575_v17, 4  ;;  %v4188_v38 = vld [vmem:[%s4821_s7 + $0x54] sm:$0xf]  ;;  %v1643_v17 = vshll.u32 %v4192_v7, 16 }
 0x10f   : > { %v1120_v54 = vpop.permute.xlu1 %1119 }
 0x110   : > { %1202 = vst.msk [vmem:[#allocation2 + $0x38] sm:$0xf] %vm1187_vm8, %v1120_v54  ;;  %v1118_v55 = vpop.permute.xlu0 %1117  ;;  %v1134_v57 = vpop.permute.xlu2 %1133  ;;  %v1496_v54 = vor.u32 %v1495_v40, %v1492_v39  ;;  %v1511_v2 = vrot.slane %v1509_v51, 5  ;;  %v1529_v6 = vrot.slane %v1527_v52, 4  ;;  %v1564_v39 = vrot.slane %v1562_v20, 4 }
 0x111   : > { %1201 = vst.msk [vmem:[#allocation2 + $0x34] sm:$0xf] %vm1187_vm8, %v1118_v55  ;;  %v5354_v55 = vrot.slane %v1547_v42, 5  ;;  %v1567_v40 = vrot.slane %v1565_v21, 5  ;;  %v1610_v51 = vshrl.u32 %v4188_v38, 16  ;;  %v5392_v52 = vrot.slane %v1619_v36, 5 }
 0x112   : > { %1209 = vst.msk [vmem:[#allocation2 + $0x54] sm:$0xf] %vm1187_vm8, %v1134_v57  ;;  %v1540_v57 = vrot.slane %v1538_v44, 4 }
 0x113   : > { %v1554_v8 = vor.u32 %v1553_v56, %v5354_v55  ;;  %v1568_v56 = vor.u32 %v1567_v40, %v1564_v39 }
 0x114   : > { %v1544_v10 = vor.u32 %v1543_v58, %v1540_v57  ;;  %v1599_v57 = vshrl.u32 %v4186_v29, 16 }
 0x115   : > { %1342 = vrot.lane.b32.xlu1 %v4165_v60, %s4727_s10  ;;  %v1525_v60 = vrot.slane %v1523_v48, 5  ;;  %v1555_v26 = vrot.slane %v1554_v8, 4 }
 0x116   : > { %1340 = vrot.lane.b32.xlu0 %v4164_v61, %s4727_s10  ;;  %1338 = vrot.lane.b32.xlu2 %v4163_v0, %s4727_s10  ;;  %v4181_v61 = vld [vmem:[%s4821_s7 + $0x38] sm:$0x1]  ;;  %v1507_v0 = vrot.slane %v1506_v50, 4  ;;  %v1545_v28 = vrot.slane %v1544_v10, 4 }
 0x117   : > { %v1126_v5 = vpop.permute.xlu1 %1125  ;;  %v1526_v14 = vsel %vm4832_vm2, %v1521_v59, %v1525_v60  ;;  %v1530_v23 = vor.u32 %v1529_v6, %v1525_v60  ;;  %v4194_v60 = vld [vmem:[%s4821_s7 + $0x6c] sm:$0xf]  ;;  %v1569_v6 = vrot.slane %v1568_v56, 4 }
 0x118   : > { %1205 = vst.msk [vmem:[#allocation2 + $0x44] sm:$0xf] %vm1187_vm8, %v1126_v5  ;;  %v1124_v9 = vpop.permute.xlu0 %1123  ;;  %v1140_v13 = vpop.permute.xlu2 %1139  ;;  %v1497_v5 = vrot.slane %v1496_v54, 4  ;;  %v1550_v45 = vsel %vm4832_vm2, %v1545_v28, %v5354_v55  ;;  %v1613_v54 = vshll.u32 %v4188_v38, 16  ;;  %v4190_v55 = vld [vmem:[%s4821_s7 + $0x5c] sm:$0x1] }
 0x119   : > { %1204 = vst.msk [vmem:[#allocation2 + $0x40] sm:$0xf] %vm1187_vm8, %v1124_v9  ;;  %v1557_v9 = vshll.u32 %v4181_v61, 16  ;;  %v1531_v42 = vrot.slane %v1530_v23, 4  ;;  %v1661_v10 = vshll.u32 %v4194_v60, 16 }
 0x11a   : > { %1212 = vst.msk [vmem:[#allocation2 + $0x60] sm:$0xf] %vm1187_vm8, %v1140_v13  ;;  %v4178_v13 = vld [vmem:[%s4821_s7 + $0x2c] sm:$0x1]  ;;  %v4193_v38 = vld [vmem:[%s4821_s7 + $0x68] sm:$0x1] }
 0x11b   : > { %v1533_v24 = vshll.u32 %v4178_v13, 16  ;;  %v1559_v27 = vrot.slane %v1557_v9, 5  ;;  %v1658_v9 = vshrl.u32 %v4194_v60, 16  ;;  %v4187_v13 = vld [vmem:[%s4821_s7 + $0x50] sm:$0x1] }
 0x11d   : > { %1348 = vrot.lane.b32.xlu1 %v4168_v15, %s4727_s10  ;;  %v1589_v15 = vshll.u32 %v4185_v62, 16  ;;  %v1535_v43 = vrot.slane %v1533_v24, 5  ;;  %v1560_v44 = vsel %vm4832_vm2, %v1555_v26, %v1559_v27  ;;  %v1605_v24 = vshll.u32 %v4187_v13, 16 }
 0x11e   : > { %1346 = vrot.lane.b32.xlu0 %v4167_v18, %s4727_s10  ;;  %1344 = vrot.lane.b32.xlu2 %v4166_v22, %s4727_s10  ;;  %v1512_v18 = vsel %vm4832_vm2, %v1507_v0, %v1511_v2  ;;  %v1502_v22 = vsel %vm4832_vm2, %v1497_v5, %v5340_v35  ;;  %v1623_v35 = vshrl.u32 %v4189_v19, 16  ;;  %v1612_v0 = vrot.slane %v1610_v51, 4 }
 0x11f   : > { %v1132_v32 = vpop.permute.xlu1 %1131  ;;  %v1591_v31 = vrot.slane %v1589_v15, 5  ;;  %v1536_v58 = vsel %vm4832_vm2, %v1531_v42, %v1535_v43  ;;  %v1615_v5 = vrot.slane %v1613_v54, 5  ;;  %v1660_v28 = vrot.slane %v1658_v9, 4  ;;  %v4200_v9 = vld [vmem:[%s4821_s7 + $0x84] sm:$0xf] }
 0x120   : > { %1208 = vst.msk [vmem:[#allocation2 + $0x50] sm:$0xf] %vm1187_vm8, %v1132_v32  ;;  %v1130_v37 = vpop.permute.xlu0 %1129  ;;  %v1146_v41 = vpop.permute.xlu2 %1145  ;;  %v4184_v32 = vld [vmem:[%s4821_s7 + $0x44] sm:$0x1] }
 0x121   : > { %1207 = vst.msk [vmem:[#allocation2 + $0x4c] sm:$0xf] %vm1187_vm8, %v1130_v37  ;;  %v1592_v48 = vor.u32 %v1591_v31, %v1588_v30  ;;  %v1581_v50 = vshll.u32 %v4184_v32, 16  ;;  %v1616_v21 = vor.u32 %v1615_v5, %v1612_v0  ;;  %v5417_v30 = vrot.slane %v1643_v17, 5  ;;  %v4198_v32 = vld [vmem:[%s4821_s7 + $0x7c] sm:$0xf] }
 0x122   : > { %1215 = vst.msk [vmem:[#allocation2 + $0x6c] sm:$0xf] %vm1187_vm8, %v1146_v41  ;;  %v4201_v5 = vld [vmem:[%s4821_s7 + $0x88] sm:$0xf] }
 0x123   : > { %v1593_v61 = vrot.slane %v1592_v48, 4 }
 0x125   : > { %1851 = vrot.lane.b32.xlu1 %v1488_v46, %s4728_s11  ;;  %v1595_v46 = vshll.u32 %v4186_v29, 16  ;;  %v1663_v29 = vrot.slane %v1661_v10, 5 }
 0x126   : > { %1849 = vrot.lane.b32.xlu0 %v1478_v49, %s4728_s11  ;;  %1350 = vrot.lane.b32.xlu2 %v4169_v53, %s4727_s10  ;;  %v1578_v49 = vor.u32 %v1577_v34, %v5379_v33  ;;  %v1625_v53 = vrot.slane %v1623_v35, 4  ;;  %v4197_v34 = vld [vmem:[%s4821_s7 + $0x78] sm:$0xf]  ;;  %v4195_v35 = vld [vmem:[%s4821_s7 + $0x70] sm:$0xf] }
 0x127   : > { %v1138_v63 = vpop.permute.xlu1 %1137  ;;  %v1597_v59 = vrot.slane %v1595_v46, 5  ;;  %v1695_v46 = vshrl.u32 %v4198_v32, 16  ;;  %v1685_v48 = vshll.u32 %v4197_v34, 16  ;;  %v1671_v56 = vshrl.u32 %v4195_v35, 16 }
 0x128   : > { %1211 = vst.msk [vmem:[#allocation2 + $0x5c] sm:$0xf] %vm1187_vm8, %v1138_v63  ;;  %v1136_v4 = vpop.permute.xlu0 %1135  ;;  %v1152_v11 = vpop.permute.xlu2 %1151  ;;  %v1579_v62 = vrot.slane %v1578_v49, 4  ;;  %v1583_v63 = vrot.slane %v1581_v50, 5  ;;  %v1626_v3 = vor.u32 %v1625_v53, %v5392_v52  ;;  %v1664_v49 = vor.u32 %v1663_v29, %v1660_v28 }
 0x129   : > { %1210 = vst.msk [vmem:[#allocation2 + $0x58] sm:$0xf] %vm1187_vm8, %v1136_v4  ;;  %v1629_v4 = vshll.u32 %v4190_v55, 16  ;;  %v1598_v15 = vsel %vm4832_vm2, %v1593_v61, %v1597_v59  ;;  %v1667_v50 = vshll.u32 %v4195_v35, 16  ;;  %v1653_v53 = vshll.u32 %v4193_v38, 16 }
 0x12a   : > { %1218 = vst.msk [vmem:[#allocation2 + $0x78] sm:$0xf] %vm1187_vm8, %v1152_v11  ;;  %v1601_v11 = vrot.slane %v1599_v57, 4  ;;  %v1584_v16 = vsel %vm4832_vm2, %v1579_v62, %v1583_v63  ;;  %v1627_v19 = vrot.slane %v1626_v3, 4  ;;  %v1687_v61 = vrot.slane %v1685_v48, 5 }
 0x12b   : > { %v1631_v20 = vrot.slane %v1629_v4, 5  ;;  %v1665_v62 = vrot.slane %v1664_v49, 4  ;;  %v1669_v63 = vrot.slane %v1667_v50, 5  ;;  %v1655_v0 = vrot.slane %v1653_v53, 5  ;;  %v4203_v4 = vld [vmem:[%s4821_s7 + $0x90] sm:$0xf] }
 0x12c   : > { %v1602_v23 = vor.u32 %v1601_v11, %v1597_v59  ;;  %v1697_v59 = vrot.slane %v1695_v46, 4  ;;  %v1730_v17 = vshrl.u32 %v4203_v4, 16 }
 0x12d   : > { %1857 = vrot.lane.b32.xlu1 %v1526_v14, %s4728_s11  ;;  %v4191_v14 = vld [vmem:[%s4821_s7 + $0x60] sm:$0xf] }
 0x12e   : > { %1855 = vrot.lane.b32.xlu0 %v1512_v18, %s4728_s11  ;;  %1853 = vrot.lane.b32.xlu2 %v1502_v22, %s4728_s11  ;;  %v1647_v18 = vshrl.u32 %v4192_v7, 16  ;;  %v1574_v22 = vsel %vm4832_vm2, %v1569_v6, %v5379_v33  ;;  %v1634_v26 = vshrl.u32 %v4191_v14, 16  ;;  %v1637_v27 = vshll.u32 %v4191_v14, 16  ;;  %v4196_v14 = vld [vmem:[%s4821_s7 + $0x74] sm:$0x1] }
 0x12f   : > { %v1144_v37 = vpop.permute.xlu1 %1143  ;;  %v1632_v33 = vsel %vm4832_vm2, %v1627_v19, %v1631_v20  ;;  %v1603_v40 = vrot.slane %v1602_v23, 4  ;;  %v1715_v19 = vshll.u32 %v4201_v5, 16  ;;  %v1719_v20 = vshrl.u32 %v4201_v5, 16 }
 0x130   : > { %1214 = vst.msk [vmem:[#allocation2 + $0x68] sm:$0xf] %vm1187_vm8, %v1144_v37  ;;  %v1142_v41 = vpop.permute.xlu0 %1141  ;;  %v1291_v47 = vpop.permute.xlu2 %1290  ;;  %v1649_v31 = vrot.slane %v1647_v18, 4  ;;  %v1617_v37 = vrot.slane %v1616_v21, 4  ;;  %v1636_v42 = vrot.slane %v1634_v26, 4  ;;  %v1639_v43 = vrot.slane %v1637_v27, 5 }
 0x131   : > { %1213 = vst.msk [vmem:[#allocation2 + $0x64] sm:$0xf] %vm1187_vm8, %v1142_v41  ;;  %v1607_v41 = vrot.slane %v1605_v24, 5  ;;  %v1733_v18 = vshll.u32 %v4203_v4, 16  ;;  %v1706_v21 = vshrl.u32 %v4200_v9, 16  ;;  %v1677_v26 = vshll.u32 %v4196_v14, 16 }
 0x132   : > { %1386 = vst.msk [vmem:[#allocation2 + $0x4] sm:$0xf] %vm1384_vm9, %v1291_v47  ;;  %v1682_v47 = vshrl.u32 %v4197_v34, 16  ;;  %v1650_v51 = vor.u32 %v1649_v31, %v5417_v30  ;;  %v1622_v54 = vsel %vm4832_vm2, %v1617_v37, %v5392_v52  ;;  %v1732_v31 = vrot.slane %v1730_v17, 4  ;;  %v4207_v34 = vld [vmem:[%s4821_s7 + $0xa0] sm:$0xf] }
 0x133   : > { %v1608_v57 = vsel %vm4832_vm2, %v1603_v40, %v1607_v41  ;;  %v4204_v37 = vld [vmem:[%s4821_s7 + $0x94] sm:$0xf]  ;;  %v5462_v35 = vrot.slane %v1715_v19, 5  ;;  %v1708_v38 = vrot.slane %v1706_v21, 4  ;;  %v4202_v41 = vld [vmem:[%s4821_s7 + $0x8c] sm:$0x1] }
 0x134   : > { %v1684_v60 = vrot.slane %v1682_v47, 4  ;;  %v1651_v52 = vrot.slane %v1650_v51, 4  ;;  %v1767_v46 = vshrl.u32 %v4207_v34, 16  ;;  %v1739_v51 = vshll.u32 %v4204_v37, 16  ;;  %v4205_v14 = vld [vmem:[%s4821_s7 + $0x98] sm:$0x1] }
 0x135   : > { %1863 = vrot.lane.b32.xlu1 %v1560_v44, %s4728_s11 }
 0x136   : > { %1861 = vrot.lane.b32.xlu0 %v1550_v45, %s4728_s11  ;;  %1859 = vrot.lane.b32.xlu2 %v1536_v58, %s4728_s11  ;;  %v1691_v45 = vshll.u32 %v4198_v32, 16  ;;  %v1640_v58 = vor.u32 %v1639_v43, %v1636_v42  ;;  %v1735_v32 = vrot.slane %v1733_v18, 5  ;;  %v1679_v43 = vrot.slane %v1677_v26, 5 }
 0x137   : > { %v1150_v2 = vpop.permute.xlu1 %1149 }
 0x138   : > { %1217 = vst.msk [vmem:[#allocation2 + $0x74] sm:$0xf] %vm1187_vm8, %v1150_v2  ;;  %v1148_v8 = vpop.permute.xlu0 %1147  ;;  %v1297_v12 = vpop.permute.xlu2 %1296  ;;  %v5436_v55 = vrot.slane %v1691_v45, 5  ;;  %v4199_v2 = vld [vmem:[%s4821_s7 + $0x80] sm:$0x1]  ;;  %v1641_v7 = vrot.slane %v1640_v58, 4  ;;  %v1736_v50 = vor.u32 %v1735_v32, %v1732_v31 }
 0x139   : > { %1216 = vst.msk [vmem:[#allocation2 + $0x70] sm:$0xf] %vm1187_vm8, %v1148_v8  ;;  %v1673_v8 = vrot.slane %v1671_v56, 4  ;;  %v1701_v11 = vshll.u32 %v4199_v2, 16  ;;  %v1763_v45 = vshll.u32 %v4207_v34, 16  ;;  %v1725_v56 = vshll.u32 %v4202_v41, 16 }
 0x13a   : > { %1389 = vst.msk [vmem:[#allocation2 + $0x10] sm:$0xf] %vm1384_vm9, %v1297_v12  ;;  %v1698_v10 = vor.u32 %v1697_v59, %v5436_v55  ;;  %v1688_v12 = vor.u32 %v1687_v61, %v1684_v60  ;;  %v1646_v23 = vsel %vm4832_vm2, %v1641_v7, %v5417_v30  ;;  %v1721_v30 = vrot.slane %v1719_v20, 4  ;;  %v4208_v60 = vld [vmem:[%s4821_s7 + $0xa4] sm:$0x1] }
 0x13b   : > { %v1674_v24 = vor.u32 %v1673_v8, %v1669_v63  ;;  %v1703_v28 = vrot.slane %v1701_v11, 5  ;;  %v1743_v58 = vshrl.u32 %v4204_v37, 16  ;;  %v5478_v61 = vrot.slane %v1763_v45, 5  ;;  %v4213_v32 = vld [vmem:[%s4821_s7 + $0xb8] sm:$0xf] }
 0x13c   : > { %v1699_v27 = vrot.slane %v1698_v10, 4  ;;  %v1689_v29 = vrot.slane %v1688_v12, 4  ;;  %v1727_v4 = vrot.slane %v1725_v56, 5  ;;  %v1773_v8 = vshll.u32 %v4208_v60, 16 }
 0x13d   : > { %1869 = vrot.lane.b32.xlu1 %v1598_v15, %s4728_s11  ;;  %v1670_v15 = vsel %vm4832_vm2, %v1665_v62, %v1669_v63  ;;  %v1675_v42 = vrot.slane %v1674_v24, 4  ;;  %v1769_v62 = vrot.slane %v1767_v46, 4  ;;  %v1745_v10 = vrot.slane %v1743_v58, 4 }
 0x13e   : > { %1867 = vrot.lane.b32.xlu0 %v1584_v16, %s4728_s11  ;;  %1865 = vrot.lane.b32.xlu2 %v1574_v22, %s4728_s11  ;;  %v1656_v16 = vsel %vm4832_vm2, %v1651_v52, %v1655_v0  ;;  %v1709_v22 = vshll.u32 %v4200_v9, 16  ;;  %v1704_v49 = vsel %vm4832_vm2, %v1699_v27, %v1703_v28  ;;  %v1694_v53 = vsel %vm4832_vm2, %v1689_v29, %v5436_v55  ;;  %v4210_v9 = vld [vmem:[%s4821_s7 + $0xac] sm:$0xf] }
 0x13f   : > { %v1289_v36 = vpop.permute.xlu1 %1288  ;;  %v1680_v59 = vsel %vm4832_vm2, %v1675_v42, %v1679_v43  ;;  %v1737_v55 = vrot.slane %v1736_v50, 4  ;;  %v1741_v0 = vrot.slane %v1739_v51, 5  ;;  %v1770_v11 = vor.u32 %v1769_v62, %v5478_v61 }
 0x140   : > { %1385 = vst.msk [vmem:[#allocation2] sm:$0xf] %vm1384_vm9, %v1289_v36  ;;  %v1154_v39 = vpop.permute.xlu0 %1153  ;;  %v1303_v44 = vpop.permute.xlu2 %1302  ;;  %v4206_v36 = vld [vmem:[%s4821_s7 + $0x9c] sm:$0xf]  ;;  %v1787_v21 = vshll.u32 %v4210_v9, 16  ;;  %v1749_v24 = vshll.u32 %v4205_v14, 16 }
 0x141   : > { %1219 = vst.msk [vmem:[#allocation2 + $0x7c] sm:$0xf] %vm1187_vm8, %v1154_v39  ;;  %v1711_v39 = vrot.slane %v1709_v22, 5  ;;  %v1754_v47 = vshrl.u32 %v4206_v36, 16  ;;  %v1757_v48 = vshll.u32 %v4206_v36, 16  ;;  %v1791_v22 = vshrl.u32 %v4210_v9, 16 }
 0x142   : > { %1392 = vst.msk [vmem:[#allocation2 + $0x1c] sm:$0xf] %vm1384_vm9, %v1303_v44  ;;  %v1771_v28 = vrot.slane %v1770_v11, 4  ;;  %v1775_v29 = vrot.slane %v1773_v8, 5  ;;  %v1751_v42 = vrot.slane %v1749_v24, 5  ;;  %v1815_v58 = vshrl.u32 %v4213_v32, 16 }
 0x143   : > { %v1756_v63 = vrot.slane %v1754_v47, 4  ;;  %v1759_v52 = vrot.slane %v1757_v48, 5  ;;  %v4219_v24 = vld [vmem:[%s4821_s7 + $0x10] sm:$0xf] }
 0x144   : > { %v1776_v45 = vsel %vm4832_vm2, %v1771_v28, %v1775_v29  ;;  %v1817_v8 = vrot.slane %v1815_v58, 4 }
 0x145   : > { %1875 = vrot.lane.b32.xlu1 %v1632_v33, %s4728_s11  ;;  %v1760_v12 = vor.u32 %v1759_v52, %v1756_v63 }
 0x146   : > { %1873 = vrot.lane.b32.xlu0 %v1622_v54, %s4728_s11  ;;  %1871 = vrot.lane.b32.xlu2 %v1608_v57, %s4728_s11  ;;  %v1722_v54 = vor.u32 %v1721_v30, %v5462_v35  ;;  %v1712_v57 = vor.u32 %v1711_v39, %v1708_v38  ;;  %v1793_v30 = vrot.slane %v1791_v22, 4  ;;  %v4216_v38 = vld [vmem:[%s4821_s7 + $0xc4] sm:$0xf]  ;;  %v4215_v39 = vld [vmem:[%s4821_s7 + $0xc0] sm:$0xf] }
 0x147   : > { %v1295_v3 = vpop.permute.xlu1 %1294  ;;  %v1761_v31 = vrot.slane %v1760_v12, 4  ;;  %v1835_v50 = vshll.u32 %v4216_v38, 16  ;;  %v1839_v51 = vshrl.u32 %v4216_v38, 16  ;;  %v1826_v56 = vshrl.u32 %v4215_v39, 16 }
 0x148   : > { %1388 = vst.msk [vmem:[#allocation2 + $0xc] sm:$0xf] %vm1384_vm9, %v1295_v3  ;;  %v1293_v6 = vpop.permute.xlu0 %1292  ;;  %v1309_v13 = vpop.permute.xlu2 %1308  ;;  %v1723_v3 = vrot.slane %v1722_v54, 4  ;;  %v1713_v5 = vrot.slane %v1712_v57, 4  ;;  %v1829_v57 = vshll.u32 %v4215_v39, 16 }
 0x149   : > { %1387 = vst.msk [vmem:[#allocation2 + $0x8] sm:$0xf] %vm1384_vm9, %v1293_v6  ;;  %v4212_v6 = vld [vmem:[%s4821_s7 + $0xb4] sm:$0xf]  ;;  %v1766_v46 = vsel %vm4832_vm2, %v1761_v31, %v5478_v61  ;;  %v1837_v63 = vrot.slane %v1835_v50, 5  ;;  %v1841_v52 = vrot.slane %v1839_v51, 4 }
 0x14a   : > { %1395 = vst.msk [vmem:[#allocation2 + $0x28] sm:$0xf] %vm1384_vm9, %v1309_v13  ;;  %v1802_v17 = vshrl.u32 %v4212_v6, 16  ;;  %v1805_v18 = vshll.u32 %v4212_v6, 16  ;;  %v1728_v19 = vsel %vm4832_vm2, %v1723_v3, %v1727_v4  ;;  %v1718_v20 = vsel %vm4832_vm2, %v1713_v5, %v5462_v35  ;;  %v4217_v3 = vld [vmem:[%s4821_s7 + $0xc8] sm:$0x1] }
 0x14b   : > { %v1789_v35 = vrot.slane %v1787_v21, 5  ;;  %v1828_v4 = vrot.slane %v1826_v56, 4  ;;  %v1831_v5 = vrot.slane %v1829_v57, 5  ;;  %v1842_v12 = vor.u32 %v1841_v52, %v1837_v63  ;;  %v4224_v50 = vld [vmem:[%s4821_s7 + $0x24] sm:$0xe] }
 0x14c   : > { %v1804_v34 = vrot.slane %v1802_v17, 4  ;;  %v1807_v36 = vrot.slane %v1805_v18, 5  ;;  %v4268_v58 = vrot.slane %v4224_v50, 9 }
 0x14d   : > { %1881 = vrot.lane.b32.xlu1 %v1670_v15, %s4728_s11  ;;  %v4209_v15 = vld [vmem:[%s4821_s7 + $0xa8] sm:$0xf] }
 0x14e   : > { %1879 = vrot.lane.b32.xlu0 %v1656_v16, %s4728_s11  ;;  %1877 = vrot.lane.b32.xlu2 %v1646_v23, %s4728_s11  ;;  %v1742_v16 = vsel %vm4832_vm2, %v1737_v55, %v1741_v0  ;;  %v1746_v23 = vor.u32 %v1745_v10, %v1741_v0  ;;  %v1778_v26 = vshrl.u32 %v4209_v15, 16  ;;  %v1781_v27 = vshll.u32 %v4209_v15, 16  ;;  %v4214_v10 = vld [vmem:[%s4821_s7 + $0xbc] sm:$0x1] }
 0x14f   : > { %v1301_v33 = vpop.permute.xlu1 %1300  ;;  %v1808_v48 = vor.u32 %v1807_v36, %v1804_v34  ;;  %v1832_v15 = vor.u32 %v1831_v5, %v1828_v4  ;;  %v1821_v18 = vshll.u32 %v4214_v10, 16  ;;  %v4222_v34 = vld [vmem:[%s4821_s7 + $0x1c] sm:$0xf]  ;;  %v2076_v36 = vrot.slane %v4219_v24, 5  ;;  %v4229_v4 = vld [vmem:[%s4821_s7 + $0x38] sm:$0x1] }
 0x150   : > { %1391 = vst.msk [vmem:[#allocation2 + $0x18] sm:$0xf] %vm1384_vm9, %v1301_v33  ;;  %v1299_v40 = vpop.permute.xlu0 %1298  ;;  %v1315_v44 = vpop.permute.xlu2 %1314  ;;  %v4211_v33 = vld [vmem:[%s4821_s7 + $0xb0] sm:$0x1]  ;;  %v1747_v41 = vrot.slane %v1746_v23, 4  ;;  %v1780_v43 = vrot.slane %v1778_v26, 4 }
 0x151   : > { %1390 = vst.msk [vmem:[#allocation2 + $0x14] sm:$0xf] %vm1384_vm9, %v1299_v40  ;;  %v1797_v54 = vshll.u32 %v4211_v33, 16  ;;  %v1809_v61 = vrot.slane %v1808_v48, 4  ;;  %v1833_v22 = vrot.slane %v1832_v15, 4  ;;  %v2083_v38 = vrot.slane %v4222_v34, 5 }
 0x152   : > { %1398 = vst.msk [vmem:[#allocation2 + $0x34] sm:$0xf] %vm1384_vm9, %v1315_v44  ;;  %v1783_v44 = vrot.slane %v1781_v27, 5  ;;  %v1823_v27 = vrot.slane %v1821_v18, 5  ;;  %v4220_v33 = vld [vmem:[%s4821_s7 + $0x14] sm:$0x1] }
 0x153   : > { %v1838_v31 = vsel %vm4832_vm2, %v1833_v22, %v1837_v63  ;;  %v4232_v22 = vld [vmem:[%s4821_s7 + $0x44] sm:$0x1] }
 0x154   : > { %v1784_v60 = vor.u32 %v1783_v44, %v1780_v43 }
 0x155   : > { %1887 = vrot.lane.b32.xlu1 %v1704_v49, %s4728_s11  ;;  %v1811_v49 = vshll.u32 %v4213_v32, 16  ;;  %v4221_v32 = vld [vmem:[%s4821_s7 + $0x18] sm:$0xe] }
 0x156   : > { %1885 = vrot.lane.b32.xlu0 %v1694_v53, %s4728_s11  ;;  %1883 = vrot.lane.b32.xlu2 %v1680_v59, %s4728_s11  ;;  %v1794_v53 = vor.u32 %v1793_v30, %v1789_v35  ;;  %v1752_v59 = vsel %vm4832_vm2, %v1747_v41, %v1751_v42  ;;  %v4267_v30 = vrot.slane %v4221_v32, 9  ;;  %v2079_v41 = vrot.slane %v4220_v33, 5  ;;  %v4225_v42 = vld [vmem:[%s4821_s7 + $0x28] sm:$0xf] }
 0x157   : > { %v1307_v2 = vpop.permute.xlu1 %1306  ;;  %v1813_v62 = vrot.slane %v1811_v49, 5  ;;  %v4226_v49 = vld [vmem:[%s4821_s7 + $0x2c] sm:$0x1]  ;;  %v2107_v32 = vrot.slane %v4232_v22, 5 }
 0x158   : > { %1394 = vst.msk [vmem:[#allocation2 + $0x24] sm:$0xf] %vm1384_vm9, %v1307_v2  ;;  %v1305_v7 = vpop.permute.xlu0 %1304  ;;  %v1321_v13 = vpop.permute.xlu2 %1320  ;;  %v1795_v0 = vrot.slane %v1794_v53, 4  ;;  %v1799_v2 = vrot.slane %v1797_v54, 5  ;;  %v4223_v53 = vld [vmem:[%s4821_s7 + $0x20] sm:$0x1] }
 0x159   : > { %1393 = vst.msk [vmem:[#allocation2 + $0x20] sm:$0xf] %vm1384_vm9, %v1305_v7  ;;  %v1785_v7 = vrot.slane %v1784_v60, 4  ;;  %v1814_v11 = vsel %vm4832_vm2, %v1809_v61, %v1813_v62  ;;  %v1818_v17 = vor.u32 %v1817_v8, %v1813_v62  ;;  %v2093_v56 = vrot.slane %v4226_v49, 5  ;;  %v4228_v60 = vld [vmem:[%s4821_s7 + $0x34] sm:$0xf] }
 0x15a   : > { %1401 = vst.msk [vmem:[#allocation2 + $0x40] sm:$0xf] %vm1384_vm9, %v1321_v13  ;;  %v1845_v13 = vshll.u32 %v4217_v3, 16  ;;  %v1800_v14 = vsel %vm4832_vm2, %v1795_v0, %v1799_v2  ;;  %v2085_v61 = vrot.slane %v2083_v38, 4  ;;  %v2086_v62 = vrot.slane %v4223_v53, 5 }
 0x15b   : > { %v1819_v26 = vrot.slane %v1818_v17, 4  ;;  %v4230_v0 = vld [vmem:[%s4821_s7 + $0x3c] sm:$0xe]  ;;  %v4231_v2 = vld [vmem:[%s4821_s7 + $0x40] sm:$0xf]  ;;  %v2097_v3 = vrot.slane %v4228_v60, 5 }
 0x15c   : > { %v2087_v5 = vsel %vm5007_vm6, %v2085_v61, %v2086_v62  ;;  %v2104_v8 = vrot.slane %v4231_v2, 5 }
 0x15d   : > { %1893 = vrot.lane.b32.xlu1 %v1742_v16, %s4728_s11  ;;  %v1790_v16 = vsel %vm4832_vm2, %v1785_v7, %v1789_v35  ;;  %v4218_v35 = vld [vmem:[%s4821_s7 + $0xc] sm:$0xe]  ;;  %v4270_v7 = vrot.slane %v4230_v0, 9  ;;  %v2099_v10 = vrot.slane %v2097_v3, 4 }
 0x15e   : > { %1891 = vrot.lane.b32.xlu0 %v1728_v19, %s4728_s11  ;;  %1889 = vrot.lane.b32.xlu2 %v1718_v20, %s4728_s11  ;;  %v1843_v19 = vrot.slane %v1842_v12, 4  ;;  %v1847_v20 = vrot.slane %v1845_v13, 5  ;;  %v4266_v44 = vrot.slane %v4218_v35, 9  ;;  %v4234_v12 = vld [vmem:[%s4821_s7 + $0x4c] sm:$0xf] }
 0x15f   : > { %v1313_v37 = vpop.permute.xlu1 %1312  ;;  %v2111_v17 = vrot.slane %v4234_v12, 5  ;;  %v4240_v35 = vld [vmem:[%s4821_s7 + $0x64] sm:$0xf] }
 0x160   : > { %1397 = vst.msk [vmem:[#allocation2 + $0x30] sm:$0xf] %vm1384_vm9, %v1313_v37  ;;  %v1311_v40 = vpop.permute.xlu0 %1310  ;;  %v1327_v47 = vpop.permute.xlu2 %1326  ;;  %v1848_v29 = vsel %vm4832_vm2, %v1843_v19, %v1847_v20  ;;  %v1824_v37 = vsel %vm4832_vm2, %v1819_v26, %v1823_v27  ;;  %v2077_v51 = vsel %vm5007_vm6, %v4266_v44, %v2076_v36  ;;  %v4235_v19 = vld [vmem:[%s4821_s7 + $0x50] sm:$0x1]  ;;  %v4233_v20 = vld [vmem:[%s4821_s7 + $0x48] sm:$0xe] }
 0x161   : > { %1396 = vst.msk [vmem:[#allocation2 + $0x2c] sm:$0xf] %vm1384_vm9, %v1311_v40  ;;  %v2078_v40 = vrot.slane %v2076_v36, 4  ;;  %v2114_v24 = vrot.slane %v4235_v19, 5  ;;  %v4271_v27 = vrot.slane %v4233_v20, 9 }
 0x162   : > { %1404 = vst.msk [vmem:[#allocation2 + $0x4c] sm:$0xf] %vm1384_vm9, %v1327_v47  ;;  %v2090_v47 = vrot.slane %v4225_v42, 5  ;;  %v2125_v42 = vrot.slane %v4240_v35, 5 }
 0x163   : > { %v2080_v48 = vsel %vm5007_vm6, %v2078_v40, %v2079_v41  ;;  %v2112_v33 = vsel %vm5007_vm6, %v4271_v27, %v2111_v17  ;;  %v4236_v40 = vld [vmem:[%s4821_s7 + $0x54] sm:$0xe]  ;;  %v4250_v27 = vld [vmem:[%s4821_s7 + $0x8c] sm:$0x1] }
 0x164   : > { %v2092_v54 = vrot.slane %v2090_v47, 4 }
 0x165   : > { %1899 = vrot.lane.b32.xlu1 %v1776_v45, %s4728_s11 }
 0x166   : > { %1897 = vrot.lane.b32.xlu0 %v1766_v46, %s4728_s11  ;;  %1895 = vrot.lane.b32.xlu2 %v1752_v59, %s4728_s11  ;;  %v2084_v46 = vsel %vm5007_vm6, %v4267_v30, %v2083_v38  ;;  %v2094_v52 = vsel %vm5007_vm6, %v2092_v54, %v2093_v56  ;;  %v4238_v38 = vld [vmem:[%s4821_s7 + $0x5c] sm:$0x1]  ;;  %v4244_v54 = vld [vmem:[%s4821_s7 + $0x74] sm:$0x1] }
 0x167   : > { %v1319_v55 = vpop.permute.xlu1 %1318  ;;  %v4242_v56 = vld [vmem:[%s4821_s7 + $0x6c] sm:$0xe]  ;;  %v2135_v60 = vrot.slane %v4244_v54, 5  ;;  %v4314_v54 = vld [vmem:[%s4821_s7 + $0x18] sm:$0xf] }
 0x168   : > { %1400 = vst.msk [vmem:[#allocation2 + $0x3c] sm:$0xf] %vm1384_vm9, %v1319_v55  ;;  %v1317_v6 = vpop.permute.xlu0 %1316  ;;  %v1333_v9 = vpop.permute.xlu2 %1332  ;;  %v2091_v55 = vsel %vm5007_vm6, %v4268_v58, %v2090_v47  ;;  %v4241_v58 = vld [vmem:[%s4821_s7 + $0x68] sm:$0x1]  ;;  %v4274_v62 = vrot.slane %v4242_v56, 9 }
 0x169   : > { %1399 = vst.msk [vmem:[#allocation2 + $0x38] sm:$0xf] %vm1384_vm9, %v1317_v6  ;;  %v4227_v6 = vld [vmem:[%s4821_s7 + $0x30] sm:$0xe]  ;;  %v2128_v0 = vrot.slane %v4241_v58, 5 }
 0x16a   : > { %1407 = vst.msk [vmem:[#allocation2 + $0x58] sm:$0xf] %vm1384_vm9, %v1333_v9 }
 0x16d   : > { %1905 = vrot.lane.b32.xlu1 %v1814_v11, %s4728_s11  ;;  %v2100_v11 = vrot.slane %v4229_v4, 5 }
 0x16e   : > { %1903 = vrot.lane.b32.xlu0 %v1800_v14, %s4728_s11  ;;  %1901 = vrot.lane.b32.xlu2 %v1790_v16, %s4728_s11  ;;  %v4269_v14 = vrot.slane %v4227_v6, 9  ;;  %v2105_v16 = vsel %vm5007_vm6, %v4270_v7, %v2104_v8  ;;  %v4249_v6 = vld [vmem:[%s4821_s7 + $0x88] sm:$0xf] }
 0x16f   : > { %v1325_v21 = vpop.permute.xlu1 %1324  ;;  %v2101_v18 = vsel %vm5007_vm6, %v2099_v10, %v2100_v11  ;;  %v4245_v10 = vld [vmem:[%s4821_s7 + $0x78] sm:$0xe]  ;;  %v2146_v12 = vrot.slane %v4249_v6, 5 }
 0x170   : > { %1403 = vst.msk [vmem:[#allocation2 + $0x48] sm:$0xf] %vm1384_vm9, %v1325_v21  ;;  %v1323_v23 = vpop.permute.xlu0 %1322  ;;  %v1339_v28 = vpop.permute.xlu2 %1338  ;;  %v2098_v21 = vsel %vm5007_vm6, %v4269_v14, %v2097_v3 }
 0x171   : > { %1402 = vst.msk [vmem:[#allocation2 + $0x44] sm:$0xf] %vm1384_vm9, %v1323_v23  ;;  %v2113_v23 = vrot.slane %v2111_v17, 4 }
 0x172   : > { %1410 = vst.msk [vmem:[#allocation2 + $0x64] sm:$0xf] %vm1384_vm9, %v1339_v28 }
 0x173   : > { %v2115_v36 = vsel %vm5007_vm6, %v2113_v23, %v2114_v24  ;;  %v4253_v23 = vld [vmem:[%s4821_s7 + $0x98] sm:$0x1]  ;;  %v4251_v24 = vld [vmem:[%s4821_s7 + $0x90] sm:$0xe] }
 0x175   : > { %1911 = vrot.lane.b32.xlu1 %v1848_v29, %s4728_s11  ;;  %v4237_v29 = vld [vmem:[%s4821_s7 + $0x58] sm:$0xf] }
 0x176   : > { %1909 = vrot.lane.b32.xlu0 %v1838_v31, %s4728_s11  ;;  %1907 = vrot.lane.b32.xlu2 %v1824_v37, %s4728_s11  ;;  %v2106_v31 = vrot.slane %v2104_v8, 4  ;;  %v4239_v37 = vld [vmem:[%s4821_s7 + $0x60] sm:$0xe]  ;;  %v2118_v30 = vrot.slane %v4237_v29, 5  ;;  %v4247_v8 = vld [vmem:[%s4821_s7 + $0x80] sm:$0x1] }
 0x177   : > { %v1331_v39 = vpop.permute.xlu1 %1330  ;;  %v4273_v41 = vrot.slane %v4239_v37, 9  ;;  %v2156_v29 = vrot.slane %v4253_v23, 5  ;;  %v2149_v37 = vrot.slane %v4250_v27, 5 }
 0x178   : > { %1406 = vst.msk [vmem:[#allocation2 + $0x54] sm:$0xf] %vm1384_vm9, %v1331_v39  ;;  %v1329_v43 = vpop.permute.xlu0 %1328  ;;  %v1345_v45 = vpop.permute.xlu2 %1344  ;;  %v2108_v39 = vsel %vm5007_vm6, %v2106_v31, %v2107_v32  ;;  %v2120_v44 = vrot.slane %v2118_v30, 4  ;;  %v4277_v32 = vrot.slane %v4251_v24, 9 }
 0x179   : > { %1405 = vst.msk [vmem:[#allocation2 + $0x50] sm:$0xf] %vm1384_vm9, %v1329_v43  ;;  %v2126_v50 = vsel %vm5007_vm6, %v4273_v41, %v2125_v42 }
 0x17a   : > { %1413 = vst.msk [vmem:[#allocation2 + $0x70] sm:$0xf] %vm1384_vm9, %v1345_v45  ;;  %v2121_v45 = vrot.slane %v4238_v38, 5 }
 0x17c   : > { %v2122_v53 = vsel %vm5007_vm6, %v2120_v44, %v2121_v45  ;;  %v4254_v44 = vld [vmem:[%s4821_s7 + $0x9c] sm:$0xe] }
 0x17d   : > { %2190 = vrot.lane.b32.xlu1 %v2084_v46, %s4729_s12  ;;  %v4243_v46 = vld [vmem:[%s4821_s7 + $0x70] sm:$0xf] }
 0x17e   : > { %2188 = vrot.lane.b32.xlu0 %v2080_v48, %s4729_s12  ;;  %2186 = vrot.lane.b32.xlu2 %v2077_v51, %s4729_s12  ;;  %v4272_v48 = vrot.slane %v4236_v40, 9  ;;  %v2132_v51 = vrot.slane %v4243_v46, 5  ;;  %v4258_v40 = vld [vmem:[%s4821_s7 + $0xac] sm:$0xf] }
 0x17f   : > { %v1337_v57 = vpop.permute.xlu1 %1336  ;;  %v2167_v46 = vrot.slane %v4258_v40, 5  ;;  %v4318_v40 = vld [vmem:[%s4821_s7 + $0x28] sm:$0xf] }
 0x180   : > { %1409 = vst.msk [vmem:[#allocation2 + $0x60] sm:$0xf] %vm1384_vm9, %v1337_v57  ;;  %v1335_v59 = vpop.permute.xlu0 %1334  ;;  %v1351_v63 = vpop.permute.xlu2 %1350  ;;  %v2119_v57 = vsel %vm5007_vm6, %v4272_v48, %v2118_v30  ;;  %v2133_v4 = vsel %vm5007_vm6, %v4274_v62, %v2132_v51  ;;  %v2564_v62 = vshll.u32 %v4314_v54, 16 }
 0x181   : > { %1408 = vst.msk [vmem:[#allocation2 + $0x5c] sm:$0xf] %vm1384_vm9, %v1335_v59  ;;  %v2134_v59 = vrot.slane %v2132_v51, 4 }
 0x182   : > { %1416 = vst.msk [vmem:[#allocation2 + $0x7c] sm:$0xf] %vm1384_vm9, %v1351_v63 }
 0x183   : > { %v2136_v3 = vsel %vm5007_vm6, %v2134_v59, %v2135_v60 }
 0x185   : > { %2196 = vrot.lane.b32.xlu1 %v2094_v52, %s4729_s12  ;;  %v4246_v52 = vld [vmem:[%s4821_s7 + $0x7c] sm:$0xf] }
 0x186   : > { %2194 = vrot.lane.b32.xlu0 %v2091_v55, %s4729_s12  ;;  %2192 = vrot.lane.b32.xlu2 %v2087_v5, %s4729_s12  ;;  %v2127_v55 = vrot.slane %v2125_v42, 4  ;;  %v4248_v5 = vld [vmem:[%s4821_s7 + $0x84] sm:$0xe]  ;;  %v2139_v7 = vrot.slane %v4246_v52, 5  ;;  %v4256_v42 = vld [vmem:[%s4821_s7 + $0xa4] sm:$0x1] }
 0x187   : > { %v1343_v9 = vpop.permute.xlu1 %1342  ;;  %v4276_v11 = vrot.slane %v4248_v5, 9  ;;  %v5691_v52 = vld [vmem:[%s4821_s7 + $0xb8] sm:$0xf] }
 0x188   : > { %1412 = vst.msk [vmem:[#allocation2 + $0x6c] sm:$0xf] %vm1384_vm9, %v1343_v9  ;;  %v1341_v13 = vpop.permute.xlu0 %1340  ;;  %v1854_v15 = vpop.permute.xlu2 %1853  ;;  %v2129_v9 = vsel %vm5007_vm6, %v2127_v55, %v2128_v0  ;;  %v2141_v14 = vrot.slane %v2139_v7, 4  ;;  %v4259_v0 = vld [vmem:[%s4821_s7 + $0xb0] sm:$0x1]  ;;  %v2174_v6 = vrot.slane %v5691_v52, 5 }
 0x189   : > { %1411 = vst.msk [vmem:[#allocation2 + $0x68] sm:$0xf] %vm1384_vm9, %v1341_v13  ;;  %v2147_v20 = vsel %vm5007_vm6, %v4276_v11, %v2146_v12  ;;  %v2169_v11 = vrot.slane %v2167_v46, 4 }
 0x18a   : > { %1948 = vst.msk [vmem:[#allocation2 + $0x8] sm:$0xf] %vm1945_vm10, %v1854_v15  ;;  %v2142_v15 = vrot.slane %v4247_v8, 5 }
 0x18c   : > { %v2143_v22 = vsel %vm5007_vm6, %v2141_v14, %v2142_v15  ;;  %v4282_v14 = vld [vmem:[%s4821_s7 + $0x18] sm:$0xf] }
 0x18d   : > { %2202 = vrot.lane.b32.xlu1 %v2105_v16, %s4729_s12  ;;  %v4252_v16 = vld [vmem:[%s4821_s7 + $0x94] sm:$0xf] }
 0x18e   : > { %2200 = vrot.lane.b32.xlu0 %v2101_v18, %s4729_s12  ;;  %2198 = vrot.lane.b32.xlu2 %v2098_v21, %s4729_s12  ;;  %v4275_v18 = vrot.slane %v4245_v10, 9  ;;  %v2153_v21 = vrot.slane %v4252_v16, 5 }
 0x18f   : > { %v1349_v26 = vpop.permute.xlu1 %1348 }
 0x190   : > { %1415 = vst.msk [vmem:[#allocation2 + $0x78] sm:$0xf] %vm1384_vm9, %v1349_v26  ;;  %v1347_v28 = vpop.permute.xlu0 %1346  ;;  %v1860_v34 = vpop.permute.xlu2 %1859  ;;  %v2140_v26 = vsel %vm5007_vm6, %v4275_v18, %v2139_v7  ;;  %v2154_v38 = vsel %vm5007_vm6, %v4277_v32, %v2153_v21  ;;  %v4316_v7 = vld [vmem:[%s4821_s7 + $0x20] sm:$0x1] }
 0x191   : > { %1414 = vst.msk [vmem:[#allocation2 + $0x74] sm:$0xf] %vm1384_vm9, %v1347_v28  ;;  %v2155_v28 = vrot.slane %v2153_v21, 4  ;;  %v2580_v16 = vshll.u32 %v4316_v7, 16  ;;  %v4364_v32 = vld [vmem:[%s4821_s7 + $0x20] sm:$0x1] }
 0x192   : > { %1951 = vst.msk [vmem:[#allocation2 + $0x14] sm:$0xf] %vm1945_vm10, %v1860_v34 }
 0x193   : > { %v2157_v30 = vsel %vm5007_vm6, %v2155_v28, %v2156_v29  ;;  %v2582_v21 = vrot.slane %v2580_v16, 5  ;;  %v4366_v16 = vld [vmem:[%s4821_s7 + $0x28] sm:$0xf] }
 0x195   : > { %2208 = vrot.lane.b32.xlu1 %v2115_v36, %s4729_s12  ;;  %v4255_v36 = vld [vmem:[%s4821_s7 + $0xa0] sm:$0xf] }
 0x196   : > { %2206 = vrot.lane.b32.xlu0 %v2112_v33, %s4729_s12  ;;  %2204 = vrot.lane.b32.xlu2 %v2108_v39, %s4729_s12  ;;  %v2148_v33 = vrot.slane %v2146_v12, 4  ;;  %v4257_v39 = vld [vmem:[%s4821_s7 + $0xa8] sm:$0xe]  ;;  %v2160_v41 = vrot.slane %v4255_v36, 5  ;;  %v2170_v12 = vrot.slane %v4259_v0, 5 }
 0x197   : > { %v1852_v43 = vpop.permute.xlu1 %1851  ;;  %v4279_v45 = vrot.slane %v4257_v39, 9  ;;  %v4362_v36 = vld [vmem:[%s4821_s7 + $0x18] sm:$0xe]  ;;  %v4291_v0 = vld [vmem:[%s4821_s7 + $0x4c] sm:$0xf] }
 0x198   : > { %1947 = vst.msk [vmem:[#allocation2 + $0x4] sm:$0xf] %vm1945_vm10, %v1852_v43  ;;  %v1850_v47 = vpop.permute.xlu0 %1849  ;;  %v1866_v49 = vpop.permute.xlu2 %1865  ;;  %v2150_v43 = vsel %vm5007_vm6, %v2148_v33, %v2149_v37  ;;  %v2162_v48 = vrot.slane %v2160_v41, 4  ;;  %v4410_v39 = vrot.slane %v4362_v36, 9 }
 0x199   : > { %1946 = vst.msk [vmem:[#allocation2] sm:$0xf] %vm1945_vm10, %v1850_v47 }
 0x19a   : > { %1954 = vst.msk [vmem:[#allocation2 + $0x20] sm:$0xf] %vm1945_vm10, %v1866_v49  ;;  %v2163_v49 = vrot.slane %v4256_v42, 5  ;;  %v4317_v42 = vld [vmem:[%s4821_s7 + $0x24] sm:$0xf] }
 0x19c   : > { %v2164_v60 = vsel %vm5007_vm6, %v2162_v48, %v2163_v49  ;;  %v2598_v48 = vshrl.u32 %v4318_v40, 16 }
 0x19d   : > { %2214 = vrot.lane.b32.xlu1 %v2126_v50, %s4729_s12  ;;  %v4315_v50 = vld [vmem:[%s4821_s7 + $0x1c] sm:$0xf] }
 0x19e   : > { %2212 = vrot.lane.b32.xlu0 %v2122_v53, %s4729_s12  ;;  %2210 = vrot.lane.b32.xlu2 %v2119_v57, %s4729_s12  ;;  %v4278_v53 = vrot.slane %v4254_v44, 9  ;;  %v2168_v57 = vsel %vm5007_vm6, %v4279_v45, %v2167_v46  ;;  %v2570_v58 = vshll.u32 %v4315_v50, 16  ;;  %v2574_v59 = vshrl.u32 %v4315_v50, 16 }
 0x19f   : > { %v1858_v61 = vpop.permute.xlu1 %1857  ;;  %v2585_v50 = vshrl.u32 %v4317_v42, 16 }
 0x1a0   : > { %1950 = vst.msk [vmem:[#allocation2 + $0x10] sm:$0xf] %vm1945_vm10, %v1858_v61  ;;  %v1856_v63 = vpop.permute.xlu0 %1855  ;;  %v1872_v2 = vpop.permute.xlu2 %1871  ;;  %v2561_v61 = vshrl.u32 %v4314_v54, 16  ;;  %v2161_v55 = vsel %vm5007_vm6, %v4278_v53, %v2160_v41 }
 0x1a1   : > { %1949 = vst.msk [vmem:[#allocation2 + $0xc] sm:$0xf] %vm1945_vm10, %v1856_v63  ;;  %v4260_v63 = vld [vmem:[%s4821_s7 + $0xb4] sm:$0xe] }
 0x1a2   : > { %1957 = vst.msk [vmem:[#allocation2 + $0x2c] sm:$0xf] %vm1945_vm10, %v1872_v2  ;;  %v2572_v2 = vrot.slane %v2570_v58, 5  ;;  %v4280_v5 = vrot.slane %v4260_v63, 9  ;;  %v2563_v8 = vrot.slane %v2561_v61, 4 }
 0x1a3   : > { %v4319_v61 = vld [vmem:[%s4821_s7 + $0x2c] sm:$0x1] }
 0x1a4   : > { %v2604_v7 = vshll.u32 %v4319_v61, 16 }
 0x1a5   : > { %2220 = vrot.lane.b32.xlu1 %v2136_v3, %s4729_s12  ;;  %v2576_v3 = vrot.slane %v2574_v59, 4  ;;  %v2600_v59 = vrot.slane %v2598_v48, 4 }
 0x1a6   : > { %2218 = vrot.lane.b32.xlu0 %v2133_v4, %s4729_s12  ;;  %2216 = vrot.lane.b32.xlu2 %v2129_v9, %s4729_s12  ;;  %v2566_v9 = vrot.slane %v2564_v62, 5  ;;  %v2587_v62 = vrot.slane %v2585_v50, 4 }
 0x1a7   : > { %v1864_v13 = vpop.permute.xlu1 %1863  ;;  %v2577_v15 = vor.u32 %v2576_v3, %v2572_v2 }
 0x1a8   : > { %1953 = vst.msk [vmem:[#allocation2 + $0x1c] sm:$0xf] %vm1945_vm10, %v1864_v13  ;;  %v1862_v17 = vpop.permute.xlu0 %1861  ;;  %v1878_v19 = vpop.permute.xlu2 %1877  ;;  %v2567_v18 = vor.u32 %v2566_v9, %v2563_v8  ;;  %v4285_v9 = vld [vmem:[%s4821_s7 + $0x28] sm:$0xf] }
 0x1a9   : > { %1952 = vst.msk [vmem:[#allocation2 + $0x18] sm:$0xf] %vm1945_vm10, %v1862_v17  ;;  %v2175_v17 = vsel %vm5007_vm6, %v4280_v5, %v2174_v6 }
 0x1aa   : > { %1960 = vst.msk [vmem:[#allocation2 + $0x38] sm:$0xf] %vm1945_vm10, %v1878_v19  ;;  %v2171_v19 = vsel %vm5007_vm6, %v2169_v11, %v2170_v12  ;;  %v2568_v23 = vrot.slane %v2567_v18, 4 }
 0x1ac   : > { %v2573_v29 = vsel %vm4832_vm2, %v2568_v23, %v2572_v2  ;;  %v3178_v23 = vrot.slane %v4366_v16, 5 }
 0x1ad   : > { %2226 = vrot.lane.b32.xlu1 %v2147_v20, %s4729_s12  ;;  %v2578_v20 = vrot.slane %v2577_v15, 4  ;;  %v2606_v15 = vrot.slane %v2604_v7, 5 }
 0x1ae   : > { %2224 = vrot.lane.b32.xlu0 %v2143_v22, %s4729_s12  ;;  %2222 = vrot.lane.b32.xlu2 %v2140_v26, %s4729_s12  ;;  %v4363_v26 = vld [vmem:[%s4821_s7 + $0x1c] sm:$0xf] }
 0x1af   : > { %v1870_v31 = vpop.permute.xlu1 %1869  ;;  %v2583_v28 = vsel %vm4832_vm2, %v2578_v20, %v2582_v21  ;;  %v4328_v21 = vld [vmem:[%s4821_s7 + $0x50] sm:$0x1] }
 0x1b0   : > { %1956 = vst.msk [vmem:[#allocation2 + $0x28] sm:$0xf] %vm1945_vm10, %v1870_v31  ;;  %v1868_v34 = vpop.permute.xlu0 %1867  ;;  %v1884_v35 = vpop.permute.xlu2 %1883  ;;  %v3171_v31 = vrot.slane %v4363_v26, 5  ;;  %v4367_v26 = vld [vmem:[%s4821_s7 + $0x2c] sm:$0x1] }
 0x1b1   : > { %1955 = vst.msk [vmem:[#allocation2 + $0x24] sm:$0xf] %vm1945_vm10, %v1868_v34  ;;  %v4283_v34 = vld [vmem:[%s4821_s7 + $0x1c] sm:$0xf] }
 0x1b2   : > { %1963 = vst.msk [vmem:[#allocation2 + $0x44] sm:$0xf] %vm1945_vm10, %v1884_v35  ;;  %v3173_v37 = vrot.slane %v3171_v31, 4  ;;  %v3174_v35 = vrot.slane %v4364_v32, 5  ;;  %v3172_v49 = vsel %vm5007_vm6, %v4410_v39, %v3171_v31  ;;  %v2676_v31 = vshll.u32 %v4328_v21, 16 }
 0x1b3   : > { %v3180_v32 = vrot.slane %v3178_v23, 4 }
 0x1b4   : > { %v3175_v46 = vsel %vm5007_vm6, %v3173_v37, %v3174_v35  ;;  %v4375_v37 = vld [vmem:[%s4821_s7 + $0x4c] sm:$0xf]  ;;  %v4339_v35 = vld [vmem:[%s4821_s7 + $0x7c] sm:$0xf]  ;;  %v2678_v39 = vrot.slane %v2676_v31, 5 }
 0x1b5   : > { %2232 = vrot.lane.b32.xlu1 %v2157_v30, %s4729_s12  ;;  %v4326_v30 = vld [vmem:[%s4821_s7 + $0x48] sm:$0xf]  ;;  %v4320_v31 = vld [vmem:[%s4821_s7 + $0x30] sm:$0xf] }
 0x1b6   : > { %2230 = vrot.lane.b32.xlu0 %v2154_v38, %s4729_s12  ;;  %2228 = vrot.lane.b32.xlu2 %v2150_v43, %s4729_s12  ;;  %v4284_v43 = vld [vmem:[%s4821_s7 + $0x24] sm:$0xf]  ;;  %v2657_v44 = vshrl.u32 %v4326_v30, 16  ;;  %v2660_v45 = vshll.u32 %v4326_v30, 16 }
 0x1b7   : > { %v1876_v47 = vpop.permute.xlu1 %1875 }
 0x1b8   : > { %1959 = vst.msk [vmem:[#allocation2 + $0x34] sm:$0xf] %vm1945_vm10, %v1876_v47  ;;  %v1874_v51 = vpop.permute.xlu0 %1873  ;;  %v1890_v56 = vpop.permute.xlu2 %1889  ;;  %v2594_v47 = vshll.u32 %v4318_v40, 16  ;;  %v2659_v53 = vrot.slane %v2657_v44, 4  ;;  %v2662_v54 = vrot.slane %v2660_v45, 5  ;;  %v2766_v44 = vshrl.u32 %v4339_v35, 16 }
 0x1b9   : > { %1958 = vst.msk [vmem:[#allocation2 + $0x30] sm:$0xf] %vm1945_vm10, %v1874_v51  ;;  %v2588_v51 = vshll.u32 %v4317_v42, 16  ;;  %v4338_v40 = vld [vmem:[%s4821_s7 + $0x78] sm:$0xf] }
 0x1ba   : > { %1966 = vst.msk [vmem:[#allocation2 + $0x50] sm:$0xf] %vm1945_vm10, %v1890_v56  ;;  %v2596_v58 = vrot.slane %v2594_v47, 5  ;;  %v2663_v2 = vor.u32 %v2662_v54, %v2659_v53  ;;  %v2753_v47 = vshrl.u32 %v4338_v40, 16  ;;  %v2756_v48 = vshll.u32 %v4338_v40, 16 }
 0x1bb   : > { %v2590_v63 = vrot.slane %v2588_v51, 5  ;;  %v4374_v51 = vld [vmem:[%s4821_s7 + $0x48] sm:$0xe]  ;;  %v2768_v54 = vrot.slane %v2766_v44, 4 }
 0x1bc   : > { %v2601_v5 = vor.u32 %v2600_v59, %v2596_v58  ;;  %v2664_v11 = vrot.slane %v2663_v2, 4  ;;  %v4340_v59 = vld [vmem:[%s4821_s7 + $0x80] sm:$0x1]  ;;  %v2758_v61 = vrot.slane %v2756_v48, 5 }
 0x1bd   : > { %2238 = vrot.lane.b32.xlu1 %v2168_v57, %s4729_s12  ;;  %v4327_v57 = vld [vmem:[%s4821_s7 + $0x4c] sm:$0xf] }
 0x1be   : > { %2236 = vrot.lane.b32.xlu0 %v2164_v60, %s4729_s12  ;;  %2234 = vrot.lane.b32.xlu2 %v2161_v55, %s4729_s12  ;;  %v2666_v3 = vshll.u32 %v4327_v57, 16  ;;  %v2670_v8 = vshrl.u32 %v4327_v57, 16 }
 0x1bf   : > { %v1882_v4 = vpop.permute.xlu1 %1881 }
 0x1c0   : > { %1962 = vst.msk [vmem:[#allocation2 + $0x40] sm:$0xf] %vm1945_vm10, %v1882_v4  ;;  %v1880_v10 = vpop.permute.xlu0 %1879  ;;  %v1896_v13 = vpop.permute.xlu2 %1895  ;;  %v4290_v4 = vld [vmem:[%s4821_s7 + $0x48] sm:$0xf]  ;;  %v2668_v12 = vrot.slane %v2666_v3, 5  ;;  %v2772_v3 = vshll.u32 %v4340_v59, 16 }
 0x1c1   : > { %1961 = vst.msk [vmem:[#allocation2 + $0x3c] sm:$0xf] %vm1945_vm10, %v1880_v10  ;;  %v2591_v10 = vor.u32 %v2590_v63, %v2587_v62  ;;  %v4414_v63 = vrot.slane %v4374_v51, 9  ;;  %v4293_v51 = vld [vmem:[%s4821_s7 + $0x58] sm:$0xf] }
 0x1c2   : > { %1969 = vst.msk [vmem:[#allocation2 + $0x5c] sm:$0xf] %vm1945_vm10, %v1896_v13 }
 0x1c3   : > { %v2592_v18 = vrot.slane %v2591_v10, 4 }
 0x1c5   : > { %2383 = vrot.lane.b32.xlu1 %v4282_v14, %s4730_s13  ;;  %v2602_v14 = vrot.slane %v2601_v5, 4 }
 0x1c6   : > { %2242 = vrot.lane.b32.xlu0 %v2175_v17, %s4729_s12  ;;  %2240 = vrot.lane.b32.xlu2 %v2171_v19, %s4729_s12  ;;  %v2672_v19 = vrot.slane %v2670_v8, 4 }
 0x1c7   : > { %v1888_v22 = vpop.permute.xlu1 %1887 }
 0x1c8   : > { %1965 = vst.msk [vmem:[#allocation2 + $0x4c] sm:$0xf] %vm1945_vm10, %v1888_v22  ;;  %v1886_v24 = vpop.permute.xlu0 %1885  ;;  %v1902_v27 = vpop.permute.xlu2 %1901  ;;  %v2669_v22 = vsel %vm4832_vm2, %v2664_v11, %v2668_v12 }
 0x1c9   : > { %1964 = vst.msk [vmem:[#allocation2 + $0x48] sm:$0xf] %vm1945_vm10, %v1886_v24  ;;  %v2607_v24 = vsel %vm4832_vm2, %v2602_v14, %v2606_v15 }
 0x1ca   : > { %1972 = vst.msk [vmem:[#allocation2 + $0x68] sm:$0xf] %vm1945_vm10, %v1902_v27  ;;  %v4365_v27 = vld [vmem:[%s4821_s7 + $0x24] sm:$0xe] }
 0x1cd   : > { %2946 = vrot.lane.b32.xlu1 %v2583_v28, %s4731_s14  ;;  %v2597_v28 = vsel %vm4832_vm2, %v2592_v18, %v2596_v58  ;;  %v4388_v18 = vld [vmem:[%s4821_s7 + $0x80] sm:$0x1] }
 0x1ce   : > { %2944 = vrot.lane.b32.xlu0 %v2573_v29, %s4731_s14  ;;  %2385 = vrot.lane.b32.xlu2 %v4283_v34, %s4730_s13  ;;  %v2673_v29 = vor.u32 %v2672_v19, %v2668_v12  ;;  %v3181_v34 = vrot.slane %v4367_v26, 5  ;;  %v4299_v19 = vld [vmem:[%s4821_s7 + $0x7c] sm:$0xf] }
 0x1cf   : > { %v1894_v33 = vpop.permute.xlu1 %1893 }
 0x1d0   : > { %1968 = vst.msk [vmem:[#allocation2 + $0x58] sm:$0xf] %vm1945_vm10, %v1894_v33  ;;  %v1892_v38 = vpop.permute.xlu0 %1891  ;;  %v1908_v41 = vpop.permute.xlu2 %1907  ;;  %v4411_v33 = vrot.slane %v4365_v27, 9  ;;  %v3182_v42 = vsel %vm5007_vm6, %v3180_v32, %v3181_v34  ;;  %v4286_v32 = vld [vmem:[%s4821_s7 + $0x30] sm:$0xf] }
 0x1d1   : > { %1967 = vst.msk [vmem:[#allocation2 + $0x54] sm:$0xf] %vm1945_vm10, %v1892_v38  ;;  %v2674_v38 = vrot.slane %v2673_v29, 4 }
 0x1d2   : > { %1975 = vst.msk [vmem:[#allocation2 + $0x74] sm:$0xf] %vm1945_vm10, %v1908_v41  ;;  %v3179_v45 = vsel %vm5007_vm6, %v4411_v33, %v3178_v23  ;;  %v3230_v23 = vrot.slane %v4388_v18, 5 }
 0x1d3   : > { %v2679_v50 = vsel %vm4832_vm2, %v2674_v38, %v2678_v39  ;;  %v2609_v38 = vshrl.u32 %v4320_v31, 16  ;;  %v2612_v39 = vshll.u32 %v4320_v31, 16 }
 0x1d5   : > { %2387 = vrot.lane.b32.xlu1 %v4284_v43, %s4730_s13  ;;  %v2762_v43 = vshll.u32 %v4339_v35, 16  ;;  %v2611_v48 = vrot.slane %v2609_v38, 4 }
 0x1d6   : > { %3283 = vrot.lane.b32.xlu0 %v3175_v46, %s4732_s21  ;;  %3281 = vrot.lane.b32.xlu2 %v3172_v49, %s4732_s21  ;;  %v3199_v46 = vrot.slane %v4375_v37, 5  ;;  %v4376_v49 = vld [vmem:[%s4821_s7 + $0x50] sm:$0x1] }
 0x1d7   : > { %v1900_v56 = vpop.permute.xlu1 %1899  ;;  %v2764_v53 = vrot.slane %v2762_v43, 5  ;;  %v3202_v58 = vrot.slane %v4376_v49, 5  ;;  %v4330_v43 = vld [vmem:[%s4821_s7 + $0x58] sm:$0xf]  ;;  %v2614_v49 = vrot.slane %v2612_v39, 5 }
 0x1d8   : > { %1971 = vst.msk [vmem:[#allocation2 + $0x64] sm:$0xf] %vm1945_vm10, %v1900_v56  ;;  %v1898_v60 = vpop.permute.xlu0 %1897  ;;  %v2187_v55 = vpop.permute.xlu2 %2186  ;;  %v3201_v57 = vrot.slane %v3199_v46, 4  ;;  %v3200_v7 = vsel %vm5007_vm6, %v4414_v63, %v3199_v46  ;;  %v2694_v59 = vshrl.u32 %v4330_v43, 16 }
 0x1d9   : > { %1970 = vst.msk [vmem:[#allocation2 + $0x60] sm:$0xf] %vm1945_vm10, %v1898_v60  ;;  %v2755_v60 = vrot.slane %v2753_v47, 4  ;;  %v2769_v2 = vor.u32 %v2768_v54, %v2764_v53  ;;  %v4322_v47 = vld [vmem:[%s4821_s7 + $0x38] sm:$0x1]  ;;  %v2690_v54 = vshll.u32 %v4330_v43, 16 }
 0x1da   : > { %2283 = vst.msk [vmem:[#allocation2] sm:$0xf] %vm2282_vm11, %v2187_v55  ;;  %v3446_v43 = vld [vmem:[%s6541_s1 + $0x10] sm:$0x3] }
 0x1db   : > { %v2759_v5 = vor.u32 %v2758_v61, %v2755_v60  ;;  %v2770_v8 = vrot.slane %v2769_v2, 4  ;;  %v4287_v60 = vld [vmem:[%s4821_s7 + $0x34] sm:$0xf]  ;;  %v2615_v61 = vor.u32 %v2614_v49, %v2611_v48  ;;  %v2692_v63 = vrot.slane %v2690_v54, 5 }
 0x1dd   : > { %2401 = vrot.lane.b32.xlu1 %v4291_v0, %s4730_s13  ;;  %v4298_v0 = vld [vmem:[%s4821_s7 + $0x78] sm:$0xf]  ;;  %v2760_v11 = vrot.slane %v2759_v5, 4  ;;  %v2616_v5 = vrot.slane %v2615_v61, 4  ;;  %v4351_v61 = vld [vmem:[%s4821_s7 + $0xac] sm:$0xf] }
 0x1de   : > { %2399 = vrot.lane.b32.xlu0 %v4290_v4, %s4730_s13  ;;  %2389 = vrot.lane.b32.xlu2 %v4285_v9, %s4730_s13  ;;  %v3203_v4 = vsel %vm5007_vm6, %v3201_v57, %v3202_v58  ;;  %v2774_v9 = vrot.slane %v2772_v3, 5  ;;  %v2628_v58 = vshll.u32 %v4322_v47, 16  ;;  %v4369_v3 = vld [vmem:[%s4821_s7 + $0x34] sm:$0xf]  ;;  %v3536_v47 = vunpack.c.l.b16 %v3446_v43 }
 0x1df   : > { %v1906_v13 = vpop.permute.xlu1 %1905  ;;  %v2765_v16 = vsel %vm4832_vm2, %v2760_v11, %v2764_v53  ;;  %v3185_v11 = vrot.slane %v4369_v3, 5 }
 0x1e0   : > { %1974 = vst.msk [vmem:[#allocation2 + $0x70] sm:$0xf] %vm1945_vm10, %v1906_v13  ;;  %v1904_v17 = vpop.permute.xlu0 %1903  ;;  %v2193_v20 = vpop.permute.xlu2 %2192  ;;  %v4387_v13 = vld [vmem:[%s4821_s7 + $0x7c] sm:$0xf]  ;;  %v2775_v15 = vsel %vm4832_vm2, %v2770_v8, %v2774_v9  ;;  %v2630_v2 = vrot.slane %v2628_v58, 5 }
 0x1e1   : > { %1973 = vst.msk [vmem:[#allocation2 + $0x6c] sm:$0xf] %vm1945_vm10, %v1904_v17  ;;  %v3227_v17 = vrot.slane %v4387_v13, 5  ;;  %v4331_v9 = vld [vmem:[%s4821_s7 + $0x5c] sm:$0x1]  ;;  %v3187_v18 = vrot.slane %v3185_v11, 4 }
 0x1e2   : > { %2286 = vst.msk [vmem:[#allocation2 + $0xc] sm:$0xf] %vm2282_vm11, %v2193_v20  ;;  %v4386_v20 = vld [vmem:[%s4821_s7 + $0x78] sm:$0xe]  ;;  %v4370_v13 = vld [vmem:[%s4821_s7 + $0x38] sm:$0x1] }
 0x1e3   : > { %v4418_v27 = vrot.slane %v4386_v20, 9 }
 0x1e5   : > { %2960 = vrot.lane.b32.xlu1 %v2669_v22, %s4731_s14  ;;  %v3229_v22 = vrot.slane %v3227_v17, 4 }
 0x1e6   : > { %2950 = vrot.lane.b32.xlu0 %v2607_v24, %s4731_s14  ;;  %2948 = vrot.lane.b32.xlu2 %v2597_v28, %s4731_s14  ;;  %v4329_v24 = vld [vmem:[%s4821_s7 + $0x54] sm:$0xf] }
 0x1e7   : > { %v1912_v36 = vpop.permute.xlu1 %1911  ;;  %v4321_v28 = vld [vmem:[%s4821_s7 + $0x34] sm:$0xf]  ;;  %v2681_v34 = vshrl.u32 %v4329_v24, 16  ;;  %v3231_v33 = vsel %vm5007_vm6, %v3229_v22, %v3230_v23  ;;  %v4378_v23 = vld [vmem:[%s4821_s7 + $0x58] sm:$0xf] }
 0x1e8   : > { %1977 = vst.msk [vmem:[#allocation2 + $0x7c] sm:$0xf] %vm1945_vm10, %v1912_v36  ;;  %v1910_v30 = vpop.permute.xlu0 %1909  ;;  %v2199_v41 = vpop.permute.xlu2 %2198  ;;  %v2684_v36 = vshll.u32 %v4329_v24, 16  ;;  %v2618_v37 = vshll.u32 %v4321_v28, 16  ;;  %v2622_v35 = vshrl.u32 %v4321_v28, 16  ;;  %v3206_v31 = vrot.slane %v4378_v23, 5 }
 0x1e9   : > { %1976 = vst.msk [vmem:[#allocation2 + $0x78] sm:$0xf] %vm1945_vm10, %v1910_v30  ;;  %v3228_v30 = vsel %vm5007_vm6, %v4418_v27, %v3227_v17  ;;  %v2683_v40 = vrot.slane %v2681_v34, 4  ;;  %v2700_v17 = vshll.u32 %v4331_v9, 16  ;;  %v2858_v9 = vshll.u32 %v4351_v61, 16 }
 0x1ea   : > { %2289 = vst.msk [vmem:[#allocation2 + $0x18] sm:$0xf] %vm2282_vm11, %v2199_v41  ;;  %v2686_v41 = vrot.slane %v2684_v36, 5  ;;  %v2620_v44 = vrot.slane %v2618_v37, 5  ;;  %v4377_v36 = vld [vmem:[%s4821_s7 + $0x54] sm:$0xe] }
 0x1eb   : > { %v3208_v37 = vrot.slane %v3206_v31, 4  ;;  %v4415_v39 = vrot.slane %v4377_v36, 9  ;;  %v4389_v36 = vld [vmem:[%s4821_s7 + $0x84] sm:$0xe] }
 0x1ec   : > { %v2687_v53 = vor.u32 %v2686_v41, %v2683_v40  ;;  %v4342_v40 = vld [vmem:[%s4821_s7 + $0x88] sm:$0xf] }
 0x1ed   : > { %3287 = vrot.lane.b32.xlu1 %v3182_v42, %s4732_s21  ;;  %v2786_v49 = vshll.u32 %v4342_v40, 16 }
 0x1ee   : > { %3285 = vrot.lane.b32.xlu0 %v3179_v45, %s4732_s21  ;;  %2962 = vrot.lane.b32.xlu2 %v2679_v50, %s4731_s14  ;;  %v2624_v45 = vrot.slane %v2622_v35, 4 }
 0x1ef   : > { %v2191_v56 = vpop.permute.xlu1 %2190 }
 0x1f0   : > { %2285 = vst.msk [vmem:[#allocation2 + $0x8] sm:$0xf] %vm2282_vm11, %v2191_v56  ;;  %v2189_v62 = vpop.permute.xlu0 %2188  ;;  %v2205_v55 = vpop.permute.xlu2 %2204  ;;  %v4292_v56 = vld [vmem:[%s4821_s7 + $0x54] sm:$0xf]  ;;  %v2625_v57 = vor.u32 %v2624_v45, %v2620_v44 }
 0x1f1   : > { %2284 = vst.msk [vmem:[#allocation2 + $0x4] sm:$0xf] %vm2282_vm11, %v2189_v62  ;;  %v2688_v62 = vrot.slane %v2687_v53, 4 }
 0x1f2   : > { %2292 = vst.msk [vmem:[#allocation2 + $0x24] sm:$0xf] %vm2282_vm11, %v2205_v55 }
 0x1f5   : > { %2415 = vrot.lane.b32.xlu1 %v4298_v0, %s4730_s13  ;;  %v2626_v0 = vrot.slane %v2625_v57, 4 }
 0x1f6   : > { %3299 = vrot.lane.b32.xlu0 %v3203_v4, %s4732_s21  ;;  %3297 = vrot.lane.b32.xlu2 %v3200_v7, %s4732_s21  ;;  %v2696_v7 = vrot.slane %v2694_v59, 4 }
 0x1f7   : > { %v2197_v10 = vpop.permute.xlu1 %2196 }
 0x1f8   : > { %2288 = vst.msk [vmem:[#allocation2 + $0x14] sm:$0xf] %vm2282_vm11, %v2197_v10  ;;  %v2195_v12 = vpop.permute.xlu0 %2194  ;;  %v2211_v14 = vpop.permute.xlu2 %2210  ;;  %v2693_v10 = vsel %vm4832_vm2, %v2688_v62, %v2692_v63  ;;  %v5886_v62 = vrot.slane %v2786_v49, 5  ;;  %v4400_v49 = vld [vmem:[%s4821_s7 + $0xb0] sm:$0x1] }
 0x1f9   : > { %2287 = vst.msk [vmem:[#allocation2 + $0x10] sm:$0xf] %vm2282_vm11, %v2195_v12  ;;  %v2631_v12 = vsel %vm4832_vm2, %v2626_v0, %v2630_v2  ;;  %v4343_v0 = vld [vmem:[%s4821_s7 + $0x8c] sm:$0x1] }
 0x1fa   : > { %2295 = vst.msk [vmem:[#allocation2 + $0x30] sm:$0xf] %vm2282_vm11, %v2211_v14  ;;  %v4368_v14 = vld [vmem:[%s4821_s7 + $0x30] sm:$0xe] }
 0x1fd   : > { %2978 = vrot.lane.b32.xlu1 %v2775_v15, %s4731_s14  ;;  %v2621_v15 = vsel %vm4832_vm2, %v2616_v5, %v2620_v44  ;;  %v4300_v44 = vld [vmem:[%s4821_s7 + $0x84] sm:$0xf]  ;;  %v4534_v5 = vld [vmem:[%s6541_s1 + $0x8] sm:$0xff] }
 0x1fe   : > { %2976 = vrot.lane.b32.xlu0 %v2765_v16, %s4731_s14  ;;  %2417 = vrot.lane.b32.xlu2 %v4299_v19, %s4730_s13  ;;  %v2697_v16 = vor.u32 %v2696_v7, %v2692_v63  ;;  %v3188_v19 = vrot.slane %v4370_v13, 5  ;;  %v4307_v7 = vld [vmem:[%s4821_s7 + $0xac] sm:$0xf]  ;;  %v2862_v13 = vshrl.u32 %v4351_v61, 16 }
 0x1ff   : > { %v2203_v21 = vpop.permute.xlu1 %2202 }
 0x200   : > { %2291 = vst.msk [vmem:[#allocation2 + $0x20] sm:$0xf] %vm2282_vm11, %v2203_v21  ;;  %v2201_v26 = vpop.permute.xlu0 %2200  ;;  %v2217_v29 = vpop.permute.xlu2 %2216  ;;  %v4412_v21 = vrot.slane %v4368_v14, 9  ;;  %v2698_v24 = vrot.slane %v2697_v16, 4  ;;  %v3189_v28 = vsel %vm5007_vm6, %v3187_v18, %v3188_v19  ;;  %v4301_v14 = vld [vmem:[%s4821_s7 + $0x88] sm:$0xf] }
 0x201   : > { %2290 = vst.msk [vmem:[#allocation2 + $0x1c] sm:$0xf] %vm2282_vm11, %v2201_v26  ;;  %v2702_v26 = vrot.slane %v2700_v17, 5  ;;  %v4533_v16 = vld [vmem:[%s6541_s1] sm:$0xff]  ;;  %v2860_v18 = vrot.slane %v2858_v9, 5 }
 0x202   : > { %2298 = vst.msk [vmem:[#allocation2 + $0x3c] sm:$0xf] %vm2282_vm11, %v2217_v29  ;;  %v3186_v29 = vsel %vm5007_vm6, %v4412_v21, %v3185_v11 }
 0x203   : > { %v2703_v34 = vsel %vm4832_vm2, %v2698_v24, %v2702_v26  ;;  %v2864_v26 = vrot.slane %v2862_v13, 4 }
 0x205   : > { %2391 = vrot.lane.b32.xlu1 %v4286_v32, %s4730_s13  ;;  %v4379_v32 = vld [vmem:[%s4821_s7 + $0x5c] sm:$0x1] }
 0x206   : > { %3315 = vrot.lane.b32.xlu0 %v3231_v33, %s4732_s21  ;;  %3313 = vrot.lane.b32.xlu2 %v3228_v30, %s4732_s21  ;;  %v3209_v35 = vrot.slane %v4379_v32, 5  ;;  %v4350_v30 = vld [vmem:[%s4821_s7 + $0xa8] sm:$0xf] }
 0x207   : > { %v2209_v42 = vpop.permute.xlu1 %2208  ;;  %v2849_v45 = vshrl.u32 %v4350_v30, 16 }
 0x208   : > { %2294 = vst.msk [vmem:[#allocation2 + $0x2c] sm:$0xf] %vm2282_vm11, %v2209_v42  ;;  %v2207_v46 = vpop.permute.xlu0 %2206  ;;  %v2223_v50 = vpop.permute.xlu2 %2222  ;;  %v4341_v42 = vld [vmem:[%s4821_s7 + $0x84] sm:$0xf]  ;;  %v3210_v48 = vsel %vm5007_vm6, %v3208_v37, %v3209_v35  ;;  %v2865_v37 = vor.u32 %v2864_v26, %v2860_v18 }
 0x209   : > { %2293 = vst.msk [vmem:[#allocation2 + $0x28] sm:$0xf] %vm2282_vm11, %v2207_v46  ;;  %v2852_v46 = vshll.u32 %v4350_v30, 16  ;;  %v2777_v53 = vshrl.u32 %v4341_v42, 16  ;;  %v2780_v54 = vshll.u32 %v4341_v42, 16  ;;  %v2851_v57 = vrot.slane %v2849_v45, 4 }
 0x20a   : > { %2301 = vst.msk [vmem:[#allocation2 + $0x48] sm:$0xf] %vm2282_vm11, %v2223_v50  ;;  %v2790_v50 = vshrl.u32 %v4342_v40, 16  ;;  %v4419_v40 = vrot.slane %v4389_v36, 9  ;;  %v4399_v42 = vld [vmem:[%s4821_s7 + $0xac] sm:$0xf] }
 0x20b   : > { %v2854_v58 = vrot.slane %v2852_v46, 5  ;;  %v2779_v2 = vrot.slane %v2777_v53, 4  ;;  %v2782_v3 = vrot.slane %v2780_v54, 5  ;;  %v2866_v43 = vrot.slane %v2865_v37, 4  ;;  %v4372_v37 = vld [vmem:[%s4821_s7 + $0x40] sm:$0xf] }
 0x20c   : > { %v2792_v63 = vrot.slane %v2790_v50, 4 }
 0x20d   : > { %2405 = vrot.lane.b32.xlu1 %v4293_v51, %s4730_s13  ;;  %v3207_v51 = vsel %vm5007_vm6, %v4415_v39, %v3206_v31 }
 0x20e   : > { %2403 = vrot.lane.b32.xlu0 %v4292_v56, %s4730_s13  ;;  %2393 = vrot.lane.b32.xlu2 %v4287_v60, %s4730_s13  ;;  %v3539_v56 = vpack.c.b16 %v3536_v47, %v3536_v47  ;;  %v2793_v11 = vor.u32 %v2792_v63, %v5886_v62  ;;  %v4288_v63 = vld [vmem:[%s4821_s7 + $0x3c] sm:$0xf] }
 0x20f   : > { %v2215_v55 = vpop.permute.xlu1 %2214 }
 0x210   : > { %2297 = vst.msk [vmem:[#allocation2 + $0x38] sm:$0xf] %vm2282_vm11, %v2215_v55  ;;  %v2213_v4 = vpop.permute.xlu0 %2212  ;;  %v2229_v8 = vpop.permute.xlu2 %2228  ;;  %v3593_v59 = vsel %vm3591_vm12, %v3539_v56, 0  ;;  %v3258_v56 = vrot.slane %v4400_v49, 5 }
 0x211   : > { %2296 = vst.msk [vmem:[#allocation2 + $0x34] sm:$0xf] %vm2282_vm11, %v2213_v4  ;;  %3600 = vmatpush.bf16.msra.mxu0 %v3593_v59  ;;  %4535 = vmatpush.bf16.msra.mxu1 %v3593_v59 }
 0x212   : > { %2304 = vst.msk [vmem:[#allocation2 + $0x54] sm:$0xf] %vm2282_vm11, %v2229_v8  ;;  %4536 = vmatpush.bf16.msra.mxu2 %v3593_v59  ;;  %4537 = vmatpush.bf16.msra.mxu3 %v3593_v59  ;;  %v2855_v8 = vor.u32 %v2854_v58, %v2851_v57  ;;  %v4332_v57 = vld [vmem:[%s4821_s7 + $0x60] sm:$0xf] }
 0x214   : > { %v2856_v17 = vrot.slane %v2855_v8, 4 }
 0x215   : > { %2964 = vrot.lane.b32.xlu1 %v2693_v10, %s4731_s14  ;;  %v4306_v10 = vld [vmem:[%s4821_s7 + $0xa8] sm:$0xf]  ;;  %3601 = vmatpush.bf16.msra.mxu0 %v4534_v5 }
 0x216   : > { %2954 = vrot.lane.b32.xlu0 %v2631_v12, %s4731_s14  ;;  %2952 = vrot.lane.b32.xlu2 %v2621_v15, %s4731_s14  ;;  %v2796_v12 = vshll.u32 %v4343_v0, 16  ;;  %v2783_v15 = vor.u32 %v2782_v3, %v2779_v2  ;;  %v2708_v0 = vshll.u32 %v4332_v57, 16 }
 0x217   : > { %v2221_v20 = vpop.permute.xlu1 %2220  ;;  %4538 = vmatpush.bf16.msra.mxu1 %v4534_v5  ;;  %4539 = vmatpush.bf16.msra.mxu2 %v4534_v5 }
 0x218   : > { %2300 = vst.msk [vmem:[#allocation2 + $0x44] sm:$0xf] %vm2282_vm11, %v2221_v20  ;;  %v2219_v22 = vpop.permute.xlu0 %2218  ;;  %v2235_v27 = vpop.permute.xlu2 %2234  ;;  %4540 = vmatpush.bf16.msra.mxu3 %v4534_v5  ;;  %v2794_v20 = vrot.slane %v2793_v11, 4  ;;  %v2798_v21 = vrot.slane %v2796_v12, 5  ;;  %v2784_v24 = vrot.slane %v2783_v15, 4 }
 0x219   : > { %2299 = vst.msk [vmem:[#allocation2 + $0x40] sm:$0xf] %vm2282_vm11, %v2219_v22  ;;  %v4390_v22 = vld [vmem:[%s4821_s7 + $0x88] sm:$0xf]  ;;  %3602 = vmatpush.bf16.msra.mxu0 %v4533_v16  ;;  %v4333_v12 = vld [vmem:[%s4821_s7 + $0x64] sm:$0xf] }
 0x21a   : > { %2307 = vst.msk [vmem:[#allocation2 + $0x60] sm:$0xf] %vm2282_vm11, %v2235_v27  ;;  %v3234_v31 = vrot.slane %v4390_v22, 5  ;;  %v2799_v32 = vsel %vm4832_vm2, %v2794_v20, %v2798_v21  ;;  %v4295_v20 = vld [vmem:[%s4821_s7 + $0x64] sm:$0xf]  ;;  %v2714_v22 = vshll.u32 %v4333_v12, 16 }
 0x21b   : > { %4541 = vmatpush.bf16.msra.mxu1 %v4533_v16  ;;  %4542 = vmatpush.bf16.msra.mxu2 %v4533_v16 }
 0x21c   : > { %4543 = vmatpush.bf16.msra.mxu3 %v4533_v16  ;;  %v3236_v30 = vrot.slane %v3234_v31, 4  ;;  %v3235_v47 = vsel %vm5007_vm6, %v4419_v40, %v3234_v31  ;;  %v4325_v16 = vld [vmem:[%s4821_s7 + $0x44] sm:$0x1] }
 0x21d   : > { %3291 = vrot.lane.b32.xlu1 %v3189_v28, %s4732_s21  ;;  %v4352_v28 = vld [vmem:[%s4821_s7 + $0xb0] sm:$0x1]  ;;  %v2652_v26 = vshll.u32 %v4325_v16, 16 }
 0x21e   : > { %3289 = vrot.lane.b32.xlu0 %v3186_v29, %s4732_s21  ;;  %2966 = vrot.lane.b32.xlu2 %v2703_v34, %s4731_s14  ;;  %v2861_v29 = vsel %vm4832_vm2, %v2856_v17, %v2860_v18  ;;  %v4391_v34 = vld [vmem:[%s4821_s7 + $0x8c] sm:$0x1]  ;;  %v2868_v35 = vshll.u32 %v4352_v28, 16  ;;  %v4289_v28 = vld [vmem:[%s4821_s7 + $0x40] sm:$0xf] }
 0x21f   : > { %v2227_v33 = vpop.permute.xlu1 %2226 }
 0x220   : > { %2303 = vst.msk [vmem:[#allocation2 + $0x50] sm:$0xf] %vm2282_vm11, %v2227_v33  ;;  %v2225_v38 = vpop.permute.xlu0 %2224  ;;  %v2241_v41 = vpop.permute.xlu2 %2240  ;;  %v2789_v33 = vsel %vm4832_vm2, %v2784_v24, %v5886_v62  ;;  %v4323_v62 = vld [vmem:[%s4821_s7 + $0x3c] sm:$0xf] }
 0x221   : > { %2302 = vst.msk [vmem:[#allocation2 + $0x4c] sm:$0xf] %vm2282_vm11, %v2225_v38  ;;  %v3237_v38 = vrot.slane %v4391_v34, 5  ;;  %v2636_v8 = vshll.u32 %v4323_v62, 16 }
 0x222   : > { %2310 = vst.msk [vmem:[#allocation2 + $0x6c] sm:$0xf] %vm2282_vm11, %v2241_v41 }
 0x223   : > { %v3238_v46 = vsel %vm5007_vm6, %v3236_v30, %v3237_v38  ;;  %v2638_v18 = vrot.slane %v2636_v8, 5 }
 0x225   : > { %2419 = vrot.lane.b32.xlu1 %v4300_v44, %s4730_s13  ;;  %v2870_v44 = vrot.slane %v2868_v35, 5 }
 0x226   : > { %3303 = vrot.lane.b32.xlu0 %v3210_v48, %s4732_s21  ;;  %3301 = vrot.lane.b32.xlu2 %v3207_v51, %s4732_s21  ;;  %v3255_v48 = vrot.slane %v4399_v42, 5  ;;  %v4398_v51 = vld [vmem:[%s4821_s7 + $0xa8] sm:$0xe] }
 0x227   : > { %v2233_v60 = vpop.permute.xlu1 %2232  ;;  %v2871_v50 = vsel %vm4832_vm2, %v2866_v43, %v2870_v44  ;;  %v4422_v59 = vrot.slane %v4398_v51, 9  ;;  %v3192_v43 = vrot.slane %v4372_v37, 5  ;;  %v4309_v37 = vld [vmem:[%s4821_s7 + $0xb8] sm:$0xf] }
 0x228   : > { %2306 = vst.msk [vmem:[#allocation2 + $0x5c] sm:$0xf] %vm2282_vm11, %v2233_v60  ;;  %v2231_v55 = vpop.permute.xlu0 %2230  ;;  %v2386_v4 = vpop.permute.xlu2 %2385  ;;  %v3257_v54 = vrot.slane %v3255_v48, 4  ;;  %v4324_v60 = vld [vmem:[%s4821_s7 + $0x40] sm:$0xf] }
 0x229   : > { %2305 = vst.msk [vmem:[#allocation2 + $0x58] sm:$0xf] %vm2282_vm11, %v2231_v55  ;;  %v2705_v55 = vshrl.u32 %v4332_v57, 16  ;;  %v2642_v3 = vshll.u32 %v4324_v60, 16  ;;  %v3256_v5 = vsel %vm5007_vm6, %v4422_v59, %v3255_v48  ;;  %v4381_v57 = vld [vmem:[%s4821_s7 + $0x64] sm:$0xf] }
 0x22a   : > { %2481 = vst.msk [vmem:[#allocation2 + $0x4] sm:$0xf] %vm2479_vm13, %v2386_v4  ;;  %v3259_v2 = vsel %vm5007_vm6, %v3257_v54, %v3258_v56  ;;  %v2646_v4 = vshrl.u32 %v4324_v60, 16 }
 0x22b   : > { %v2707_v9 = vrot.slane %v2705_v55, 4  ;;  %v2644_v13 = vrot.slane %v2642_v3, 5  ;;  %v4382_v55 = vld [vmem:[%s4821_s7 + $0x68] sm:$0x1] }
 0x22d   : > { %2433 = vrot.lane.b32.xlu1 %v4307_v7, %s4730_s13  ;;  %v2633_v7 = vshrl.u32 %v4323_v62, 16 }
 0x22e   : > { %2431 = vrot.lane.b32.xlu0 %v4306_v10, %s4730_s13  ;;  %2421 = vrot.lane.b32.xlu2 %v4301_v14, %s4730_s13  ;;  %v2710_v10 = vrot.slane %v2708_v0, 5  ;;  %v2648_v14 = vrot.slane %v2646_v4, 4 }
 0x22f   : > { %v2239_v19 = vpop.permute.xlu1 %2238  ;;  %v2635_v17 = vrot.slane %v2633_v7, 4  ;;  %v4353_v7 = vld [vmem:[%s4821_s7 + $0xb4] sm:$0xf] }
 0x230   : > { %2309 = vst.msk [vmem:[#allocation2 + $0x68] sm:$0xf] %vm2282_vm11, %v2239_v19  ;;  %v2237_v23 = vpop.permute.xlu0 %2236  ;;  %v3282_v27 = vpop.permute.xlu2 %3281  ;;  %v2711_v21 = vor.u32 %v2710_v10, %v2707_v9  ;;  %v2649_v24 = vor.u32 %v2648_v14, %v2644_v13  ;;  %v4345_v10 = vld [vmem:[%s4821_s7 + $0x94] sm:$0xf]  ;;  %v2873_v14 = vshrl.u32 %v4353_v7, 16 }
 0x231   : > { %2308 = vst.msk [vmem:[#allocation2 + $0x64] sm:$0xf] %vm2282_vm11, %v2237_v23  ;;  %v4294_v23 = vld [vmem:[%s4821_s7 + $0x60] sm:$0xf] }
 0x232   : > { %v2712_v31 = vrot.slane %v2711_v21, 4  ;;  %v2650_v36 = vrot.slane %v2649_v24, 4 }
 0x235   : > { %2992 = vrot.lane.b32.xlu1 %v2861_v29, %s4731_s14  ;;  %v2639_v29 = vor.u32 %v2638_v18, %v2635_v17  ;;  %v2810_v17 = vshll.u32 %v4345_v10, 16  ;;  %v2814_v18 = vshrl.u32 %v4345_v10, 16 }
 0x236   : > { %2982 = vrot.lane.b32.xlu0 %v2799_v32, %s4731_s14  ;;  %2980 = vrot.lane.b32.xlu2 %v2789_v33, %s4731_s14  ;;  %v2716_v32 = vrot.slane %v2714_v22, 5  ;;  %v2654_v33 = vrot.slane %v2652_v26, 5  ;;  %v2875_v22 = vrot.slane %v2873_v14, 4  ;;  %v4354_v26 = vld [vmem:[%s4821_s7 + $0xb8] sm:$0xf] }
 0x237   : > { %v2384_v39 = vpop.permute.xlu1 %2383  ;;  %v2640_v38 = vrot.slane %v2639_v29, 4  ;;  %v2816_v29 = vrot.slane %v2814_v18, 4 }
 0x238   : > { %2480 = vst.msk [vmem:[#allocation2] sm:$0xf] %vm2479_vm13, %v2384_v39  ;;  %v2243_v41 = vpop.permute.xlu0 %2242  ;;  %v2390_v45 = vpop.permute.xlu2 %2389  ;;  %v2717_v42 = vsel %vm4832_vm2, %v2712_v31, %v2716_v32  ;;  %v2655_v44 = vsel %vm4832_vm2, %v2650_v36, %v2654_v33 }
 0x239   : > { %2311 = vst.msk [vmem:[#allocation2 + $0x70] sm:$0xf] %vm2282_vm11, %v2243_v41  ;;  %v4334_v41 = vld [vmem:[%s4821_s7 + $0x68] sm:$0x1] }
 0x23a   : > { %2483 = vst.msk [vmem:[#allocation2 + $0xc] sm:$0xf] %vm2479_vm13, %v2390_v45  ;;  %v4373_v45 = vld [vmem:[%s4821_s7 + $0x44] sm:$0x1]  ;;  %v2724_v49 = vshll.u32 %v4334_v41, 16  ;;  %v2886_v41 = vshrl.u32 %v4354_v26, 16 }
 0x23b   : > { %v3195_v51 = vrot.slane %v4373_v45, 5 }
 0x23c   : > { %v2726_v59 = vrot.slane %v2724_v49, 5  ;;  %v4393_v49 = vld [vmem:[%s4821_s7 + $0x94] sm:$0xf] }
 0x23d   : > { %3319 = vrot.lane.b32.xlu1 %v3238_v46, %s4732_s21  ;;  %v4371_v46 = vld [vmem:[%s4821_s7 + $0x3c] sm:$0xe] }
 0x23e   : > { %3317 = vrot.lane.b32.xlu0 %v3235_v47, %s4732_s21  ;;  %2994 = vrot.lane.b32.xlu2 %v2871_v50, %s4731_s14  ;;  %v2645_v47 = vsel %vm4832_vm2, %v2640_v38, %v2644_v13  ;;  %v3194_v50 = vrot.slane %v3192_v43, 4  ;;  %v4413_v54 = vrot.slane %v4371_v46, 9  ;;  %v4302_v13 = vld [vmem:[%s4821_s7 + $0x90] sm:$0xf]  ;;  %v4308_v38 = vld [vmem:[%s4821_s7 + $0xb4] sm:$0xf] }
 0x23f   : > { %v2947_v53 = vpop.permute.xlu1 %2946 }
 0x240   : > { %3042 = vst.msk [vmem:[#allocation2 + $0x4] sm:$0xf] %vm3040_vm14, %v2947_v53  ;;  %v2945_v58 = vpop.permute.xlu0 %2944  ;;  %v2949_v61 = vpop.permute.xlu2 %2948  ;;  %v3193_v62 = vsel %vm5007_vm6, %v4413_v54, %v3192_v43  ;;  %v2888_v54 = vrot.slane %v2886_v41, 4 }
 0x241   : > { %3041 = vst.msk [vmem:[#allocation2] sm:$0xf] %vm3040_vm14, %v2945_v58 }
 0x242   : > { %3378 = vst.msk [vmem:[#allocation2] sm:$0xf] %vm3377_vm15, %v3282_v27  ;;  %v2718_v27 = vshrl.u32 %v4333_v12, 16  ;;  %v4344_v12 = vld [vmem:[%s4821_s7 + $0x90] sm:$0xf] }
 0x243   : > { %v2804_v21 = vshll.u32 %v4344_v12, 16 }
 0x244   : > { %v2720_v39 = vrot.slane %v2718_v27, 4  ;;  %v4346_v27 = vld [vmem:[%s4821_s7 + $0x98] sm:$0x1] }
 0x245   : > { %2395 = vrot.lane.b32.xlu1 %v4288_v63, %s4730_s13  ;;  %v3213_v63 = vrot.slane %v4381_v57, 5  ;;  %v2806_v36 = vrot.slane %v2804_v21, 5  ;;  %v4355_v57 = vld [vmem:[%s4821_s7 + $0xbc] sm:$0x1] }
 0x246   : > { %3331 = vrot.lane.b32.xlu0 %v3259_v2, %s4732_s21  ;;  %3329 = vrot.lane.b32.xlu2 %v3256_v5, %s4732_s21  ;;  %v2721_v48 = vor.u32 %v2720_v39, %v2716_v32  ;;  %v4380_v2 = vld [vmem:[%s4821_s7 + $0x60] sm:$0xe]  ;;  %v3216_v5 = vrot.slane %v4382_v55, 5  ;;  %v4403_v21 = vld [vmem:[%s4821_s7 + $0xbc] sm:$0x1] }
 0x247   : > { %v2388_v11 = vpop.permute.xlu1 %2387  ;;  %v3215_v4 = vrot.slane %v3213_v63, 4  ;;  %v4416_v9 = vrot.slane %v4380_v2, 9 }
 0x248   : > { %2482 = vst.msk [vmem:[#allocation2 + $0x8] sm:$0xf] %vm2479_vm13, %v2388_v11  ;;  %v3284_v15 = vpop.permute.xlu0 %3283  ;;  %v2963_v19 = vpop.permute.xlu2 %2962  ;;  %v2722_v58 = vrot.slane %v2721_v48, 4 }
 0x249   : > { %3379 = vst.msk [vmem:[#allocation2 + $0x4] sm:$0xf] %vm3377_vm15, %v3284_v15  ;;  %v2876_v15 = vshll.u32 %v4353_v7, 16  ;;  %v3217_v16 = vsel %vm5007_vm6, %v3215_v4, %v3216_v5  ;;  %v4402_v7 = vld [vmem:[%s4821_s7 + $0xb8] sm:$0xf] }
 0x24a   : > { %3043 = vst.msk [vmem:[#allocation2 + $0x8] sm:$0xf] %vm3040_vm14, %v2949_v61  ;;  %v3196_v61 = vsel %vm5007_vm6, %v3194_v50, %v3195_v51  ;;  %v2727_v0 = vsel %vm4832_vm2, %v2722_v58, %v2726_v59  ;;  %v3241_v59 = vrot.slane %v4393_v49, 5  ;;  %v3262_v18 = vrot.slane %v4402_v7, 5 }
 0x24c   : > { %v3243_v2 = vrot.slane %v3241_v59, 4 }
 0x24d   : > { %2409 = vrot.lane.b32.xlu1 %v4295_v20, %s4730_s13  ;;  %v2801_v20 = vshrl.u32 %v4344_v12, 16  ;;  %v4335_v12 = vld [vmem:[%s4821_s7 + $0x6c] sm:$0xf] }
 0x24e   : > { %2407 = vrot.lane.b32.xlu0 %v4294_v23, %s4730_s13  ;;  %2397 = vrot.lane.b32.xlu2 %v4289_v28, %s4730_s13  ;;  %v2878_v23 = vrot.slane %v2876_v15, 5  ;;  %v2812_v28 = vrot.slane %v2810_v17, 5 }
 0x24f   : > { %v2402_v34 = vpop.permute.xlu1 %2401 }
 0x250   : > { %2489 = vst.msk [vmem:[#allocation2 + $0x24] sm:$0xf] %vm2479_vm13, %v2402_v34  ;;  %v2400_v35 = vpop.permute.xlu0 %2399  ;;  %v4517_v30 = vld [vmem:[#allocation2] sm:$0xff]  ;;  %v3298_v40 = vpop.permute.xlu2 %3297  ;;  %v2803_v34 = vrot.slane %v2801_v20, 4  ;;  %v2817_v39 = vor.u32 %v2816_v29, %v2812_v28  ;;  %v2732_v20 = vshll.u32 %v4335_v12, 16  ;;  %v3265_v29 = vrot.slane %v4403_v21, 5 }
 0x251   : > { %2488 = vst.msk [vmem:[#allocation2 + $0x20] sm:$0xf] %vm2479_vm13, %v2400_v35  ;;  %4498 = vmatmul.msk.bf16.vlgmr.msra.gmra.mxu0 %vm3542_vm0, %v4517_v30  ;;  %v2879_v35 = vor.u32 %v2878_v23, %v2875_v22  ;;  %v2882_v30 = vshll.u32 %v4354_v26, 16  ;;  %v4401_v23 = vld [vmem:[%s4821_s7 + $0xb4] sm:$0xe] }
 0x252   : > { %3050 = vst.msk [vmem:[#allocation2 + $0x24] sm:$0xf] %vm3040_vm14, %v2963_v19  ;;  %v3214_v19 = vsel %vm5007_vm6, %v4416_v9, %v3213_v63  ;;  %v2807_v43 = vor.u32 %v2806_v36, %v2803_v34  ;;  %v2734_v34 = vrot.slane %v2732_v20, 5  ;;  %v4356_v21 = vld [vmem:[%s4821_s7 + $0xc0] sm:$0xf] }
 0x253   : > { %v2884_v45 = vrot.slane %v2882_v30, 5  ;;  %v4296_v30 = vld [vmem:[%s4821_s7 + $0x6c] sm:$0xf] }
 0x255   : > { %2968 = vrot.lane.b32.xlu1 %v2717_v42, %s4731_s14  ;;  %v4303_v42 = vld [vmem:[%s4821_s7 + $0x94] sm:$0xf]  ;;  %v2889_v55 = vor.u32 %v2888_v54, %v2884_v45 }
 0x256   : > { %2958 = vrot.lane.b32.xlu0 %v2655_v44, %s4731_s14  ;;  %2956 = vrot.lane.b32.xlu2 %v2645_v47, %s4731_s14  ;;  %v2880_v44 = vrot.slane %v2879_v35, 4  ;;  %v2818_v47 = vrot.slane %v2817_v39, 4 }
 0x257   : > { %v2961_v53 = vpop.permute.xlu1 %2960  ;;  %v2890_v10 = vrot.slane %v2889_v55, 4  ;;  %v4348_v55 = vld [vmem:[%s4821_s7 + $0xa0] sm:$0xf] }
 0x258   : > { %3049 = vst.msk [vmem:[#allocation2 + $0x20] sm:$0xf] %vm3040_vm14, %v2961_v53  ;;  %v2951_v56 = vpop.permute.xlu0 %2950  ;;  %v2418_v60 = vpop.permute.xlu2 %2417  ;;  %v2808_v53 = vrot.slane %v2807_v43, 4  ;;  %v2885_v58 = vsel %vm4832_vm2, %v2880_v44, %v2884_v45 }
 0x259   : > { %3044 = vst.msk [vmem:[#allocation2 + $0xc] sm:$0xf] %vm3040_vm14, %v2951_v56 }
 0x25a   : > { %3386 = vst.msk [vmem:[#allocation2 + $0x20] sm:$0xf] %vm3377_vm15, %v3298_v40  ;;  %v2820_v40 = vshll.u32 %v4346_v27, 16  ;;  %v2813_v63 = vsel %vm4832_vm2, %v2808_v53, %v2812_v28  ;;  %v3264_v28 = vrot.slane %v3262_v18, 4  ;;  %v4262_v53 = vld [vmem:[%s4821_s7 + $0xbc] sm:$0x1] }
 0x25b   : > { %2497 = vst.msk [vmem:[#allocation2 + $0x44] sm:$0xf] %vm2479_vm13, %v2418_v60 }
 0x25c   : > { %v2822_v48 = vrot.slane %v2820_v40, 5  ;;  %v3266_v40 = vsel %vm5007_vm6, %v3264_v28, %v3265_v29 }
 0x25d   : > { %3295 = vrot.lane.b32.xlu1 %v3196_v61, %s4732_s21  ;;  %v4394_v61 = vld [vmem:[%s4821_s7 + $0x98] sm:$0x1] }
 0x25e   : > { %3293 = vrot.lane.b32.xlu0 %v3193_v62, %s4732_s21  ;;  %2970 = vrot.lane.b32.xlu2 %v2727_v0, %s4731_s14  ;;  %v2823_v60 = vsel %vm4832_vm2, %v2818_v47, %v2822_v48  ;;  %v4392_v62 = vld [vmem:[%s4821_s7 + $0x90] sm:$0xe]  ;;  %v2892_v0 = vshll.u32 %v4355_v57, 16 }
 0x25f   : > { %v3288_v3 = vpop.permute.xlu1 %3287  ;;  %v4420_v5 = vrot.slane %v4392_v62, 9  ;;  %v4384_v48 = vld [vmem:[%s4821_s7 + $0x70] sm:$0xf] }
 0x260   : > { %3381 = vst.msk [vmem:[#allocation2 + $0xc] sm:$0xf] %vm3377_vm15, %v3288_v3  ;;  %v3286_v8 = vpop.permute.xlu0 %3285  ;;  %v3314_v11 = vpop.permute.xlu2 %3313  ;;  %v3244_v3 = vrot.slane %v4394_v61, 5  ;;  %v3220_v54 = vrot.slane %v4384_v48, 5  ;;  %v4297_v57 = vld [vmem:[%s4821_s7 + $0x70] sm:$0xf] }
 0x261   : > { %3380 = vst.msk [vmem:[#allocation2 + $0x8] sm:$0xf] %vm3377_vm15, %v3286_v8  ;;  %v4336_v8 = vld [vmem:[%s4821_s7 + $0x70] sm:$0xf]  ;;  %v3242_v17 = vsel %vm5007_vm6, %v4420_v5, %v3241_v59  ;;  %v2176_v59 = vrot.slane %v2174_v6, 4  ;;  %v2834_v6 = vshll.u32 %v4348_v55, 16 }
 0x262   : > { %v3245_v14 = vsel %vm5007_vm6, %v3243_v2, %v3244_v3  ;;  %v2738_v15 = vshll.u32 %v4336_v8, 16  ;;  %v3222_v62 = vrot.slane %v3220_v54, 4  ;;  %v4347_v3 = vld [vmem:[%s4821_s7 + $0x9c] sm:$0xf]  ;;  %v2838_v5 = vshrl.u32 %v4348_v55, 16 }
 0x263   : > { %v4396_v48 = vld [vmem:[%s4821_s7 + $0xa0] sm:$0xf] }
 0x265   : > { %2423 = vrot.lane.b32.xlu1 %v4302_v13, %s4730_s13 }
 0x266   : > { %3307 = vrot.lane.b32.xlu0 %v3217_v16, %s4732_s21  ;;  %3305 = vrot.lane.b32.xlu2 %v3214_v19, %s4732_s21  ;;  %v2742_v16 = vshrl.u32 %v4336_v8, 16  ;;  %v2729_v19 = vshrl.u32 %v4335_v12, 16  ;;  %v2825_v8 = vshrl.u32 %v4347_v3, 16  ;;  %v2840_v12 = vrot.slane %v2838_v5, 4 }
 0x267   : > { %v2416_v24 = vpop.permute.xlu1 %2415 }
 0x268   : > { %2496 = vst.msk [vmem:[#allocation2 + $0x40] sm:$0xf] %vm2479_vm13, %v2416_v24  ;;  %v3300_v31 = vpop.permute.xlu0 %3299  ;;  %v4518_v32 = vld [vmem:[#allocation2 + $0x8] sm:$0xff]  ;;  %v2394_v33 = vpop.permute.xlu2 %2393  ;;  %v2740_v24 = vrot.slane %v2738_v15, 5  ;;  %v2744_v26 = vrot.slane %v2742_v16, 4  ;;  %v2827_v15 = vrot.slane %v2825_v8, 4 }
 0x269   : > { %3387 = vst.msk [vmem:[#allocation2 + $0x24] sm:$0xf] %vm3377_vm15, %v3300_v31  ;;  %4499 = vmatmul.msk.bf16.gmra.mxu0 %vm3542_vm0, %v4518_v32  ;;  %v4337_v31 = vld [vmem:[%s4821_s7 + $0x74] sm:$0x1]  ;;  %v2731_v32 = vrot.slane %v2729_v19, 4 }
 0x26a   : > { %2485 = vst.msk [vmem:[#allocation2 + $0x14] sm:$0xf] %vm2479_vm13, %v2394_v33  ;;  %v2748_v39 = vshll.u32 %v4337_v31, 16  ;;  %v4357_v19 = vld [vmem:[%s4821_s7 + $0xc4] sm:$0xf] }
 0x26b   : > { %v2735_v41 = vor.u32 %v2734_v34, %v2731_v32  ;;  %v2906_v28 = vshll.u32 %v4357_v19, 16  ;;  %v2910_v29 = vshrl.u32 %v4357_v19, 16  ;;  %v4304_v31 = vld [vmem:[%s4821_s7 + $0x9c] sm:$0xf]  ;;  %v2897_v32 = vshrl.u32 %v4356_v21, 16 }
 0x26c   : > { %v2750_v44 = vrot.slane %v2748_v39, 5  ;;  %v2900_v34 = vshll.u32 %v4356_v21, 16 }
 0x26d   : > { %2437 = vrot.lane.b32.xlu1 %v4309_v37, %s4730_s13  ;;  %v4423_v37 = vrot.slane %v4401_v23, 9  ;;  %v2912_v39 = vrot.slane %v2910_v29, 4 }
 0x26e   : > { %2435 = vrot.lane.b32.xlu0 %v4308_v38, %s4730_s13  ;;  %2425 = vrot.lane.b32.xlu2 %v4303_v42, %s4730_s13  ;;  %v2745_v38 = vor.u32 %v2744_v26, %v2740_v24  ;;  %v4305_v26 = vld [vmem:[%s4821_s7 + $0xa0] sm:$0xf] }
 0x26f   : > { %v2979_v46 = vpop.permute.xlu1 %2978  ;;  %v3263_v42 = vsel %vm5007_vm6, %v4423_v37, %v3262_v18 }
 0x270   : > { %3058 = vst.msk [vmem:[#allocation2 + $0x44] sm:$0xf] %vm3040_vm14, %v2979_v46  ;;  %v2977_v50 = vpop.permute.xlu0 %2976  ;;  %v4521_v51 = vld [vmem:[#allocation2 + $0x20] sm:$0xff]  ;;  %v2953_v56 = vpop.permute.xlu2 %2952  ;;  %v2746_v43 = vrot.slane %v2745_v38, 4  ;;  %v2736_v46 = vrot.slane %v2735_v41, 4  ;;  %v2908_v38 = vrot.slane %v2906_v28, 5 }
 0x271   : > { %3057 = vst.msk [vmem:[#allocation2 + $0x40] sm:$0xf] %vm3040_vm14, %v2977_v50  ;;  %4502 = vmatmul.msk.bf16.vlgmr.msra.gmra.mxu1 %vm3542_vm0, %v4521_v51 }
 0x272   : > { %3394 = vst.msk [vmem:[#allocation2 + $0x40] sm:$0xf] %vm3377_vm15, %v3314_v11  ;;  %v2894_v11 = vrot.slane %v2892_v0, 5  ;;  %v2751_v50 = vsel %vm4832_vm2, %v2746_v43, %v2750_v44  ;;  %v2741_v51 = vsel %vm4832_vm2, %v2736_v46, %v2740_v24  ;;  %v2902_v43 = vrot.slane %v2900_v34, 5 }
 0x274   : > { %v2895_v22 = vsel %vm4832_vm2, %v2890_v10, %v2894_v11  ;;  %v2836_v11 = vrot.slane %v2834_v6, 5  ;;  %v4397_v6 = vld [vmem:[%s4821_s7 + $0xa4] sm:$0x1] }
 0x275   : > { %2996 = vrot.lane.b32.xlu1 %v2885_v58, %s4731_s14  ;;  %v4383_v58 = vld [vmem:[%s4821_s7 + $0x6c] sm:$0xe] }
 0x276   : > { %2986 = vrot.lane.b32.xlu0 %v2823_v60, %s4731_s14  ;;  %2984 = vrot.lane.b32.xlu2 %v2813_v63, %s4731_s14  ;;  %v2177_v60 = vrot.slane %v4262_v53, 5  ;;  %v4417_v2 = vrot.slane %v4383_v58, 9  ;;  %v2841_v23 = vor.u32 %v2840_v12, %v2836_v11 }
 0x277   : > { %v2392_v4 = vpop.permute.xlu1 %2391 }
 0x278   : > { %2484 = vst.msk [vmem:[#allocation2 + $0x10] sm:$0xf] %vm2479_vm13, %v2392_v4  ;;  %v3316_v9 = vpop.permute.xlu0 %3315  ;;  %v2967_v13 = vpop.permute.xlu2 %2966  ;;  %v2178_v52 = vsel %vm5007_vm6, %v2176_v59, %v2177_v60  ;;  %v3221_v10 = vsel %vm5007_vm6, %v4417_v2, %v3220_v54  ;;  %v4405_v60 = vld [vmem:[%s4821_s7 + $0xc4] sm:$0xf] }
 0x279   : > { %3395 = vst.msk [vmem:[#allocation2 + $0x44] sm:$0xf] %vm3377_vm15, %v3316_v9  ;;  %v2828_v9 = vshll.u32 %v4347_v3, 16  ;;  %v4406_v3 = vld [vmem:[%s4821_s7 + $0xc8] sm:$0x1] }
 0x27a   : > { %3045 = vst.msk [vmem:[#allocation2 + $0x10] sm:$0xf] %vm3040_vm14, %v2953_v56  ;;  %v4385_v56 = vld [vmem:[%s4821_s7 + $0x74] sm:$0x1] }
 0x27b   : > { %v3223_v63 = vrot.slane %v4385_v56, 5  ;;  %v2830_v16 = vrot.slane %v2828_v9, 5  ;;  %v3248_v56 = vrot.slane %v4396_v48, 5 }
 0x27d   : > { %3323 = vrot.lane.b32.xlu1 %v3245_v14, %s4732_s21  ;;  %v3224_v7 = vsel %vm5007_vm6, %v3222_v62, %v3223_v63  ;;  %v4349_v14 = vld [vmem:[%s4821_s7 + $0xa4] sm:$0x1]  ;;  %v3250_v12 = vrot.slane %v3248_v56, 4 }
 0x27e   : > { %3321 = vrot.lane.b32.xlu0 %v3242_v17, %s4732_s21  ;;  %2998 = vrot.lane.b32.xlu2 %v2895_v22, %s4731_s14  ;;  %v4310_v22 = vld [vmem:[%s4821_s7 + $0xc0] sm:$0xf]  ;;  %v2844_v24 = vshll.u32 %v4349_v14, 16  ;;  %v4359_v14 = vld [vmem:[%s4821_s7 + $0xcc] sm:$0xf] }
 0x27f   : > { %v2406_v27 = vpop.permute.xlu1 %2405  ;;  %v2921_v21 = vshrl.u32 %v4359_v14, 16 }
 0x280   : > { %2491 = vst.msk [vmem:[#allocation2 + $0x2c] sm:$0xf] %vm2479_vm13, %v2406_v27  ;;  %v2404_v36 = vpop.permute.xlu0 %2403  ;;  %v4525_v33 = vld [vmem:[#allocation2 + $0x40] sm:$0xff]  ;;  %v3302_v35 = vpop.permute.xlu2 %3301  ;;  %v2831_v27 = vor.u32 %v2830_v16, %v2827_v15  ;;  %v4360_v16 = vld [vmem:[%s4821_s7 + $0xd0] sm:$0xf] }
 0x281   : > { %2490 = vst.msk [vmem:[#allocation2 + $0x28] sm:$0xf] %vm2479_vm13, %v2404_v36  ;;  %4506 = vmatmul.msk.bf16.vlgmr.msra.gmra.mxu2 %vm3542_vm0, %v4525_v33  ;;  %v2842_v36 = vrot.slane %v2841_v23, 4  ;;  %v2846_v33 = vrot.slane %v2844_v24, 5  ;;  %v4265_v23 = vld [vmem:[%s4821_s7 + $0xc8] sm:$0x1] }
 0x282   : > { %3052 = vst.msk [vmem:[#allocation2 + $0x2c] sm:$0xf] %vm3040_vm14, %v2967_v13  ;;  %v2923_v34 = vrot.slane %v2921_v21, 4 }
 0x285   : > { %2411 = vrot.lane.b32.xlu1 %v4296_v30, %s4730_s13  ;;  %v4358_v30 = vld [vmem:[%s4821_s7 + $0xc8] sm:$0x1] }
 0x286   : > { %3335 = vrot.lane.b32.xlu0 %v3266_v40, %s4732_s21  ;;  %3333 = vrot.lane.b32.xlu2 %v3263_v42, %s4732_s21  ;;  %v2899_v42 = vrot.slane %v2897_v32, 4  ;;  %v2184_v32 = vrot.slane %v4265_v23, 5 }
 0x287   : > { %v2965_v45 = vpop.permute.xlu1 %2964 }
 0x288   : > { %3051 = vst.msk [vmem:[#allocation2 + $0x28] sm:$0xf] %vm3040_vm14, %v2965_v45  ;;  %v2955_v47 = vpop.permute.xlu0 %2954  ;;  %v2422_v49 = vpop.permute.xlu2 %2421  ;;  %v2847_v45 = vsel %vm4832_vm2, %v2842_v36, %v2846_v33  ;;  %v2903_v53 = vor.u32 %v2902_v43, %v2899_v42  ;;  %v4361_v33 = vld [vmem:[%s4821_s7 + $0xd4] sm:$0x1] }
 0x289   : > { %3046 = vst.msk [vmem:[#allocation2 + $0x14] sm:$0xf] %vm3040_vm14, %v2955_v47  ;;  %v4395_v47 = vld [vmem:[%s4821_s7 + $0x9c] sm:$0xe]  ;;  %v2940_v42 = vshll.u32 %v4361_v33, 16 }
 0x28a   : > { %3388 = vst.msk [vmem:[#allocation2 + $0x28] sm:$0xf] %vm3377_vm15, %v3302_v35  ;;  %v2832_v35 = vrot.slane %v2831_v27, 4  ;;  %v4421_v54 = vrot.slane %v4395_v47, 9  ;;  %v2904_v62 = vrot.slane %v2903_v53, 4 }
 0x28b   : > { %2499 = vst.msk [vmem:[#allocation2 + $0x4c] sm:$0xf] %vm2479_vm13, %v2422_v49  ;;  %v2913_v49 = vor.u32 %v2912_v39, %v2908_v38  ;;  %v4263_v27 = vld [vmem:[%s4821_s7 + $0xc0] sm:$0xe]  ;;  %v2942_v47 = vrot.slane %v2940_v42, 5 }
 0x28c   : > { %v2837_v46 = vsel %vm4832_vm2, %v2832_v35, %v2836_v11  ;;  %v3249_v55 = vsel %vm5007_vm6, %v4421_v54, %v3248_v56  ;;  %v4408_v53 = vld [vmem:[%s4821_s7 + $0xd0] sm:$0xf] }
 0x28d   : > { %2974 = vrot.lane.b32.xlu1 %v2751_v50, %s4731_s14  ;;  %v2916_v50 = vshll.u32 %v4358_v30, 16  ;;  %v2914_v58 = vrot.slane %v2913_v49, 4 }
 0x28e   : > { %2972 = vrot.lane.b32.xlu0 %v2741_v51, %s4731_s14  ;;  %2413 = vrot.lane.b32.xlu2 %v4297_v57, %s4730_s13  ;;  %v4311_v51 = vld [vmem:[%s4821_s7 + $0xc4] sm:$0xf] }
 0x28f   : > { %v3292_v61 = vpop.permute.xlu1 %3291  ;;  %v2918_v59 = vrot.slane %v2916_v50, 5 }
 0x290   : > { %3383 = vst.msk [vmem:[#allocation2 + $0x14] sm:$0xf] %vm3377_vm15, %v3292_v61  ;;  %v3290_v0 = vpop.permute.xlu0 %3289  ;;  %v2981_v4 = vpop.permute.xlu2 %2980 }
 0x291   : > { %3382 = vst.msk [vmem:[#allocation2 + $0x10] sm:$0xf] %vm3377_vm15, %v3290_v0  ;;  %v3269_v0 = vrot.slane %v4405_v60, 5  ;;  %v2919_v2 = vsel %vm4832_vm2, %v2914_v58, %v2918_v59  ;;  %v3276_v58 = vrot.slane %v4408_v53, 5  ;;  %v4409_v59 = vld [vmem:[%s4821_s7 + $0xd4] sm:$0x1] }
 0x292   : > { %v4313_v60 = vld [vmem:[%s4821_s7 + $0xd0] sm:$0xf] }
 0x293   : > { %v3271_v5 = vrot.slane %v3269_v0, 4 }
 0x295   : > { %2244 = vrot.lane.b32.xlu1 %v2178_v52, %s4729_s12  ;;  %v2909_v52 = vsel %vm4832_vm2, %v2904_v62, %v2908_v38  ;;  %v4281_v38 = vrot.slane %v4263_v27, 9 }
 0x296   : > { %3311 = vrot.lane.b32.xlu0 %v3224_v7, %s4732_s21  ;;  %3309 = vrot.lane.b32.xlu2 %v3221_v10, %s4732_s21  ;;  %v3272_v7 = vrot.slane %v4406_v3, 5  ;;  %v4264_v10 = vld [vmem:[%s4821_s7 + $0xc4] sm:$0xf] }
 0x297   : > { %v2420_v13 = vpop.permute.xlu1 %2419 }
 0x298   : > { %2498 = vst.msk [vmem:[#allocation2 + $0x48] sm:$0xf] %vm2479_vm13, %v2420_v13  ;;  %v3304_v17 = vpop.permute.xlu0 %3303  ;;  %v4519_v18 = vld [vmem:[#allocation2 + $0x10] sm:$0xff]  ;;  %v2995_v20 = vpop.permute.xlu2 %2994  ;;  %v3251_v13 = vrot.slane %v4397_v6, 5 }
 0x299   : > { %3389 = vst.msk [vmem:[#allocation2 + $0x2c] sm:$0xf] %vm3377_vm15, %v3304_v17  ;;  %4500 = vmatmul.msk.bf16.gmra.mxu0 %vm3542_vm0, %v4519_v18  ;;  %v3273_v17 = vsel %vm5007_vm6, %v3271_v5, %v3272_v7  ;;  %v2934_v18 = vshrl.u32 %v4360_v16, 16 }
 0x29a   : > { %3059 = vst.msk [vmem:[#allocation2 + $0x48] sm:$0xf] %vm3040_vm14, %v2981_v4  ;;  %v4404_v4 = vld [vmem:[%s4821_s7 + $0xc0] sm:$0xe]  ;;  %v3252_v24 = vsel %vm5007_vm6, %v3250_v12, %v3251_v13 }
 0x29b   : > { %v4424_v9 = vrot.slane %v4404_v4, 9  ;;  %v2936_v28 = vrot.slane %v2934_v18, 4 }
 0x29d   : > { %2439 = vrot.lane.b32.xlu1 %v4310_v22, %s4730_s13  ;;  %v3270_v19 = vsel %vm5007_vm6, %v4424_v9, %v3269_v0  ;;  %v2924_v22 = vshll.u32 %v4359_v14, 16 }
 0x29e   : > { %2429 = vrot.lane.b32.xlu0 %v4305_v26, %s4730_s13  ;;  %2427 = vrot.lane.b32.xlu2 %v4304_v31, %s4730_s13  ;;  %v2930_v26 = vshll.u32 %v4360_v16, 16 }
 0x29f   : > { %v2434_v37 = vpop.permute.xlu1 %2433  ;;  %v2926_v36 = vrot.slane %v2924_v22, 5 }
 0x2a0   : > { %2505 = vst.msk [vmem:[#allocation2 + $0x64] sm:$0xf] %vm2479_vm13, %v2434_v37  ;;  %v2432_v40 = vpop.permute.xlu0 %2431  ;;  %v4522_v41 = vld [vmem:[#allocation2 + $0x28] sm:$0xff]  ;;  %v3330_v44 = vpop.permute.xlu2 %3329  ;;  %v2932_v30 = vrot.slane %v2930_v26, 5 }
 0x2a1   : > { %2504 = vst.msk [vmem:[#allocation2 + $0x60] sm:$0xf] %vm2479_vm13, %v2432_v40  ;;  %4503 = vmatmul.msk.bf16.gmra.mxu1 %vm3542_vm0, %v4522_v41  ;;  %v4312_v40 = vld [vmem:[%s4821_s7 + $0xcc] sm:$0xf] }
 0x2a2   : > { %3066 = vst.msk [vmem:[#allocation2 + $0x64] sm:$0xf] %vm3040_vm14, %v2995_v20  ;;  %v2181_v20 = vrot.slane %v4264_v10, 5  ;;  %v2937_v41 = vor.u32 %v2936_v28, %v2932_v30 }
 0x2a4   : > { %v2183_v31 = vrot.slane %v2181_v20, 4 }
 0x2a5   : > { %2990 = vrot.lane.b32.xlu1 %v2847_v45, %s4731_s14  ;;  %v2182_v45 = vsel %vm5007_vm6, %v4281_v38, %v2181_v20 }
 0x2a6   : > { %2988 = vrot.lane.b32.xlu0 %v2837_v46, %s4731_s14  ;;  %2441 = vrot.lane.b32.xlu2 %v4311_v51, %s4730_s13  ;;  %v2185_v43 = vsel %vm5007_vm6, %v2183_v31, %v2184_v32  ;;  %v2938_v46 = vrot.slane %v2937_v41, 4 }
 0x2a7   : > { %v2993_v57 = vpop.permute.xlu1 %2992 }
 0x2a8   : > { %3065 = vst.msk [vmem:[#allocation2 + $0x60] sm:$0xf] %vm3040_vm14, %v2993_v57  ;;  %v2983_v61 = vpop.permute.xlu0 %2982  ;;  %v2398_v63 = vpop.permute.xlu2 %2397  ;;  %v2943_v56 = vsel %vm4832_vm2, %v2938_v46, %v2942_v47 }
 0x2a9   : > { %3060 = vst.msk [vmem:[#allocation2 + $0x4c] sm:$0xf] %vm3040_vm14, %v2983_v61  ;;  %v4407_v61 = vld [vmem:[%s4821_s7 + $0xcc] sm:$0xe]  ;;  %s4516_s7 = sshll.u32 %s4815_s29, 7  ;;  %s6464_s29 = sand.u32 1, %s4707_s16  }
 0x2aa   : > { %3402 = vst.msk [vmem:[#allocation2 + $0x60] sm:$0xf] %vm3377_vm15, %v3330_v44  ;;  %v2927_v44 = vor.u32 %v2926_v36, %v2923_v34  ;;  %s6199_s10 = scalar_lea.vmem %s6542_s2, %s4516_s7  ;;  %s223_s24 = scalar_lea.vmem [#allocation3], %s6464_s29 }
 0x2ab   : > { %2487 = vst.msk [vmem:[#allocation2 + $0x1c] sm:$0xf] %vm2479_vm13, %v2398_v63  ;;  %v3278_v63 = vrot.slane %v3276_v58, 4  ;;  %s6475_s26 = sshll.u32 %s223_s24, 4  ;;  %s229_s5 = scalar_lea.vmem [#allocation5], %s6464_s29  ;;  %s3954_s26 = int_to_ptr.vmem [resolvable:$true] %s6475_s26 }
 0x2ac   : > { %v2928_v49 = vrot.slane %v2927_v44, 4  ;;  %s6480_s6 = sshll.u32 %s229_s5, 4  ;;  %s6482_s7 = sshll.u32 %s3965_s22, 4  ;;  %s3968_s6 = int_to_ptr.vmem [resolvable:$true] %s6480_s6  ;;  %s3970_s7 = int_to_ptr.hbm [resolvable:$true] %s6482_s7 }
 0x2ad   : > { %3325 = vrot.lane.b32.xlu1 %v3249_v55, %s4732_s21  ;;  %v3279_v55 = vrot.slane %v4409_v59, 5 }
 0x2ae   : > { %3002 = vrot.lane.b32.xlu0 %v2919_v2, %s4731_s14  ;;  %3000 = vrot.lane.b32.xlu2 %v2909_v52, %s4731_s14  ;;  %v2933_v57 = vsel %vm4832_vm2, %v2928_v49, %v2932_v30  ;;  %v4425_v2 = vrot.slane %v4407_v61, 9  ;;  %vm3749_vm2 = vcmask 64512  }
 0x2af   : > { %v3320_v8 = vpop.permute.xlu1 %3319  ;;  %v3280_v3 = vsel %vm5007_vm6, %v3278_v63, %v3279_v55 }
 0x2b0   : > { %3397 = vst.msk [vmem:[#allocation2 + $0x4c] sm:$0xf] %vm3377_vm15, %v3320_v8  ;;  %v3318_v11 = vpop.permute.xlu0 %3317  ;;  %v2957_v15 = vpop.permute.xlu2 %2956  ;;  %v3277_v4 = vsel %vm5007_vm6, %v4425_v2, %v3276_v58 }
 0x2b1   : > { %3396 = vst.msk [vmem:[#allocation2 + $0x48] sm:$0xf] %vm3377_vm15, %v3318_v11 }
 0x2b5   : > { %3339 = vrot.lane.b32.xlu1 %v3273_v17, %s4732_s21 }
 0x2b6   : > { %3337 = vrot.lane.b32.xlu0 %v3270_v19, %s4732_s21  ;;  %3327 = vrot.lane.b32.xlu2 %v3252_v24, %s4732_s21 }
 0x2b7   : > { %v2396_v29 = vpop.permute.xlu1 %2395 }
 0x2b8   : > { %2486 = vst.msk [vmem:[#allocation2 + $0x18] sm:$0xf] %vm2479_vm13, %v2396_v29  ;;  %v3332_v37 = vpop.permute.xlu0 %3331  ;;  %v4526_v35 = vld [vmem:[#allocation2 + $0x48] sm:$0xff]  ;;  %v2971_v39 = vpop.permute.xlu2 %2970 }
 0x2b9   : > { %3403 = vst.msk [vmem:[#allocation2 + $0x64] sm:$0xf] %vm3377_vm15, %v3332_v37  ;;  %4507 = vmatmul.msk.bf16.gmra.mxu2 %vm3542_vm0, %v4526_v35 }
 0x2ba   : > { %3047 = vst.msk [vmem:[#allocation2 + $0x18] sm:$0xf] %vm3040_vm14, %v2957_v15 }
 0x2bd   : > { %2443 = vrot.lane.b32.xlu1 %v4312_v40, %s4730_s13 }
 0x2be   : > { %2248 = vrot.lane.b32.xlu0 %v2185_v43, %s4729_s12  ;;  %2246 = vrot.lane.b32.xlu2 %v2182_v45, %s4729_s12  ;;  %s4633_s12 = scalar_lea.hbm %s6543_s3, 2 }
 0x2bf   : > { %v2410_v48 = vpop.permute.xlu1 %2409 }
 0x2c0   : > { %2493 = vst.msk [vmem:[#allocation2 + $0x34] sm:$0xf] %vm2479_vm13, %v2410_v48  ;;  %v2408_v50 = vpop.permute.xlu0 %2407  ;;  %v4529_v51 = vld [vmem:[#allocation2 + $0x60] sm:$0xff]  ;;  %v3306_v54 = vpop.permute.xlu2 %3305 }
 0x2c1   : > { %2492 = vst.msk [vmem:[#allocation2 + $0x30] sm:$0xf] %vm2479_vm13, %v2408_v50  ;;  %4510 = vmatmul.msk.bf16.vlgmr.msra.gmra.mxu3 %vm3542_vm0, %v4529_v51 }
 0x2c2   : > { %3054 = vst.msk [vmem:[#allocation2 + $0x34] sm:$0xf] %vm3040_vm14, %v2971_v39 }
 0x2c5   : > { %3006 = vrot.lane.b32.xlu1 %v2943_v56, %s4731_s14 }
 0x2c6   : > { %3004 = vrot.lane.b32.xlu0 %v2933_v57, %s4731_s14  ;;  %2445 = vrot.lane.b32.xlu2 %v4313_v60, %s4730_s13  ;;  %s3951_s13 = scalar_lea.hbm %s6543_s3, %s4715_s18  ;;  %s3934_s18 = scalar_lea.sflag [#allocation4], %s6464_s29 }
 0x2c7   : > { %v2969_v62 = vpop.permute.xlu1 %2968  ;;  %s6477_s30 = sshll.u32 %s3951_s13, 4  ;;  %s3956_s30 = int_to_ptr.hbm [resolvable:$true] %s6477_s30 }
 0x2c8   : > { %3053 = vst.msk [vmem:[#allocation2 + $0x30] sm:$0xf] %vm3040_vm14, %v2969_v62  ;;  %v2959_v0 = vpop.permute.xlu0 %2958  ;;  %v2426_v25 = vpop.permute.xlu2 %2425  ;;  %s4627_s8 = sshra.s32 %s3956_s30, 4  ;;  %s4628_s8 = int_to_ptr.hbm [resolvable:$true] %s4627_s8 }
 0x2c9   : > { %3048 = vst.msk [vmem:[#allocation2 + $0x1c] sm:$0xf] %vm3040_vm14, %v2959_v0  ;;  %s4629_s9 = scalar_lea.hbm %s4628_s8, 1  ;;  %p4634_p1 = scmp.lt.s32.totalorder %s4628_s8, %s6543_s3 }
 0x2ca   : > { %3390 = vst.msk [vmem:[#allocation2 + $0x30] sm:$0xf] %vm3377_vm15, %v3306_v54  ;;  %p4630_p12 = scmp.ne.s32.totalorder %s4628_s8, %s4629_s9  ;;  %p4635_p2 = scmp.lt.s32.totalorder %s4633_s12, %s4629_s9 }
 0x2cb   : > { %2501 = vst.msk [vmem:[#allocation2 + $0x54] sm:$0xf] %vm2479_vm13, %v2426_v25 }
 0x2cc   : > { %p4631_p13 = pnand %p4630_p12, %p4798_p4  ;;  %p4636_p3 = por %p4635_p2, %p4634_p1 }
 0x2ce   : > { %3343 = vrot.lane.b32.xlu0 %v3280_v3, %s4732_s21  ;;  %v3604_v6 = vpop.f32.mrf.mxu0  ;;  %3341 = vrot.lane.b32.xlu2 %v3277_v4, %s4732_s21  ;;  %p4632_p0 = pneg %p4631_p13 }
 0x2cf   : > { %v3296_v52 = vpop.permute.xlu1 %3295  ;;  %v3684_v7 = vpack.c.bf16 %v3604_v6, %v3604_v6  ;;  %v3821_v8 = vmul.f32 %v3604_v6, %v3604_v6  ;;  %v3750_v11 = vsel %vm3749_vm2, %v3604_v6, 0.0 }
 0x2d0   : > { %3385 = vst.msk [vmem:[#allocation2 + $0x1c] sm:$0xf] %vm3377_vm15, %v3296_v52  ;;  %v3294_v5 = vpop.permute.xlu0 %3293  ;;  %v2985_v1 = vpop.permute.xlu2 %2984  ;;  %p4637_p5 = pnand %p4636_p3, %p4632_p0 }
 0x2d1   : > { %3384 = vst.msk [vmem:[#allocation2 + $0x18] sm:$0xf] %vm3377_vm15, %v3294_v5  ;;  %v3853_v19 = vsel %vm3749_vm2, %v3821_v8, 0.0 }
 0x2d2   : > { %3717 = vst.msk [vmem:[%s6199_s10] sm:$0xf] %vm3716_vm1, %v3684_v7 }
 0x2d6   : > { %v3606_v10 = vpop.f32.mrf.mxu0 }
 0x2d7   : > { %v2424_v9 = vpop.permute.xlu1 %2423  ;;  %v3685_v13 = vpack.c.bf16 %v3606_v10, %v3606_v10  ;;  %v3751_v14 = vsel %vm3749_vm2, %v3606_v10, 0.0  ;;  %v3822_v15 = vmul.f32 %v3606_v10, %v3606_v10 }
 0x2d8   : > { %2500 = vst.msk [vmem:[#allocation2 + $0x50] sm:$0xf] %vm2479_vm13, %v2424_v9  ;;  %v3308_v12 = vpop.permute.xlu0 %3307  ;;  %v4520_v16 = vld [vmem:[#allocation2 + $0x18] sm:$0xff]  ;;  %v3752_v17 = vadd.f32 %v3751_v14, %v3750_v11  ;;  %v2999_v18 = vpop.permute.xlu2 %2998 }
 0x2d9   : > { %3391 = vst.msk [vmem:[#allocation2 + $0x34] sm:$0xf] %vm3377_vm15, %v3308_v12  ;;  %v3854_v20 = vsel %vm3749_vm2, %v3822_v15, 0.0  ;;  %4501 = vmatmul.msk.bf16.gmra.mxu0 %vm3542_vm0, %v4520_v16 }
 0x2da   : > { %3718 = vst.msk [vmem:[%s6199_s10 + $0x4] sm:$0xf] %vm3716_vm1, %v3685_v13  ;;  %v3855_v21 = vadd.f32 %v3854_v20, %v3853_v19 }
 0x2db   : > { %3061 = vst.msk [vmem:[#allocation2 + $0x50] sm:$0xf] %vm3040_vm14, %v2985_v1 }
 0x2df   : > { %v2438_v22 = vpop.permute.xlu1 %2437 }
 0x2e0   : > { %2507 = vst.msk [vmem:[#allocation2 + $0x6c] sm:$0xf] %vm2479_vm13, %v2438_v22  ;;  %v2436_v23 = vpop.permute.xlu0 %2435  ;;  %v4523_v24 = vld [vmem:[#allocation2 + $0x30] sm:$0xff]  ;;  %v3334_v26 = vpop.permute.xlu2 %3333 }
 0x2e1   : > { %2506 = vst.msk [vmem:[#allocation2 + $0x68] sm:$0xf] %vm2479_vm13, %v2436_v23  ;;  %4504 = vmatmul.msk.bf16.gmra.mxu1 %vm3542_vm0, %v4523_v24 }
 0x2e2   : > { %3068 = vst.msk [vmem:[#allocation2 + $0x6c] sm:$0xf] %vm3040_vm14, %v2999_v18 }
 0x2e6   : > { %v3609_v28 = vpop.f32.mrf.mxu0 }
 0x2e7   : > { %v2997_v27 = vpop.permute.xlu1 %2996  ;;  %v3686_v31 = vpack.c.bf16 %v3609_v28, %v3609_v28  ;;  %v3753_v32 = vsel %vm3749_vm2, %v3609_v28, 0.0  ;;  %v3823_v34 = vmul.f32 %v3609_v28, %v3609_v28 }
 0x2e8   : > { %3067 = vst.msk [vmem:[#allocation2 + $0x68] sm:$0xf] %vm3040_vm14, %v2997_v27  ;;  %v2987_v29 = vpop.permute.xlu0 %2986  ;;  %v3754_v36 = vadd.f32 %v3753_v32, %v3752_v17  ;;  %v2414_v33 = vpop.permute.xlu2 %2413 }
 0x2e9   : > { %3062 = vst.msk [vmem:[#allocation2 + $0x54] sm:$0xf] %vm3040_vm14, %v2987_v29  ;;  %v3856_v37 = vsel %vm3749_vm2, %v3823_v34, 0.0 }
 0x2ea   : > { %3719 = vst.msk [vmem:[%s6199_s10 + $0x8] sm:$0xf] %vm3716_vm1, %v3686_v31  ;;  %v3857_v35 = vadd.f32 %v3856_v37, %v3855_v21 }
 0x2eb   : > { %3404 = vst.msk [vmem:[#allocation2 + $0x68] sm:$0xf] %vm3377_vm15, %v3334_v26 }
 0x2ec   : > { %2495 = vst.msk [vmem:[#allocation2 + $0x3c] sm:$0xf] %vm2479_vm13, %v2414_v33 }
 0x2ee   : > { %v3611_v38 = vpop.f32.mrf.mxu0  ;;  %v6230_v43 = vpop.f32.mrf.mxu1 }
 0x2ef   : > { %v3324_v30 = vpop.permute.xlu1 %3323  ;;  %v3687_v40 = vpack.c.bf16 %v3611_v38, %v3611_v38  ;;  %v3755_v41 = vsel %vm3749_vm2, %v3611_v38, 0.0  ;;  %v3824_v42 = vmul.f32 %v3611_v38, %v3611_v38  ;;  %v3692_v45 = vpack.c.bf16 %v6230_v43, %v6230_v43 }
 0x2f0   : > { %3399 = vst.msk [vmem:[#allocation2 + $0x54] sm:$0xf] %vm3377_vm15, %v3324_v30  ;;  %v3322_v39 = vpop.permute.xlu0 %3321  ;;  %v3756_v44 = vadd.f32 %v3755_v41, %v3754_v36  ;;  %v3310_v46 = vpop.permute.xlu2 %3309 }
 0x2f1   : > { %3398 = vst.msk [vmem:[#allocation2 + $0x50] sm:$0xf] %vm3377_vm15, %v3322_v39  ;;  %v3858_v47 = vsel %vm3749_vm2, %v3824_v42, 0.0 }
 0x2f2   : > { %3720 = vst.msk [vmem:[%s6199_s10 + $0xc] sm:$0xf] %vm3716_vm1, %v3687_v40  ;;  %v3859_v48 = vadd.f32 %v3858_v47, %v3857_v35 }
 0x2f3   : > { %3725 = vst.msk [vmem:[%s6199_s10 + $0x20] sm:$0xf] %vm3716_vm1, %v3692_v45 }
 0x2f6   : > { %v6241_v51 = vpop.f32.mrf.mxu1 }
 0x2f7   : > { %v2412_v49 = vpop.permute.xlu1 %2411  ;;  %v3693_v54 = vpack.c.bf16 %v6241_v51, %v6241_v51 }
 0x2f8   : > { %2494 = vst.msk [vmem:[#allocation2 + $0x38] sm:$0xf] %vm2479_vm13, %v2412_v49  ;;  %v3336_v50 = vpop.permute.xlu0 %3335  ;;  %v4527_v53 = vld [vmem:[#allocation2 + $0x50] sm:$0xff]  ;;  %v2428_v56 = vpop.permute.xlu2 %2427 }
 0x2f9   : > { %3405 = vst.msk [vmem:[#allocation2 + $0x6c] sm:$0xf] %vm3377_vm15, %v3336_v50  ;;  %4508 = vmatmul.msk.bf16.gmra.mxu2 %vm3542_vm0, %v4527_v53 }
 0x2fa   : > { %2502 = vst.msk [vmem:[#allocation2 + $0x58] sm:$0xf] %vm2479_vm13, %v2428_v56 }
 0x2fb   : > { %3726 = vst.msk [vmem:[%s6199_s10 + $0x24] sm:$0xf] %vm3716_vm1, %v3693_v54 }
 0x2ff   : > { %v2975_v57 = vpop.permute.xlu1 %2974 }
 0x300   : > { %3056 = vst.msk [vmem:[#allocation2 + $0x3c] sm:$0xf] %vm3040_vm14, %v2975_v57  ;;  %v2973_v58 = vpop.permute.xlu0 %2972  ;;  %v4530_v59 = vld [vmem:[#allocation2 + $0x68] sm:$0xff]  ;;  %v2442_v60 = vpop.permute.xlu2 %2441 }
 0x301   : > { %3055 = vst.msk [vmem:[#allocation2 + $0x38] sm:$0xf] %vm3040_vm14, %v2973_v58  ;;  %4511 = vmatmul.msk.bf16.gmra.mxu3 %vm3542_vm0, %v4530_v59 }
 0x302   : > { %3392 = vst.msk [vmem:[#allocation2 + $0x38] sm:$0xf] %vm3377_vm15, %v3310_v46 }
 0x304   : > { %v6254_v61 = vpop.f32.mrf.mxu2 }
 0x305   : > { %v3700_v62 = vpack.c.bf16 %v6254_v61, %v6254_v61 }
 0x307   : > { %v2245_v63 = vpop.permute.xlu1 %2244  ;;  %3733 = vst.msk [vmem:[%s6199_s10 + $0x40] sm:$0xf] %vm3716_vm1, %v3700_v62 }
 0x308   : > { %v3312_v55 = vpop.permute.xlu0 %3311  ;;  %2312 = vst.msk [vmem:[#allocation2 + $0x74] sm:$0xf] %vm2282_vm11, %v2245_v63  ;;  %v3001_v0 = vpop.permute.xlu2 %3000 }
 0x309   : > { %3393 = vst.msk [vmem:[#allocation2 + $0x3c] sm:$0xf] %vm3377_vm15, %v3312_v55 }
 0x30a   : > { %2509 = vst.msk [vmem:[#allocation2 + $0x74] sm:$0xf] %vm2479_vm13, %v2442_v60  ;;  %v3829_v60 = vmul.f32 %v6230_v43, %v6230_v43 }
 0x30c   : > { %v6263_v2 = vpop.f32.mrf.mxu2 }
 0x30d   : > { %v3701_v25 = vpack.c.bf16 %v6263_v2, %v6263_v2 }
 0x30f   : > { %v2440_v3 = vpop.permute.xlu1 %2439  ;;  %3734 = vst.msk [vmem:[%s6199_s10 + $0x44] sm:$0xf] %vm3716_vm1, %v3701_v25 }
 0x310   : > { %v2430_v4 = vpop.permute.xlu0 %2429  ;;  %2508 = vst.msk [vmem:[#allocation2 + $0x70] sm:$0xf] %vm2479_vm13, %v2440_v3  ;;  %v4524_v52 = vld [vmem:[#allocation2 + $0x38] sm:$0xff]  ;;  %v3328_v6 = vpop.permute.xlu2 %3327 }
 0x311   : > { %2503 = vst.msk [vmem:[#allocation2 + $0x5c] sm:$0xf] %vm2479_vm13, %v2430_v4  ;;  %4505 = vmatmul.msk.bf16.gmra.mxu1 %vm3542_vm0, %v4524_v52  ;;  %v3765_v52 = vsel %vm3749_vm2, %v6230_v43, 0.0 }
 0x312   : > { %3069 = vst.msk [vmem:[#allocation2 + $0x70] sm:$0xf] %vm3040_vm14, %v3001_v0 }
 0x316   : > { %v3614_v7 = vpop.f32.mrf.mxu0 }
 0x317   : > { %v2991_v5 = vpop.permute.xlu1 %2990  ;;  %v3688_v8 = vpack.c.bf16 %v3614_v7, %v3614_v7  ;;  %v3757_v9 = vsel %vm3749_vm2, %v3614_v7, 0.0  ;;  %v3825_v10 = vmul.f32 %v3614_v7, %v3614_v7 }
 0x318   : > { %3064 = vst.msk [vmem:[#allocation2 + $0x5c] sm:$0xf] %vm3040_vm14, %v2991_v5  ;;  %v2989_v1 = vpop.permute.xlu0 %2988  ;;  %v3758_v11 = vadd.f32 %v3757_v9, %v3756_v44  ;;  %v2247_v12 = vpop.permute.xlu2 %2246  ;;  %v3767_v9 = vsel %vm3749_vm2, %v6241_v51, 0.0 }
 0x319   : > { %3063 = vst.msk [vmem:[#allocation2 + $0x58] sm:$0xf] %vm3040_vm14, %v2989_v1  ;;  %v3860_v13 = vsel %vm3749_vm2, %v3825_v10, 0.0 }
 0x31a   : > { %3721 = vst.msk [vmem:[%s6199_s10 + $0x10] sm:$0xf] %vm3716_vm1, %v3688_v8  ;;  %v3861_v14 = vadd.f32 %v3860_v13, %v3859_v48  ;;  %v3868_v8 = vsel %vm3749_vm2, %v3829_v60, 0.0 }
 0x31b   : > { %3401 = vst.msk [vmem:[#allocation2 + $0x5c] sm:$0xf] %vm3377_vm15, %v3328_v6  ;;  %v3830_v6 = vmul.f32 %v6241_v51, %v6241_v51 }
 0x31c   : > { %2313 = vst.msk [vmem:[#allocation2 + $0x78] sm:$0xf] %vm2282_vm11, %v2247_v12 }
 0x31d   : > { %v3870_v12 = vsel %vm3749_vm2, %v3830_v6, 0.0 }
 0x31e   : > { %v3616_v16 = vpop.f32.mrf.mxu0  ;;  %v6283_v21 = vpop.f32.mrf.mxu1 }
 0x31f   : > { %v3326_v15 = vpop.permute.xlu1 %3325  ;;  %v3689_v18 = vpack.c.bf16 %v3616_v16, %v3616_v16  ;;  %v3759_v19 = vsel %vm3749_vm2, %v3616_v16, 0.0  ;;  %v3826_v20 = vmul.f32 %v3616_v16, %v3616_v16  ;;  %v3694_v23 = vpack.c.bf16 %v6283_v21, %v6283_v21 }
 0x320   : > { %3400 = vst.msk [vmem:[#allocation2 + $0x58] sm:$0xf] %vm3377_vm15, %v3326_v15  ;;  %v3003_v17 = vpop.permute.xlu0 %3002  ;;  %v3760_v22 = vadd.f32 %v3759_v19, %v3758_v11  ;;  %v2446_v34 = vpop.permute.xlu2 %2445  ;;  %v3831_v10 = vmul.f32 %v6283_v21, %v6283_v21  ;;  %v3769_v13 = vsel %vm3749_vm2, %v6283_v21, 0.0 }
 0x321   : > { %3070 = vst.msk [vmem:[#allocation2 + $0x74] sm:$0xf] %vm3040_vm14, %v3003_v17  ;;  %v3862_v24 = vsel %vm3749_vm2, %v3826_v20, 0.0 }
 0x322   : > { %3722 = vst.msk [vmem:[%s6199_s10 + $0x14] sm:$0xf] %vm3716_vm1, %v3689_v18  ;;  %v3863_v26 = vadd.f32 %v3862_v24, %v3861_v14  ;;  %v3872_v18 = vsel %vm3749_vm2, %v3831_v10, 0.0 }
 0x323   : > { %3727 = vst.msk [vmem:[%s6199_s10 + $0x28] sm:$0xf] %vm3716_vm1, %v3694_v23 }
 0x326   : > { %v6294_v31 = vpop.f32.mrf.mxu1 }
 0x327   : > { %v3340_v27 = vpop.permute.xlu1 %3339  ;;  %v4528_v28 = vld [vmem:[#allocation2 + $0x58] sm:$0xff]  ;;  %v3695_v32 = vpack.c.bf16 %v6294_v31, %v6294_v31  ;;  %v3832_v14 = vmul.f32 %v6294_v31, %v6294_v31  ;;  %v3771_v51 = vsel %vm3749_vm2, %v6294_v31, 0.0 }
 0x328   : > { %3407 = vst.msk [vmem:[#allocation2 + $0x74] sm:$0xf] %vm3377_vm15, %v3340_v27  ;;  %v3338_v29 = vpop.permute.xlu0 %3337  ;;  %4509 = vmatmul.msk.bf16.gmra.mxu2 %vm3542_vm0, %v4528_v28  ;;  %v3342_v30 = vpop.permute.xlu2 %3341 }
 0x329   : > { %3406 = vst.msk [vmem:[#allocation2 + $0x70] sm:$0xf] %vm3377_vm15, %v3338_v29  ;;  %v3874_v24 = vsel %vm3749_vm2, %v3832_v14, 0.0 }
 0x32a   : > { %3728 = vst.msk [vmem:[%s6199_s10 + $0x2c] sm:$0xf] %vm3716_vm1, %v3695_v32 }
 0x32f   : > { %v2444_v36 = vpop.permute.xlu1 %2443 }
 0x330   : > { %v2249_v33 = vpop.permute.xlu0 %2248  ;;  %v4531_v37 = vld [vmem:[#allocation2 + $0x70] sm:$0xff]  ;;  %2510 = vst.msk [vmem:[#allocation2 + $0x78] sm:$0xf] %vm2479_vm13, %v2444_v36 }
 0x331   : > { %2314 = vst.msk [vmem:[#allocation2 + $0x7c] sm:$0xf] %vm2282_vm11, %v2249_v33  ;;  %4512 = vmatmul.msk.bf16.gmra.mxu3 %vm3542_vm0, %v4531_v37 }
 0x332   : > { %2511 = vst.msk [vmem:[#allocation2 + $0x7c] sm:$0xf] %vm2479_vm13, %v2446_v34 }
 0x337   : > { %v3007_v35 = vpop.permute.xlu1 %3006 }
 0x338   : > { %v3005_v38 = vpop.permute.xlu0 %3004  ;;  %3072 = vst.msk [vmem:[#allocation2 + $0x7c] sm:$0xf] %vm3040_vm14, %v3007_v35 }
 0x339   : > { %3071 = vst.msk [vmem:[#allocation2 + $0x78] sm:$0xf] %vm3040_vm14, %v3005_v38 }
 0x33a   : > { %3408 = vst.msk [vmem:[#allocation2 + $0x78] sm:$0xf] %vm3377_vm15, %v3342_v30 }
 0x33c   : > { %v6309_v39 = vpop.f32.mrf.mxu2 }
 0x33d   : > { %v3702_v40 = vpack.c.bf16 %v6309_v39, %v6309_v39 }
 0x33f   : > { %3735 = vst.msk [vmem:[%s6199_s10 + $0x48] sm:$0xf] %vm3716_vm1, %v3702_v40 }
 0x340   : > { %v3344_v41 = vpop.permute.xlu0 %3343 }
 0x341   : > { %3409 = vst.msk [vmem:[#allocation2 + $0x7c] sm:$0xf] %vm3377_vm15, %v3344_v41 }
 0x344   : > { %v6316_v42 = vpop.f32.mrf.mxu2  ;;  %v6318_v44 = vpop.f32.mrf.mxu3 }
 0x345   : > { %v3703_v45 = vpack.c.bf16 %v6316_v42, %v6316_v42  ;;  %v3708_v46 = vpack.c.bf16 %v6318_v44, %v6318_v44  ;;  %v3840_v10 = vmul.f32 %v6316_v42, %v6316_v42 }
 0x347   : > { %3736 = vst.msk [vmem:[%s6199_s10 + $0x4c] sm:$0xf] %vm3716_vm1, %v3703_v45 }
 0x348   : > { %v4532_v47 = vld [vmem:[#allocation2 + $0x78] sm:$0xff]  ;;  %3741 = vst.msk [vmem:[%s6199_s10 + $0x60] sm:$0xf] %vm3716_vm1, %v3708_v46 }
 0x349   : > { %4513 = vmatmul.msk.bf16.gmra.mxu3 %vm3542_vm0, %v4532_v47 }
 0x34c   : > { %v6329_v48 = vpop.f32.mrf.mxu3 }
 0x34d   : > { %v3709_v49 = vpack.c.bf16 %v6329_v48, %v6329_v48 }
 0x34f   : > { %3742 = vst.msk [vmem:[%s6199_s10 + $0x64] sm:$0xf] %vm3716_vm1, %v3709_v49 }
 0x356   : > { %v3619_v50 = vpop.f32.mrf.mxu0 }
 0x357   : > { %v3690_v53 = vpack.c.bf16 %v3619_v50, %v3619_v50  ;;  %v3761_v54 = vsel %vm3749_vm2, %v3619_v50, 0.0  ;;  %v3827_v56 = vmul.f32 %v3619_v50, %v3619_v50 }
 0x358   : > { %v3762_v57 = vadd.f32 %v3761_v54, %v3760_v22 }
 0x359   : > { %3723 = vst.msk [vmem:[%s6199_s10 + $0x18] sm:$0xf] %vm3716_vm1, %v3690_v53  ;;  %v3864_v58 = vsel %vm3749_vm2, %v3827_v56, 0.0 }
 0x35a   : > { %v3865_v59 = vadd.f32 %v3864_v58, %v3863_v26  ;;  %v3837_v58 = vmul.f32 %v6254_v61, %v6254_v61 }
 0x35c   : > { %v3884_v6 = vsel %vm3749_vm2, %v3837_v58, 0.0 }
 0x35e   : > { %v3621_v62 = vpop.f32.mrf.mxu0  ;;  %v3634_v63 = vpop.f32.mrf.mxu1 }
 0x35f   : > { %v3691_v55 = vpack.c.bf16 %v3621_v62, %v3621_v62  ;;  %v3763_v0 = vsel %vm3749_vm2, %v3621_v62, 0.0  ;;  %v3828_v25 = vmul.f32 %v3621_v62, %v3621_v62  ;;  %v3696_v3 = vpack.c.bf16 %v3634_v63, %v3634_v63 }
 0x360   : > { %v3764_v4 = vadd.f32 %v3763_v0, %v3762_v57  ;;  %v3833_v19 = vmul.f32 %v3634_v63, %v3634_v63  ;;  %v3773_v21 = vsel %vm3749_vm2, %v3634_v63, 0.0  ;;  %v3781_v0 = vsel %vm3749_vm2, %v6254_v61, 0.0 }
 0x361   : > { %3724 = vst.msk [vmem:[%s6199_s10 + $0x1c] sm:$0xf] %vm3716_vm1, %v3691_v55  ;;  %v3866_v5 = vsel %vm3749_vm2, %v3828_v25, 0.0  ;;  %v3838_v25 = vmul.f32 %v6263_v2, %v6263_v2 }
 0x362   : > { %v3766_v7 = vadd.f32 %v3765_v52, %v3764_v4  ;;  %v3867_v1 = vadd.f32 %v3866_v5, %v3865_v59  ;;  %3729 = vst.msk [vmem:[%s6199_s10 + $0x30] sm:$0xf] %vm3716_vm1, %v3696_v3  ;;  %v3876_v29 = vsel %vm3749_vm2, %v3833_v19, 0.0  ;;  %v3783_v5 = vsel %vm3749_vm2, %v6263_v2, 0.0 }
 0x363   : > { %v3886_v61 = vsel %vm3749_vm2, %v3838_v25, 0.0  ;;  %v3787_v2 = vsel %vm3749_vm2, %v6316_v42, 0.0 }
 0x364   : > { %v3768_v43 = vadd.f32 %v3767_v9, %v3766_v7  ;;  %v3869_v11 = vadd.f32 %v3868_v8, %v3867_v1  ;;  %v3839_v7 = vmul.f32 %v6309_v39, %v6309_v39  ;;  %v3785_v9 = vsel %vm3749_vm2, %v6309_v39, 0.0 }
 0x366   : > { %v3871_v15 = vadd.f32 %v3870_v12, %v3869_v11  ;;  %v3770_v16 = vadd.f32 %v3769_v13, %v3768_v43  ;;  %v3636_v17 = vpop.f32.mrf.mxu1  ;;  %v3888_v12 = vsel %vm3749_vm2, %v3839_v7, 0.0 }
 0x367   : > { %v3697_v20 = vpack.c.bf16 %v3636_v17, %v3636_v17  ;;  %v3834_v26 = vmul.f32 %v3636_v17, %v3636_v17  ;;  %v3775_v31 = vsel %vm3749_vm2, %v3636_v17, 0.0 }
 0x368   : > { %v3772_v22 = vadd.f32 %v3771_v51, %v3770_v16  ;;  %v3873_v23 = vadd.f32 %v3872_v18, %v3871_v15  ;;  %v3890_v16 = vsel %vm3749_vm2, %v3840_v10, 0.0 }
 0x369   : > { %3730 = vst.msk [vmem:[%s6199_s10 + $0x34] sm:$0xf] %vm3716_vm1, %v3697_v20  ;;  %v3878_v36 = vsel %vm3749_vm2, %v3834_v26, 0.0 }
 0x36a   : > { %v3774_v27 = vadd.f32 %v3773_v21, %v3772_v22  ;;  %v3875_v28 = vadd.f32 %v3874_v24, %v3873_v23 }
 0x36c   : > { %v3877_v32 = vadd.f32 %v3876_v29, %v3875_v28  ;;  %v3776_v34 = vadd.f32 %v3775_v31, %v3774_v27 }
 0x36e   : > { %v3879_v33 = vadd.f32 %v3878_v36, %v3877_v32 }
 0x37c   : > { %v3654_v37 = vpop.f32.mrf.mxu2 }
 0x37d   : > { %v3704_v35 = vpack.c.bf16 %v3654_v37, %v3654_v37  ;;  %v3841_v13 = vmul.f32 %v3654_v37, %v3654_v37  ;;  %v3789_v17 = vsel %vm3749_vm2, %v3654_v37, 0.0 }
 0x37f   : > { %3737 = vst.msk [vmem:[%s6199_s10 + $0x50] sm:$0xf] %vm3716_vm1, %v3704_v35  ;;  %v3892_v51 = vsel %vm3749_vm2, %v3841_v13, 0.0 }
 0x384   : > { %v3656_v30 = vpop.f32.mrf.mxu2  ;;  %v6373_v38 = vpop.f32.mrf.mxu3 }
 0x385   : > { %v3705_v40 = vpack.c.bf16 %v3656_v30, %v3656_v30  ;;  %v3710_v41 = vpack.c.bf16 %v6373_v38, %v6373_v38  ;;  %v3842_v23 = vmul.f32 %v3656_v30, %v3656_v30  ;;  %v3791_v42 = vsel %vm3749_vm2, %v3656_v30, 0.0 }
 0x387   : > { %3738 = vst.msk [vmem:[%s6199_s10 + $0x54] sm:$0xf] %vm3716_vm1, %v3705_v40  ;;  %v3894_v27 = vsel %vm3749_vm2, %v3842_v23, 0.0 }
 0x388   : > { %3743 = vst.msk [vmem:[%s6199_s10 + $0x68] sm:$0xf] %vm3716_vm1, %v3710_v41 }
 0x38c   : > { %v6381_v45 = vpop.f32.mrf.mxu3 }
 0x38d   : > { %v3711_v46 = vpack.c.bf16 %v6381_v45, %v6381_v45 }
 0x38e   : > { %v3639_v47 = vpop.f32.mrf.mxu1 }
 0x38f   : > { %3744 = vst.msk [vmem:[%s6199_s10 + $0x6c] sm:$0xf] %vm3716_vm1, %v3711_v46  ;;  %v3698_v49 = vpack.c.bf16 %v3639_v47, %v3639_v47  ;;  %v3835_v50 = vmul.f32 %v3639_v47, %v3639_v47  ;;  %v3777_v53 = vsel %vm3749_vm2, %v3639_v47, 0.0  ;;  %v3797_v46 = vsel %vm3749_vm2, %v6318_v44, 0.0 }
 0x390   : > { %v3778_v56 = vadd.f32 %v3777_v53, %v3776_v34  ;;  %v3845_v34 = vmul.f32 %v6318_v44, %v6318_v44  ;;  %v3846_v47 = vmul.f32 %v6329_v48, %v6329_v48 }
 0x391   : > { %3731 = vst.msk [vmem:[%s6199_s10 + $0x38] sm:$0xf] %vm3716_vm1, %v3698_v49  ;;  %v3880_v54 = vsel %vm3749_vm2, %v3835_v50, 0.0 }
 0x392   : > { %v3881_v63 = vadd.f32 %v3880_v54, %v3879_v33  ;;  %v3900_v54 = vsel %vm3749_vm2, %v3845_v34, 0.0 }
 0x396   : > { %v3641_v57 = vpop.f32.mrf.mxu1 }
 0x397   : > { %v3699_v59 = vpack.c.bf16 %v3641_v57, %v3641_v57  ;;  %v3779_v60 = vsel %vm3749_vm2, %v3641_v57, 0.0  ;;  %v3836_v62 = vmul.f32 %v3641_v57, %v3641_v57  ;;  %v3847_v57 = vmul.f32 %v6373_v38, %v6373_v38 }
 0x398   : > { %v3780_v55 = vadd.f32 %v3779_v60, %v3778_v56  ;;  %v3799_v56 = vsel %vm3749_vm2, %v6329_v48, 0.0  ;;  %v3801_v60 = vsel %vm3749_vm2, %v6373_v38, 0.0  ;;  %v3803_v48 = vsel %vm3749_vm2, %v6381_v45, 0.0 }
 0x399   : > { %3732 = vst.msk [vmem:[%s6199_s10 + $0x3c] sm:$0xf] %vm3716_vm1, %v3699_v59  ;;  %v3882_v3 = vsel %vm3749_vm2, %v3836_v62, 0.0  ;;  %v3902_v59 = vsel %vm3749_vm2, %v3846_v47, 0.0  ;;  %v3848_v62 = vmul.f32 %v6381_v45, %v6381_v45 }
 0x39a   : > { %v3782_v4 = vadd.f32 %v3781_v0, %v3780_v55  ;;  %v3883_v52 = vadd.f32 %v3882_v3, %v3881_v63  ;;  %v3904_v0 = vsel %vm3749_vm2, %v3847_v57, 0.0 }
 0x39c   : > { %v3784_v1 = vadd.f32 %v3783_v5, %v3782_v4  ;;  %v3885_v8 = vadd.f32 %v3884_v6, %v3883_v52  ;;  %v3906_v6 = vsel %vm3749_vm2, %v3848_v62, 0.0 }
 0x39e   : > { %v3786_v43 = vadd.f32 %v3785_v9, %v3784_v1  ;;  %v3887_v11 = vadd.f32 %v3886_v61, %v3885_v8 }
 0x3a0   : > { %v3889_v14 = vadd.f32 %v3888_v12, %v3887_v11  ;;  %v3788_v15 = vadd.f32 %v3787_v2, %v3786_v43 }
 0x3a2   : > { %v3790_v18 = vadd.f32 %v3789_v17, %v3788_v15  ;;  %v3891_v39 = vadd.f32 %v3890_v16, %v3889_v14 }
 0x3a4   : > { %v3893_v19 = vadd.f32 %v3892_v51, %v3891_v39  ;;  %v3792_v26 = vadd.f32 %v3791_v42, %v3790_v18 }
 0x3a6   : > { %v3895_v31 = vadd.f32 %v3894_v27, %v3893_v19 }
 0x3ab   : > { %v3659_v20 = vpop.f32.mrf.mxu2 }
 0x3ac   : > { %v3706_v22 = vpack.c.bf16 %v3659_v20, %v3659_v20  ;;  %v3843_v24 = vmul.f32 %v3659_v20, %v3659_v20  ;;  %v3793_v21 = vsel %vm3749_vm2, %v3659_v20, 0.0 }
 0x3ad   : > { %v3794_v29 = vadd.f32 %v3793_v21, %v3792_v26 }
 0x3ae   : > { %3739 = vst.msk [vmem:[%s6199_s10 + $0x58] sm:$0xf] %vm3716_vm1, %v3706_v22  ;;  %v3896_v28 = vsel %vm3749_vm2, %v3843_v24, 0.0 }
 0x3af   : > { %v3897_v30 = vadd.f32 %v3896_v28, %v3895_v31 }
 0x3b3   : > { %v3661_v32 = vpop.f32.mrf.mxu2 }
 0x3b4   : > { %v3707_v36 = vpack.c.bf16 %v3661_v32, %v3661_v32  ;;  %v3795_v33 = vsel %vm3749_vm2, %v3661_v32, 0.0  ;;  %v3844_v37 = vmul.f32 %v3661_v32, %v3661_v32  ;;  %v3674_v35 = vpop.f32.mrf.mxu3 }
 0x3b5   : > { %v3796_v40 = vadd.f32 %v3795_v33, %v3794_v29  ;;  %v3712_v41 = vpack.c.bf16 %v3674_v35, %v3674_v35  ;;  %v3849_v38 = vmul.f32 %v3674_v35, %v3674_v35  ;;  %v3805_v1 = vsel %vm3749_vm2, %v3674_v35, 0.0 }
 0x3b6   : > { %3740 = vst.msk [vmem:[%s6199_s10 + $0x5c] sm:$0xf] %vm3716_vm1, %v3707_v36  ;;  %v3898_v49 = vsel %vm3749_vm2, %v3844_v37, 0.0 }
 0x3b7   : > { %v3798_v50 = vadd.f32 %v3797_v46, %v3796_v40  ;;  %v3899_v53 = vadd.f32 %v3898_v49, %v3897_v30  ;;  %3745 = vst.msk [vmem:[%s6199_s10 + $0x70] sm:$0xf] %vm3716_vm1, %v3712_v41  ;;  %v3908_v9 = vsel %vm3749_vm2, %v3849_v38, 0.0 }
 0x3b9   : > { %v3800_v44 = vadd.f32 %v3799_v56, %v3798_v50  ;;  %v3901_v58 = vadd.f32 %v3900_v54, %v3899_v53 }
 0x3bb   : > { %v3903_v63 = vadd.f32 %v3902_v59, %v3901_v58  ;;  %v3802_v55 = vadd.f32 %v3801_v60, %v3800_v44 }
 0x3bc   : > { %v3676_v25 = vpop.f32.mrf.mxu3 }
 0x3bd   : > { %v3804_v3 = vadd.f32 %v3803_v48, %v3802_v55  ;;  %v3905_v4 = vadd.f32 %v3904_v0, %v3903_v63  ;;  %v3713_v52 = vpack.c.bf16 %v3676_v25, %v3676_v25  ;;  %v3850_v10 = vmul.f32 %v3676_v25, %v3676_v25 }
 0x3be   : > { %v3807_v11 = vsel %vm3749_vm2, %v3676_v25, 0.0 }
 0x3bf   : > { %v3907_v5 = vadd.f32 %v3906_v6, %v3905_v4  ;;  %3746 = vst.msk [vmem:[%s6199_s10 + $0x74] sm:$0xf] %vm3716_vm1, %v3713_v52  ;;  %v3806_v61 = vadd.f32 %v3805_v1, %v3804_v3  ;;  %v3910_v13 = vsel %vm3749_vm2, %v3850_v10, 0.0 }
 0x3c1   : > { %v3909_v43 = vadd.f32 %v3908_v9, %v3907_v5  ;;  %v3808_v2 = vadd.f32 %v3807_v11, %v3806_v61 }
 0x3c3   : > { %v3911_v15 = vadd.f32 %v3910_v13, %v3909_v43 }
 0x3cc   : > { %v3679_v7 = vpop.f32.mrf.mxu3 }
 0x3cd   : > { %v3714_v8 = vpack.c.bf16 %v3679_v7, %v3679_v7  ;;  %v3851_v45 = vmul.f32 %v3679_v7, %v3679_v7  ;;  %v3809_v12 = vsel %vm3749_vm2, %v3679_v7, 0.0 }
 0x3ce   : > { %v3810_v16 = vadd.f32 %v3809_v12, %v3808_v2 }
 0x3cf   : > { %3747 = vst.msk [vmem:[%s6199_s10 + $0x78] sm:$0xf] %vm3716_vm1, %v3714_v8  ;;  %v3912_v14 = vsel %vm3749_vm2, %v3851_v45, 0.0 }
 0x3d0   : > { %v3913_v19 = vadd.f32 %v3912_v14, %v3911_v15 }
 0x3d4   : > { %v3681_v17 = vpop.f32.mrf.mxu3 }
 0x3d5   : > { %v3715_v18 = vpack.c.bf16 %v3681_v17, %v3681_v17  ;;  %v3811_v39 = vsel %vm3749_vm2, %v3681_v17, 0.0  ;;  %v3852_v51 = vmul.f32 %v3681_v17, %v3681_v17 }
 0x3d6   : > { %v3812_v20 = vadd.f32 %v3811_v39, %v3810_v16 }
 0x3d7   : > { %3748 = vst.msk [vmem:[%s6199_s10 + $0x7c] sm:$0xf] %vm3716_vm1, %v3715_v18  ;;  %v3914_v22 = vsel %vm3749_vm2, %v3852_v51, 0.0 }
 0x3d8   : > { %v3813_v23 = vrot.slane %v3812_v20, 4  ;;  %v3915_v24 = vadd.f32 %v3914_v22, %v3913_v19 }
 0x3da   : > { %v3814_v42 = vadd.f32 %v3813_v23, %v3812_v20  ;;  %v3916_v21 = vrot.slane %v3915_v24, 4 }
 0x3dc   : > { %v3815_v26 = vrot.slane %v3814_v42, 2  ;;  %v3917_v27 = vadd.f32 %v3916_v21, %v3915_v24 }
 0x3de   : > { %v3816_v28 = vadd.f32 %v3815_v26, %v3814_v42  ;;  %v3918_v29 = vrot.slane %v3917_v27, 2 }
 0x3e0   : > { %v3817_v31 = vrot.slane %v3816_v28, 1  ;;  %v3919_v32 = vadd.f32 %v3918_v29, %v3917_v27 }
 0x3e2   : > { %v3818_v34 = vadd.f32 %v3817_v31, %v3816_v28  ;;  %v3920_v36 = vrot.slane %v3919_v32, 1 }
 0x3e4   : > { %3820 = vst.msk [vmem:[%s223_s24] sm:$0x1] %vm3819_vm3, %v3818_v34  ;;  %v3921_v33 = vadd.f32 %v3920_v36, %v3919_v32 }
 0x3e5   : > { %4640 = shalt.err (!%p4637_p5)
}
 0x3e6   : > { %4545 = dma.vmem_to_hbm [thread:$0]  (%p4798_p4), %s3954_s26, 16, %s3956_s30, %s3934_s18   ;;  %3922 = vst.msk [vmem:[%s229_s5] sm:$0x1] %vm3819_vm3, %v3921_v33 }
 0x3e7   : > { %s3938_s21 = scalar_lea.sflag [#allocation6], %s6464_s29  ;;  %s4655_s22 = sshra.s32 %s3970_s7, 4  ;;  %s4656_s22 = int_to_ptr.hbm [resolvable:$true] %s4655_s22 }
 0x3e8   : > { %s4657_s24 = scalar_lea.hbm %s4656_s22, 1  ;;  %s4661_s10 = scalar_lea.hbm %s6544_s4, 2 }
 0x3e9   : > { %p4658_p6 = scmp.ne.s32.totalorder %s4656_s22, %s4657_s24  ;;  %p4662_p10 = scmp.lt.s32.totalorder %s4656_s22, %s6544_s4 }
 0x3ea   : > { %p4663_p11 = scmp.lt.s32.totalorder %s4661_s10, %s4657_s24 }
 0x3eb   : > { %p4659_p7 = pnand %p4658_p6, %p4798_p4 }
 0x3ec   : > { %p4664_p12 = por %p4663_p11, %p4662_p10 }
 0x3ed   : > { %p4660_p9 = pneg %p4659_p7 }
 0x3ef   : > { %p4665_p13 = pnand %p4664_p12, %p4660_p9 }
 0x3f1   : > { %4668 = shalt.err (!%p4665_p13)
}
 0x3f2   : > { %4546 = dma.vmem_to_hbm [thread:$0]  (%p4798_p4), %s3968_s6, 16, %s3970_s7, %s3938_s21  }
 0x3f3 PF: > { %p4556_p0 = scmp.ge.s32.totalorder %s4723_s20, 2  ;;  %s3994_s29 = sand.u32 1, %s4703_s15  }
 0x3f4   : > { %s3995_s26 = scalar_lea.sflag [#allocation4], %s3994_s29 }
 0x3f5   : > { %p4550_p1 = pnand %p4556_p0, %p4805_p8 }
 0x3f7   : > { %p4551_p2 = pneg %p4550_p1 }
 0x3f9   : > { %4694 = dma.done.wait (%p4551_p2), %s3995_s26, 16  }
 0x3fa   : > { %4696 = vsyncadd (%p4551_p2), %s3995_s26, 4294967280  ;;  %s4004_s30 = scalar_lea.sflag [#allocation6], %s3994_s29 }
 0x3fb   : > { %4698 = dma.done.wait (%p4551_p2), %s4004_s30, 16  }
 0x3fc   : > { %4700 = vsyncadd (%p4551_p2), %s4004_s30, 4294967280  ;;  %s21_s20 = sadd.s32 1, %s4723_s20   ;;  %s6551_s15 = smov %s4707_s16 }
 0x3fd   : > { %p18_p3 = scmp.ge.s32.totalorder %s21_s20, 4   ;;  %s6552_s16 = smov %s4711_s17 }
 0x3fe   : > { %s6553_s17 = smov %s4811_s28  ;;  %s6554_s18 = smov %s4719_s19 }
 0x3ff   : > { %s6555_s19 = smov %s6557_s23  ;;  %20 = sbr.rel (!%p18_p3) target bundleno = 6 (0x6), region = 95 }
 0x404   :  { %4009 = vsyncpa [#allocation4], 1 }
 0x405   :  { %4011 = vsyncpa [#allocation4 + $0x1], 1 }
 0x406   :  { %4012 = vsyncpa [#allocation6], 1 }
 0x407   :  { %4014 = vsyncpa [#allocation6 + $0x1], 1 }

</bundles_post_ra>
